<compile_context>
chip_gen: v7x
topology: tpu7x:2x2x1
jax: 0.10.0
libtpu: 0.0.40
codegen_flags: <defaults>
</compile_context>

<pallas_src>
import functools

import jax
import jax.numpy as jnp
from jax.experimental import pallas as pl
from jax.experimental.pallas import tpu as pltpu

KERNEL_SIZE = 7
PAD = 3  # padding = 3 for kernel_size 7


# ---------------------------------------------------------------------------
# VMEM budgeting helpers (padded footprints, per-generation limits).
# ---------------------------------------------------------------------------
def _vmem_capacity_bytes():
    try:
        return int(pltpu.get_tpu_info().vmem_capacity_bytes)
    except Exception:
        return 64 * 1024 * 1024  # conservative default (v7x per-core VMEM)


def _padded_tile_bytes(rows, lanes, dtype, leading=1):
    """VMEM footprint of a (leading, rows, lanes) tile with TPU tiling padding."""
    itemsize = jnp.dtype(dtype).itemsize
    sub = max(8, 8 * (4 // max(itemsize, 1)))      # f32: 8, bf16: 16, int8: 32
    r = ((rows + sub - 1) // sub) * sub
    l = ((lanes + 127) // 128) * 128
    return leading * r * l * itemsize


def _choose_c_tile(C, HW, dtype, budget_bytes):
    """Largest channel tile that (a) divides C, (b) is a multiple of 8
    (hard (8,128) BlockSpec rule) unless it equals C, (c) keeps the padded
    (tc, HW) block under budget.  Prefers multiples of 16 for bf16 packing."""
    itemsize = jnp.dtype(dtype).itemsize
    pref = 16 if itemsize == 2 else 8
    if _padded_tile_bytes(C, HW, dtype) <= budget_bytes:
        return C
    cands = [t for t in range(C - 1, 0, -1)
             if C % t == 0 and t % 8 == 0
             and _padded_tile_bytes(t, HW, dtype) <= budget_bytes]
    for t in cands:
        if t % pref == 0:
            return t
    if cands:
        return cands[0]
    # Rare fallback (small / awkward C with huge HW): run untiled.
    return C


# ---------------------------------------------------------------------------
# Shared in-kernel pieces: padded-map fill, 7x7 conv + sigmoid.
# ---------------------------------------------------------------------------
def _fill_padded(pad_ref, mean_vec, max_vec, H, W):
    """pad_ref: VMEM (2, H+6, W+6) f32; mean_vec/max_vec: (H*W,) f32 values."""
    pad_ref[...] = jnp.zeros_like(pad_ref)
    for h in range(H):
        pad_ref[0, PAD + h, PAD:PAD + W] = mean_vec[h * W:(h + 1) * W]
        pad_ref[1, PAD + h, PAD:PAD + W] = max_vec[h * W:(h + 1) * W]


def _conv7x7_sigmoid(w_ref, pad_ref, attn_ref, H, W):
    """attn_ref[0, :] <- sigmoid(conv2d([mean, max], W7x7)) flattened to (H*W,).

    w_ref: SMEM (2*7*7,) f32 (OIHW flattened, out-channel squeezed).
    Taps: one lane-shifted copy per (channel, kw) — 14 lane-offset reads — and
    cheap sublane slices across kh; 4 accumulators break the FP-add chain."""
    K = KERNEL_SIZE
    accs = [jnp.zeros((H, W), jnp.float32) for _ in range(4)]
    t = 0
    for c in range(2):
        for kw in range(K):
            col = pad_ref[c, :, kw:kw + W]                 # (H+6, W), one lane shift
            for kh in range(K):
                wv = w_ref[c * K * K + kh * K + kw]        # scalar from SMEM
                accs[t % 4] = accs[t % 4] + wv * col[kh:kh + H, :]
                t += 1
    y = (accs[0] + accs[1]) + (accs[2] + accs[3])
    sig = jax.nn.sigmoid(y)                                # (H, W)
    for h in range(H):
        attn_ref[0, h * W:(h + 1) * W] = sig[h, :]


# ---------------------------------------------------------------------------
# Fused single-pass kernel: reduce -> conv -> sigmoid -> multiply, grid=(B,).
# ---------------------------------------------------------------------------
def _fused_kernel(w_ref, x_ref, o_ref, pad_ref, attn_ref, *, inv_c, H, W):
    xt = x_ref[0]                                          # (C, HW)
    mean = jnp.sum(xt.astype(jnp.float32), axis=0) * inv_c
    mx = jnp.max(xt, axis=0).astype(jnp.float32)
    _fill_padded(pad_ref, mean, mx, H, W)
    _conv7x7_sigmoid(w_ref, pad_ref, attn_ref, H, W)
    attn = attn_ref[0, :]                                  # (HW,) f32
    o_ref[0] = xt * attn.astype(xt.dtype)[None, :]


# ---------------------------------------------------------------------------
# Tiled pass A: channel mean / max, lane-dense (B, C, H*W), C tiled reduction.
# ---------------------------------------------------------------------------
def _reduce_kernel(x_ref, s_ref, *, HW, inv_c):
    ct = pl.program_id(1)

    @pl.when(ct == 0)
    def _():
        s_ref[0, 0, :] = jnp.zeros((HW,), jnp.float32)
        s_ref[0, 1, :] = jnp.full((HW,), -jnp.inf, jnp.float32)

    xt = x_ref[0]                                          # (tc, HW)
    s_ref[0, 0, :] = s_ref[0, 0, :] + jnp.sum(xt.astype(jnp.float32), axis=0)
    s_ref[0, 1, :] = jnp.maximum(s_ref[0, 1, :],
                                 jnp.max(xt, axis=0).astype(jnp.float32))

    @pl.when(ct == pl.num_programs(1) - 1)
    def _():
        s_ref[0, 0, :] = s_ref[0, 0, :] * inv_c


# ---------------------------------------------------------------------------
# Tiled pass C: recompute conv + sigmoid from stats, multiply into x tile.
# ---------------------------------------------------------------------------
def _mul_conv_kernel(w_ref, s_ref, x_ref, o_ref, pad_ref, attn_ref, *, H, W):
    # s_ref: (1, 2, HW) f32 stats; x_ref/o_ref: (1, tc, HW).  The 98-tap conv
    # is ~98*H*W VPU flops — hidden under the HBM-bound tile read + write.
    _fill_padded(pad_ref, s_ref[0, 0, :], s_ref[0, 1, :], H, W)
    _conv7x7_sigmoid(w_ref, pad_ref, attn_ref, H, W)
    attn = attn_ref[0, :]
    o_ref[0] = x_ref[0] * attn.astype(x_ref.dtype)[None, :]


# ---------------------------------------------------------------------------
# Wrapper / dispatch.
# ---------------------------------------------------------------------------
@functools.partial(jax.jit, static_argnames=("force_tiled",))
def spatial_attention(x, conv_weight, force_tiled=False):
    """x: (B, C, H, W); conv_weight: (1, 2, 7, 7) f32 (PyTorch OIHW layout)."""
    B, C, H, W = x.shape
    HW = H * W
    w_flat = conv_weight.reshape(-1).astype(jnp.float32)   # (2*7*7,)
    x3 = x.reshape(B, C, HW)                               # lane-dense view

    cap = _vmem_capacity_bytes()
    # ~40 MiB usable on v7x (64 MiB physical), ~96 MiB on v5e/v6e (128 MiB).
    usable = int(max(16 * 1024 * 1024,
                     min((3 * cap) // 4, cap - 24 * 1024 * 1024)))

    pad_scratch = pltpu.VMEM((2, H + 2 * PAD, W + 2 * PAD), jnp.float32)
    attn_scratch = pltpu.VMEM((1, HW), jnp.float32)
    pad_bytes = _padded_tile_bytes(H + 2 * PAD, W + 2 * PAD, jnp.float32, leading=2)
    attn_bytes = _padded_tile_bytes(1, HW, jnp.float32)

    slab = _padded_tile_bytes(C, HW, x.dtype)
    slab_f32 = _padded_tile_bytes(C, HW, jnp.float32)
    # in + out double-buffered, one f32 compute temp, scratch, slack.
    fused_need = 4 * slab + slab_f32 + pad_bytes + attn_bytes + (2 << 20)

    if fused_need <= usable and not force_tiled:
        out3 = pl.pallas_call(
            functools.partial(_fused_kernel, inv_c=1.0 / C, H=H, W=W),
            out_shape=jax.ShapeDtypeStruct((B, C, HW), x.dtype),
            grid=(B,),
            in_specs=[
                pl.BlockSpec(memory_space=pltpu.MemorySpace.SMEM),   # weights
                pl.BlockSpec((1, C, HW), lambda b: (b, 0, 0)),       # x slab
            ],
            out_specs=pl.BlockSpec((1, C, HW), lambda b: (b, 0, 0)),
            scratch_shapes=[pad_scratch, attn_scratch],
            compiler_params=pltpu.CompilerParams(
                dimension_semantics=("parallel",),
                vmem_limit_bytes=usable),
        )(w_flat, x3)
        return out3.reshape(B, C, H, W)

    # ---- Tiled two-pass fallback -----------------------------------------
    # Larger tiles on 128-MiB-VMEM chips (v5e/v6e), ~4 MiB padded on v7x.
    tile_budget = (4 << 20) if cap <= (64 << 20) else (12 << 20)
    tc = _choose_c_tile(C, HW, x.dtype, tile_budget)
    n_ct = C // tc

    stats = pl.pallas_call(
        functools.partial(_reduce_kernel, HW=HW, inv_c=1.0 / C),
        out_shape=jax.ShapeDtypeStruct((B, 2, HW), jnp.float32),
        grid=(B, n_ct),
        in_specs=[pl.BlockSpec((1, tc, HW), lambda b, c: (b, c, 0))],
        out_specs=pl.BlockSpec((1, 2, HW), lambda b, c: (b, 0, 0)),
        compiler_params=pltpu.CompilerParams(
            dimension_semantics=("parallel", "arbitrary"),
            vmem_limit_bytes=usable),
    )(x3)

    out3 = pl.pallas_call(
        functools.partial(_mul_conv_kernel, H=H, W=W),
        out_shape=jax.ShapeDtypeStruct((B, C, HW), x.dtype),
        grid=(B, n_ct),
        in_specs=[
            pl.BlockSpec(memory_space=pltpu.MemorySpace.SMEM),       # weights
            pl.BlockSpec((1, 2, HW), lambda b, c: (b, 0, 0)),        # stats
            pl.BlockSpec((1, tc, HW), lambda b, c: (b, c, 0)),       # x tile
        ],
        out_specs=pl.BlockSpec((1, tc, HW), lambda b, c: (b, c, 0)),
        scratch_shapes=[pad_scratch, attn_scratch],
        compiler_params=pltpu.CompilerParams(
            dimension_semantics=("parallel", "parallel"),
            vmem_limit_bytes=usable),
    )(w_flat, stats, x3)
    return out3.reshape(B, C, H, W)


def _reference(x, conv_weight):
    """Pure-JAX reference matching the PyTorch forward."""
    avg = jnp.mean(x, axis=1, keepdims=True)
    mx = jnp.max(x, axis=1, keepdims=True)
    y = jnp.concatenate([avg, mx], axis=1)                 # (B, 2, H, W)
    y = jax.lax.conv_general_dilated(
        y, conv_weight,
        window_strides=(1, 1), padding=[(PAD, PAD), (PAD, PAD)],
        dimension_numbers=("NCHW", "OIHW", "NCHW"))
    return jax.nn.sigmoid(y) * x


if __name__ == "__main__":
    key = jax.random.PRNGKey(0)
    kx, kw = jax.random.split(key)

    B, C, H, W = 2, 4, 16, 16
    x = jax.random.normal(kx, (B, C, H, W), dtype=jnp.float32)

    # Deterministic conv1 weights: nn.Conv2d(2, 1, 7, padding=3, bias=False)
    fan_in = 2 * KERNEL_SIZE * KERNEL_SIZE
    bound = (1.0 / fan_in) ** 0.5
    conv_weight = jax.random.uniform(
        kw, (1, 2, KERNEL_SIZE, KERNEL_SIZE),
        minval=-bound, maxval=bound, dtype=jnp.float32)

    ref = jax.block_until_ready(_reference(x, conv_weight))

    # Fused single-pass path (used for this shape).
    out_fused = jax.block_until_ready(spatial_attention(x, conv_weight))
    assert out_fused.shape == (B, C, H, W)
    assert jnp.allclose(out_fused, ref, atol=1e-5, rtol=1e-5), "fused path mismatch"

    # Tiled two-pass fallback path (forced, to keep it tested too).
    out_tiled = jax.block_until_ready(
        spatial_attention(x, conv_weight, force_tiled=True))
    assert jnp.allclose(out_tiled, ref, atol=1e-5, rtol=1e-5), "tiled path mismatch"

    print("KERNEL_OK")
</pallas_src>

<mosaic_0001>
module attributes {stable_mosaic.version = 11 : i64} {
  func.func @_fused_kernel(%arg0: i32, %arg1: memref<98xf32, #tpu.memory_space<smem>>, %arg2: memref<1x4x256xf32, #tpu.memory_space<vmem>>, %arg3: memref<1x4x256xf32, #tpu.memory_space<vmem>>, %arg4: memref<2x22x22xf32, #tpu.memory_space<vmem>>, %arg5: memref<1x256xf32, #tpu.memory_space<vmem>>) attributes {dimension_semantics = [#tpu.dimension_semantics<parallel>], iteration_bounds = array<i64: 2>, scalar_prefetch = 0 : i64, scratch_operands = 2 : i64, tpu.core_type = #tpu.core_type<tc>, window_params = [{transform_indices = @transform_0, window_bounds = array<i64: 98>}, {transform_indices = @transform_1, window_bounds = array<i64: 1, 4, 256>}, {transform_indices = @transform_2, window_bounds = array<i64: 1, 4, 256>}]} {
    %c0 = arith.constant 0 : index
    %c0_0 = arith.constant 0 : index
    %c0_1 = arith.constant 0 : index
    %0 = vector.load %arg2[%c0, %c0_0, %c0_1] : memref<1x4x256xf32, #tpu.memory_space<vmem>>, vector<1x4x256xf32>
    %1 = vector.shape_cast %0 : vector<1x4x256xf32> to vector<4x256xf32>
    %cst = arith.constant dense<0.000000e+00> : vector<256xf32>
    %2 = vector.multi_reduction <add>, %1, %cst [0] : vector<4x256xf32> to vector<256xf32>
    %cst_2 = arith.constant 2.500000e-01 : f32
    %3 = vector.broadcast %cst_2 : f32 to vector<256xf32>
    %4 = arith.mulf %2, %3 : vector<256xf32>
    %cst_3 = arith.constant dense<0xFF800000> : vector<256xf32>
    %5 = vector.multi_reduction <maximumf>, %1, %cst_3 [0] : vector<4x256xf32> to vector<256xf32>
    %cst_4 = arith.constant 0.000000e+00 : f32
    %6 = vector.broadcast %cst_4 : f32 to vector<2x22x22xf32>
    %c0_5 = arith.constant 0 : index
    %c0_6 = arith.constant 0 : index
    %c0_7 = arith.constant 0 : index
    %7 = vector.load %arg4[%c0_5, %c0_6, %c0_7] : memref<2x22x22xf32, #tpu.memory_space<vmem>>, vector<2x22x22xf32>
    tpu.vector_store %arg4[%c0_5, %c0_6, %c0_7], %6 {strides = array<i32>} : memref<2x22x22xf32, #tpu.memory_space<vmem>>, vector<2x22x22xf32>,
    %8 = vector.extract_strided_slice %4 {offsets = [0], sizes = [16], strides = [1]} : vector<256xf32> to vector<16xf32>
    %c0_8 = arith.constant 0 : index
    %c3 = arith.constant 3 : index
    %c3_9 = arith.constant 3 : index
    %9 = vector.load %arg4[%c0_8, %c3, %c3_9] : memref<2x22x22xf32, #tpu.memory_space<vmem>>, vector<1x1x16xf32>
    %10 = vector.shape_cast %9 : vector<1x1x16xf32> to vector<16xf32>
    %11 = vector.shape_cast %8 : vector<16xf32> to vector<1x1x16xf32>
    tpu.vector_store %arg4[%c0_8, %c3, %c3_9], %11 {strides = array<i32>} : memref<2x22x22xf32, #tpu.memory_space<vmem>>, vector<1x1x16xf32>,
    %12 = vector.extract_strided_slice %5 {offsets = [0], sizes = [16], strides = [1]} : vector<256xf32> to vector<16xf32>
    %c1 = arith.constant 1 : index
    %c3_10 = arith.constant 3 : index
    %c3_11 = arith.constant 3 : index
    %13 = vector.load %arg4[%c1, %c3_10, %c3_11] : memref<2x22x22xf32, #tpu.memory_space<vmem>>, vector<1x1x16xf32>
    %14 = vector.shape_cast %13 : vector<1x1x16xf32> to vector<16xf32>
    %15 = vector.shape_cast %12 : vector<16xf32> to vector<1x1x16xf32>
    tpu.vector_store %arg4[%c1, %c3_10, %c3_11], %15 {strides = array<i32>} : memref<2x22x22xf32, #tpu.memory_space<vmem>>, vector<1x1x16xf32>,
    %16 = vector.extract_strided_slice %4 {offsets = [16], sizes = [16], strides = [1]} : vector<256xf32> to vector<16xf32>
    %c0_12 = arith.constant 0 : index
    %c4 = arith.constant 4 : index
    %c3_13 = arith.constant 3 : index
    %17 = vector.load %arg4[%c0_12, %c4, %c3_13] : memref<2x22x22xf32, #tpu.memory_space<vmem>>, vector<1x1x16xf32>
    %18 = vector.shape_cast %17 : vector<1x1x16xf32> to vector<16xf32>
    %19 = vector.shape_cast %16 : vector<16xf32> to vector<1x1x16xf32>
    tpu.vector_store %arg4[%c0_12, %c4, %c3_13], %19 {strides = array<i32>} : memref<2x22x22xf32, #tpu.memory_space<vmem>>, vector<1x1x16xf32>,
    %20 = vector.extract_strided_slice %5 {offsets = [16], sizes = [16], strides = [1]} : vector<256xf32> to vector<16xf32>
    %c1_14 = arith.constant 1 : index
    %c4_15 = arith.constant 4 : index
    %c3_16 = arith.constant 3 : index
    %21 = vector.load %arg4[%c1_14, %c4_15, %c3_16] : memref<2x22x22xf32, #tpu.memory_space<vmem>>, vector<1x1x16xf32>
    %22 = vector.shape_cast %21 : vector<1x1x16xf32> to vector<16xf32>
    %23 = vector.shape_cast %20 : vector<16xf32> to vector<1x1x16xf32>
    tpu.vector_store %arg4[%c1_14, %c4_15, %c3_16], %23 {strides = array<i32>} : memref<2x22x22xf32, #tpu.memory_space<vmem>>, vector<1x1x16xf32>,
    %24 = vector.extract_strided_slice %4 {offsets = [32], sizes = [16], strides = [1]} : vector<256xf32> to vector<16xf32>
    %c0_17 = arith.constant 0 : index
    %c5 = arith.constant 5 : index
    %c3_18 = arith.constant 3 : index
    %25 = vector.load %arg4[%c0_17, %c5, %c3_18] : memref<2x22x22xf32, #tpu.memory_space<vmem>>, vector<1x1x16xf32>
    %26 = vector.shape_cast %25 : vector<1x1x16xf32> to vector<16xf32>
    %27 = vector.shape_cast %24 : vector<16xf32> to vector<1x1x16xf32>
    tpu.vector_store %arg4[%c0_17, %c5, %c3_18], %27 {strides = array<i32>} : memref<2x22x22xf32, #tpu.memory_space<vmem>>, vector<1x1x16xf32>,
    %28 = vector.extract_strided_slice %5 {offsets = [32], sizes = [16], strides = [1]} : vector<256xf32> to vector<16xf32>
    %c1_19 = arith.constant 1 : index
    %c5_20 = arith.constant 5 : index
    %c3_21 = arith.constant 3 : index
    %29 = vector.load %arg4[%c1_19, %c5_20, %c3_21] : memref<2x22x22xf32, #tpu.memory_space<vmem>>, vector<1x1x16xf32>
    %30 = vector.shape_cast %29 : vector<1x1x16xf32> to vector<16xf32>
    %31 = vector.shape_cast %28 : vector<16xf32> to vector<1x1x16xf32>
    tpu.vector_store %arg4[%c1_19, %c5_20, %c3_21], %31 {strides = array<i32>} : memref<2x22x22xf32, #tpu.memory_space<vmem>>, vector<1x1x16xf32>,
    %32 = vector.extract_strided_slice %4 {offsets = [48], sizes = [16], strides = [1]} : vector<256xf32> to vector<16xf32>
    %c0_22 = arith.constant 0 : index
    %c6 = arith.constant 6 : index
    %c3_23 = arith.constant 3 : index
    %33 = vector.load %arg4[%c0_22, %c6, %c3_23] : memref<2x22x22xf32, #tpu.memory_space<vmem>>, vector<1x1x16xf32>
    %34 = vector.shape_cast %33 : vector<1x1x16xf32> to vector<16xf32>
    %35 = vector.shape_cast %32 : vector<16xf32> to vector<1x1x16xf32>
    tpu.vector_store %arg4[%c0_22, %c6, %c3_23], %35 {strides = array<i32>} : memref<2x22x22xf32, #tpu.memory_space<vmem>>, vector<1x1x16xf32>,
    %36 = vector.extract_strided_slice %5 {offsets = [48], sizes = [16], strides = [1]} : vector<256xf32> to vector<16xf32>
    %c1_24 = arith.constant 1 : index
    %c6_25 = arith.constant 6 : index
    %c3_26 = arith.constant 3 : index
    %37 = vector.load %arg4[%c1_24, %c6_25, %c3_26] : memref<2x22x22xf32, #tpu.memory_space<vmem>>, vector<1x1x16xf32>
    %38 = vector.shape_cast %37 : vector<1x1x16xf32> to vector<16xf32>
    %39 = vector.shape_cast %36 : vector<16xf32> to vector<1x1x16xf32>
    tpu.vector_store %arg4[%c1_24, %c6_25, %c3_26], %39 {strides = array<i32>} : memref<2x22x22xf32, #tpu.memory_space<vmem>>, vector<1x1x16xf32>,
    %40 = vector.extract_strided_slice %4 {offsets = [64], sizes = [16], strides = [1]} : vector<256xf32> to vector<16xf32>
    %c0_27 = arith.constant 0 : index
    %c7 = arith.constant 7 : index
    %c3_28 = arith.constant 3 : index
    %41 = vector.load %arg4[%c0_27, %c7, %c3_28] : memref<2x22x22xf32, #tpu.memory_space<vmem>>, vector<1x1x16xf32>
    %42 = vector.shape_cast %41 : vector<1x1x16xf32> to vector<16xf32>
    %43 = vector.shape_cast %40 : vector<16xf32> to vector<1x1x16xf32>
    tpu.vector_store %arg4[%c0_27, %c7, %c3_28], %43 {strides = array<i32>} : memref<2x22x22xf32, #tpu.memory_space<vmem>>, vector<1x1x16xf32>,
    %44 = vector.extract_strided_slice %5 {offsets = [64], sizes = [16], strides = [1]} : vector<256xf32> to vector<16xf32>
    %c1_29 = arith.constant 1 : index
    %c7_30 = arith.constant 7 : index
    %c3_31 = arith.constant 3 : index
    %45 = vector.load %arg4[%c1_29, %c7_30, %c3_31] : memref<2x22x22xf32, #tpu.memory_space<vmem>>, vector<1x1x16xf32>
    %46 = vector.shape_cast %45 : vector<1x1x16xf32> to vector<16xf32>
    %47 = vector.shape_cast %44 : vector<16xf32> to vector<1x1x16xf32>
    tpu.vector_store %arg4[%c1_29, %c7_30, %c3_31], %47 {strides = array<i32>} : memref<2x22x22xf32, #tpu.memory_space<vmem>>, vector<1x1x16xf32>,
    %48 = vector.extract_strided_slice %4 {offsets = [80], sizes = [16], strides = [1]} : vector<256xf32> to vector<16xf32>
    %c0_32 = arith.constant 0 : index
    %c8 = arith.constant 8 : index
    %c3_33 = arith.constant 3 : index
    %49 = vector.load %arg4[%c0_32, %c8, %c3_33] : memref<2x22x22xf32, #tpu.memory_space<vmem>>, vector<1x1x16xf32>
    %50 = vector.shape_cast %49 : vector<1x1x16xf32> to vector<16xf32>
    %51 = vector.shape_cast %48 : vector<16xf32> to vector<1x1x16xf32>
    tpu.vector_store %arg4[%c0_32, %c8, %c3_33], %51 {strides = array<i32>} : memref<2x22x22xf32, #tpu.memory_space<vmem>>, vector<1x1x16xf32>,
    %52 = vector.extract_strided_slice %5 {offsets = [80], sizes = [16], strides = [1]} : vector<256xf32> to vector<16xf32>
    %c1_34 = arith.constant 1 : index
    %c8_35 = arith.constant 8 : index
    %c3_36 = arith.constant 3 : index
    %53 = vector.load %arg4[%c1_34, %c8_35, %c3_36] : memref<2x22x22xf32, #tpu.memory_space<vmem>>, vector<1x1x16xf32>
    %54 = vector.shape_cast %53 : vector<1x1x16xf32> to vector<16xf32>
    %55 = vector.shape_cast %52 : vector<16xf32> to vector<1x1x16xf32>
    tpu.vector_store %arg4[%c1_34, %c8_35, %c3_36], %55 {strides = array<i32>} : memref<2x22x22xf32, #tpu.memory_space<vmem>>, vector<1x1x16xf32>,
    %56 = vector.extract_strided_slice %4 {offsets = [96], sizes = [16], strides = [1]} : vector<256xf32> to vector<16xf32>
    %c0_37 = arith.constant 0 : index
    %c9 = arith.constant 9 : index
    %c3_38 = arith.constant 3 : index
    %57 = vector.load %arg4[%c0_37, %c9, %c3_38] : memref<2x22x22xf32, #tpu.memory_space<vmem>>, vector<1x1x16xf32>
    %58 = vector.shape_cast %57 : vector<1x1x16xf32> to vector<16xf32>
    %59 = vector.shape_cast %56 : vector<16xf32> to vector<1x1x16xf32>
    tpu.vector_store %arg4[%c0_37, %c9, %c3_38], %59 {strides = array<i32>} : memref<2x22x22xf32, #tpu.memory_space<vmem>>, vector<1x1x16xf32>,
    %60 = vector.extract_strided_slice %5 {offsets = [96], sizes = [16], strides = [1]} : vector<256xf32> to vector<16xf32>
    %c1_39 = arith.constant 1 : index
    %c9_40 = arith.constant 9 : index
    %c3_41 = arith.constant 3 : index
    %61 = vector.load %arg4[%c1_39, %c9_40, %c3_41] : memref<2x22x22xf32, #tpu.memory_space<vmem>>, vector<1x1x16xf32>
    %62 = vector.shape_cast %61 : vector<1x1x16xf32> to vector<16xf32>
    %63 = vector.shape_cast %60 : vector<16xf32> to vector<1x1x16xf32>
    tpu.vector_store %arg4[%c1_39, %c9_40, %c3_41], %63 {strides = array<i32>} : memref<2x22x22xf32, #tpu.memory_space<vmem>>, vector<1x1x16xf32>,
    %64 = vector.extract_strided_slice %4 {offsets = [112], sizes = [16], strides = [1]} : vector<256xf32> to vector<16xf32>
    %c0_42 = arith.constant 0 : index
    %c10 = arith.constant 10 : index
    %c3_43 = arith.constant 3 : index
    %65 = vector.load %arg4[%c0_42, %c10, %c3_43] : memref<2x22x22xf32, #tpu.memory_space<vmem>>, vector<1x1x16xf32>
    %66 = vector.shape_cast %65 : vector<1x1x16xf32> to vector<16xf32>
    %67 = vector.shape_cast %64 : vector<16xf32> to vector<1x1x16xf32>
    tpu.vector_store %arg4[%c0_42, %c10, %c3_43], %67 {strides = array<i32>} : memref<2x22x22xf32, #tpu.memory_space<vmem>>, vector<1x1x16xf32>,
    %68 = vector.extract_strided_slice %5 {offsets = [112], sizes = [16], strides = [1]} : vector<256xf32> to vector<16xf32>
    %c1_44 = arith.constant 1 : index
    %c10_45 = arith.constant 10 : index
    %c3_46 = arith.constant 3 : index
    %69 = vector.load %arg4[%c1_44, %c10_45, %c3_46] : memref<2x22x22xf32, #tpu.memory_space<vmem>>, vector<1x1x16xf32>
    %70 = vector.shape_cast %69 : vector<1x1x16xf32> to vector<16xf32>
    %71 = vector.shape_cast %68 : vector<16xf32> to vector<1x1x16xf32>
    tpu.vector_store %arg4[%c1_44, %c10_45, %c3_46], %71 {strides = array<i32>} : memref<2x22x22xf32, #tpu.memory_space<vmem>>, vector<1x1x16xf32>,
    %72 = vector.extract_strided_slice %4 {offsets = [128], sizes = [16], strides = [1]} : vector<256xf32> to vector<16xf32>
    %c0_47 = arith.constant 0 : index
    %c11 = arith.constant 11 : index
    %c3_48 = arith.constant 3 : index
    %73 = vector.load %arg4[%c0_47, %c11, %c3_48] : memref<2x22x22xf32, #tpu.memory_space<vmem>>, vector<1x1x16xf32>
    %74 = vector.shape_cast %73 : vector<1x1x16xf32> to vector<16xf32>
    %75 = vector.shape_cast %72 : vector<16xf32> to vector<1x1x16xf32>
    tpu.vector_store %arg4[%c0_47, %c11, %c3_48], %75 {strides = array<i32>} : memref<2x22x22xf32, #tpu.memory_space<vmem>>, vector<1x1x16xf32>,
    %76 = vector.extract_strided_slice %5 {offsets = [128], sizes = [16], strides = [1]} : vector<256xf32> to vector<16xf32>
    %c1_49 = arith.constant 1 : index
    %c11_50 = arith.constant 11 : index
    %c3_51 = arith.constant 3 : index
    %77 = vector.load %arg4[%c1_49, %c11_50, %c3_51] : memref<2x22x22xf32, #tpu.memory_space<vmem>>, vector<1x1x16xf32>
    %78 = vector.shape_cast %77 : vector<1x1x16xf32> to vector<16xf32>
    %79 = vector.shape_cast %76 : vector<16xf32> to vector<1x1x16xf32>
    tpu.vector_store %arg4[%c1_49, %c11_50, %c3_51], %79 {strides = array<i32>} : memref<2x22x22xf32, #tpu.memory_space<vmem>>, vector<1x1x16xf32>,
    %80 = vector.extract_strided_slice %4 {offsets = [144], sizes = [16], strides = [1]} : vector<256xf32> to vector<16xf32>
    %c0_52 = arith.constant 0 : index
    %c12 = arith.constant 12 : index
    %c3_53 = arith.constant 3 : index
    %81 = vector.load %arg4[%c0_52, %c12, %c3_53] : memref<2x22x22xf32, #tpu.memory_space<vmem>>, vector<1x1x16xf32>
    %82 = vector.shape_cast %81 : vector<1x1x16xf32> to vector<16xf32>
    %83 = vector.shape_cast %80 : vector<16xf32> to vector<1x1x16xf32>
    tpu.vector_store %arg4[%c0_52, %c12, %c3_53], %83 {strides = array<i32>} : memref<2x22x22xf32, #tpu.memory_space<vmem>>, vector<1x1x16xf32>,
    %84 = vector.extract_strided_slice %5 {offsets = [144], sizes = [16], strides = [1]} : vector<256xf32> to vector<16xf32>
    %c1_54 = arith.constant 1 : index
    %c12_55 = arith.constant 12 : index
    %c3_56 = arith.constant 3 : index
    %85 = vector.load %arg4[%c1_54, %c12_55, %c3_56] : memref<2x22x22xf32, #tpu.memory_space<vmem>>, vector<1x1x16xf32>
    %86 = vector.shape_cast %85 : vector<1x1x16xf32> to vector<16xf32>
    %87 = vector.shape_cast %84 : vector<16xf32> to vector<1x1x16xf32>
    tpu.vector_store %arg4[%c1_54, %c12_55, %c3_56], %87 {strides = array<i32>} : memref<2x22x22xf32, #tpu.memory_space<vmem>>, vector<1x1x16xf32>,
    %88 = vector.extract_strided_slice %4 {offsets = [160], sizes = [16], strides = [1]} : vector<256xf32> to vector<16xf32>
    %c0_57 = arith.constant 0 : index
    %c13 = arith.constant 13 : index
    %c3_58 = arith.constant 3 : index
    %89 = vector.load %arg4[%c0_57, %c13, %c3_58] : memref<2x22x22xf32, #tpu.memory_space<vmem>>, vector<1x1x16xf32>
    %90 = vector.shape_cast %89 : vector<1x1x16xf32> to vector<16xf32>
    %91 = vector.shape_cast %88 : vector<16xf32> to vector<1x1x16xf32>
    tpu.vector_store %arg4[%c0_57, %c13, %c3_58], %91 {strides = array<i32>} : memref<2x22x22xf32, #tpu.memory_space<vmem>>, vector<1x1x16xf32>,
    %92 = vector.extract_strided_slice %5 {offsets = [160], sizes = [16], strides = [1]} : vector<256xf32> to vector<16xf32>
    %c1_59 = arith.constant 1 : index
    %c13_60 = arith.constant 13 : index
    %c3_61 = arith.constant 3 : index
    %93 = vector.load %arg4[%c1_59, %c13_60, %c3_61] : memref<2x22x22xf32, #tpu.memory_space<vmem>>, vector<1x1x16xf32>
    %94 = vector.shape_cast %93 : vector<1x1x16xf32> to vector<16xf32>
    %95 = vector.shape_cast %92 : vector<16xf32> to vector<1x1x16xf32>
    tpu.vector_store %arg4[%c1_59, %c13_60, %c3_61], %95 {strides = array<i32>} : memref<2x22x22xf32, #tpu.memory_space<vmem>>, vector<1x1x16xf32>,
    %96 = vector.extract_strided_slice %4 {offsets = [176], sizes = [16], strides = [1]} : vector<256xf32> to vector<16xf32>
    %c0_62 = arith.constant 0 : index
    %c14 = arith.constant 14 : index
    %c3_63 = arith.constant 3 : index
    %97 = vector.load %arg4[%c0_62, %c14, %c3_63] : memref<2x22x22xf32, #tpu.memory_space<vmem>>, vector<1x1x16xf32>
    %98 = vector.shape_cast %97 : vector<1x1x16xf32> to vector<16xf32>
    %99 = vector.shape_cast %96 : vector<16xf32> to vector<1x1x16xf32>
    tpu.vector_store %arg4[%c0_62, %c14, %c3_63], %99 {strides = array<i32>} : memref<2x22x22xf32, #tpu.memory_space<vmem>>, vector<1x1x16xf32>,
    %100 = vector.extract_strided_slice %5 {offsets = [176], sizes = [16], strides = [1]} : vector<256xf32> to vector<16xf32>
    %c1_64 = arith.constant 1 : index
    %c14_65 = arith.constant 14 : index
    %c3_66 = arith.constant 3 : index
    %101 = vector.load %arg4[%c1_64, %c14_65, %c3_66] : memref<2x22x22xf32, #tpu.memory_space<vmem>>, vector<1x1x16xf32>
    %102 = vector.shape_cast %101 : vector<1x1x16xf32> to vector<16xf32>
    %103 = vector.shape_cast %100 : vector<16xf32> to vector<1x1x16xf32>
    tpu.vector_store %arg4[%c1_64, %c14_65, %c3_66], %103 {strides = array<i32>} : memref<2x22x22xf32, #tpu.memory_space<vmem>>, vector<1x1x16xf32>,
    %104 = vector.extract_strided_slice %4 {offsets = [192], sizes = [16], strides = [1]} : vector<256xf32> to vector<16xf32>
    %c0_67 = arith.constant 0 : index
    %c15 = arith.constant 15 : index
    %c3_68 = arith.constant 3 : index
    %105 = vector.load %arg4[%c0_67, %c15, %c3_68] : memref<2x22x22xf32, #tpu.memory_space<vmem>>, vector<1x1x16xf32>
    %106 = vector.shape_cast %105 : vector<1x1x16xf32> to vector<16xf32>
    %107 = vector.shape_cast %104 : vector<16xf32> to vector<1x1x16xf32>
    tpu.vector_store %arg4[%c0_67, %c15, %c3_68], %107 {strides = array<i32>} : memref<2x22x22xf32, #tpu.memory_space<vmem>>, vector<1x1x16xf32>,
    %108 = vector.extract_strided_slice %5 {offsets = [192], sizes = [16], strides = [1]} : vector<256xf32> to vector<16xf32>
    %c1_69 = arith.constant 1 : index
    %c15_70 = arith.constant 15 : index
    %c3_71 = arith.constant 3 : index
    %109 = vector.load %arg4[%c1_69, %c15_70, %c3_71] : memref<2x22x22xf32, #tpu.memory_space<vmem>>, vector<1x1x16xf32>
    %110 = vector.shape_cast %109 : vector<1x1x16xf32> to vector<16xf32>
    %111 = vector.shape_cast %108 : vector<16xf32> to vector<1x1x16xf32>
    tpu.vector_store %arg4[%c1_69, %c15_70, %c3_71], %111 {strides = array<i32>} : memref<2x22x22xf32, #tpu.memory_space<vmem>>, vector<1x1x16xf32>,
    %112 = vector.extract_strided_slice %4 {offsets = [208], sizes = [16], strides = [1]} : vector<256xf32> to vector<16xf32>
    %c0_72 = arith.constant 0 : index
    %c16 = arith.constant 16 : index
    %c3_73 = arith.constant 3 : index
    %113 = vector.load %arg4[%c0_72, %c16, %c3_73] : memref<2x22x22xf32, #tpu.memory_space<vmem>>, vector<1x1x16xf32>
    %114 = vector.shape_cast %113 : vector<1x1x16xf32> to vector<16xf32>
    %115 = vector.shape_cast %112 : vector<16xf32> to vector<1x1x16xf32>
    tpu.vector_store %arg4[%c0_72, %c16, %c3_73], %115 {strides = array<i32>} : memref<2x22x22xf32, #tpu.memory_space<vmem>>, vector<1x1x16xf32>,
    %116 = vector.extract_strided_slice %5 {offsets = [208], sizes = [16], strides = [1]} : vector<256xf32> to vector<16xf32>
    %c1_74 = arith.constant 1 : index
    %c16_75 = arith.constant 16 : index
    %c3_76 = arith.constant 3 : index
    %117 = vector.load %arg4[%c1_74, %c16_75, %c3_76] : memref<2x22x22xf32, #tpu.memory_space<vmem>>, vector<1x1x16xf32>
    %118 = vector.shape_cast %117 : vector<1x1x16xf32> to vector<16xf32>
    %119 = vector.shape_cast %116 : vector<16xf32> to vector<1x1x16xf32>
    tpu.vector_store %arg4[%c1_74, %c16_75, %c3_76], %119 {strides = array<i32>} : memref<2x22x22xf32, #tpu.memory_space<vmem>>, vector<1x1x16xf32>,
    %120 = vector.extract_strided_slice %4 {offsets = [224], sizes = [16], strides = [1]} : vector<256xf32> to vector<16xf32>
    %c0_77 = arith.constant 0 : index
    %c17 = arith.constant 17 : index
    %c3_78 = arith.constant 3 : index
    %121 = vector.load %arg4[%c0_77, %c17, %c3_78] : memref<2x22x22xf32, #tpu.memory_space<vmem>>, vector<1x1x16xf32>
    %122 = vector.shape_cast %121 : vector<1x1x16xf32> to vector<16xf32>
    %123 = vector.shape_cast %120 : vector<16xf32> to vector<1x1x16xf32>
    tpu.vector_store %arg4[%c0_77, %c17, %c3_78], %123 {strides = array<i32>} : memref<2x22x22xf32, #tpu.memory_space<vmem>>, vector<1x1x16xf32>,
    %124 = vector.extract_strided_slice %5 {offsets = [224], sizes = [16], strides = [1]} : vector<256xf32> to vector<16xf32>
    %c1_79 = arith.constant 1 : index
    %c17_80 = arith.constant 17 : index
    %c3_81 = arith.constant 3 : index
    %125 = vector.load %arg4[%c1_79, %c17_80, %c3_81] : memref<2x22x22xf32, #tpu.memory_space<vmem>>, vector<1x1x16xf32>
    %126 = vector.shape_cast %125 : vector<1x1x16xf32> to vector<16xf32>
    %127 = vector.shape_cast %124 : vector<16xf32> to vector<1x1x16xf32>
    tpu.vector_store %arg4[%c1_79, %c17_80, %c3_81], %127 {strides = array<i32>} : memref<2x22x22xf32, #tpu.memory_space<vmem>>, vector<1x1x16xf32>,
    %128 = vector.extract_strided_slice %4 {offsets = [240], sizes = [16], strides = [1]} : vector<256xf32> to vector<16xf32>
    %c0_82 = arith.constant 0 : index
    %c18 = arith.constant 18 : index
    %c3_83 = arith.constant 3 : index
    %129 = vector.load %arg4[%c0_82, %c18, %c3_83] : memref<2x22x22xf32, #tpu.memory_space<vmem>>, vector<1x1x16xf32>
    %130 = vector.shape_cast %129 : vector<1x1x16xf32> to vector<16xf32>
    %131 = vector.shape_cast %128 : vector<16xf32> to vector<1x1x16xf32>
    tpu.vector_store %arg4[%c0_82, %c18, %c3_83], %131 {strides = array<i32>} : memref<2x22x22xf32, #tpu.memory_space<vmem>>, vector<1x1x16xf32>,
    %132 = vector.extract_strided_slice %5 {offsets = [240], sizes = [16], strides = [1]} : vector<256xf32> to vector<16xf32>
    %c1_84 = arith.constant 1 : index
    %c18_85 = arith.constant 18 : index
    %c3_86 = arith.constant 3 : index
    %133 = vector.load %arg4[%c1_84, %c18_85, %c3_86] : memref<2x22x22xf32, #tpu.memory_space<vmem>>, vector<1x1x16xf32>
    %134 = vector.shape_cast %133 : vector<1x1x16xf32> to vector<16xf32>
    %135 = vector.shape_cast %132 : vector<16xf32> to vector<1x1x16xf32>
    tpu.vector_store %arg4[%c1_84, %c18_85, %c3_86], %135 {strides = array<i32>} : memref<2x22x22xf32, #tpu.memory_space<vmem>>, vector<1x1x16xf32>,
    %cst_87 = arith.constant 0.000000e+00 : f32
    %136 = vector.broadcast %cst_87 : f32 to vector<16x16xf32>
    %cst_88 = arith.constant 0.000000e+00 : f32
    %137 = vector.broadcast %cst_88 : f32 to vector<16x16xf32>
    %cst_89 = arith.constant 0.000000e+00 : f32
    %138 = vector.broadcast %cst_89 : f32 to vector<16x16xf32>
    %cst_90 = arith.constant 0.000000e+00 : f32
    %139 = vector.broadcast %cst_90 : f32 to vector<16x16xf32>
    %c0_91 = arith.constant 0 : index
    %c0_92 = arith.constant 0 : index
    %c0_93 = arith.constant 0 : index
    %140 = vector.load %arg4[%c0_91, %c0_92, %c0_93] : memref<2x22x22xf32, #tpu.memory_space<vmem>>, vector<1x22x16xf32>
    %141 = vector.shape_cast %140 : vector<1x22x16xf32> to vector<22x16xf32>
    %c0_94 = arith.constant 0 : index
    %142 = memref.load %arg1[%c0_94] : memref<98xf32, #tpu.memory_space<smem>>
    %143 = vector.extract_strided_slice %141 {offsets = [0, 0], sizes = [16, 16], strides = [1, 1]} : vector<22x16xf32> to vector<16x16xf32>
    %144 = vector.broadcast %142 : f32 to vector<16x16xf32>
    %145 = arith.mulf %144, %143 : vector<16x16xf32>
    %146 = arith.addf %136, %145 : vector<16x16xf32>
    %c7_95 = arith.constant 7 : index
    %147 = memref.load %arg1[%c7_95] : memref<98xf32, #tpu.memory_space<smem>>
    %148 = vector.extract_strided_slice %141 {offsets = [1, 0], sizes = [16, 16], strides = [1, 1]} : vector<22x16xf32> to vector<16x16xf32>
    %149 = vector.broadcast %147 : f32 to vector<16x16xf32>
    %150 = arith.mulf %149, %148 : vector<16x16xf32>
    %151 = arith.addf %137, %150 : vector<16x16xf32>
    %c14_96 = arith.constant 14 : index
    %152 = memref.load %arg1[%c14_96] : memref<98xf32, #tpu.memory_space<smem>>
    %153 = vector.extract_strided_slice %141 {offsets = [2, 0], sizes = [16, 16], strides = [1, 1]} : vector<22x16xf32> to vector<16x16xf32>
    %154 = vector.broadcast %152 : f32 to vector<16x16xf32>
    %155 = arith.mulf %154, %153 : vector<16x16xf32>
    %156 = arith.addf %138, %155 : vector<16x16xf32>
    %c21 = arith.constant 21 : index
    %157 = memref.load %arg1[%c21] : memref<98xf32, #tpu.memory_space<smem>>
    %158 = vector.extract_strided_slice %141 {offsets = [3, 0], sizes = [16, 16], strides = [1, 1]} : vector<22x16xf32> to vector<16x16xf32>
    %159 = vector.broadcast %157 : f32 to vector<16x16xf32>
    %160 = arith.mulf %159, %158 : vector<16x16xf32>
    %161 = arith.addf %139, %160 : vector<16x16xf32>
    %c28 = arith.constant 28 : index
    %162 = memref.load %arg1[%c28] : memref<98xf32, #tpu.memory_space<smem>>
    %163 = vector.extract_strided_slice %141 {offsets = [4, 0], sizes = [16, 16], strides = [1, 1]} : vector<22x16xf32> to vector<16x16xf32>
    %164 = vector.broadcast %162 : f32 to vector<16x16xf32>
    %165 = arith.mulf %164, %163 : vector<16x16xf32>
    %166 = arith.addf %146, %165 : vector<16x16xf32>
    %c35 = arith.constant 35 : index
    %167 = memref.load %arg1[%c35] : memref<98xf32, #tpu.memory_space<smem>>
    %168 = vector.extract_strided_slice %141 {offsets = [5, 0], sizes = [16, 16], strides = [1, 1]} : vector<22x16xf32> to vector<16x16xf32>
    %169 = vector.broadcast %167 : f32 to vector<16x16xf32>
    %170 = arith.mulf %169, %168 : vector<16x16xf32>
    %171 = arith.addf %151, %170 : vector<16x16xf32>
    %c42 = arith.constant 42 : index
    %172 = memref.load %arg1[%c42] : memref<98xf32, #tpu.memory_space<smem>>
    %173 = vector.extract_strided_slice %141 {offsets = [6, 0], sizes = [16, 16], strides = [1, 1]} : vector<22x16xf32> to vector<16x16xf32>
    %174 = vector.broadcast %172 : f32 to vector<16x16xf32>
    %175 = arith.mulf %174, %173 : vector<16x16xf32>
    %176 = arith.addf %156, %175 : vector<16x16xf32>
    %c0_97 = arith.constant 0 : index
    %c0_98 = arith.constant 0 : index
    %c1_99 = arith.constant 1 : index
    %177 = vector.load %arg4[%c0_97, %c0_98, %c1_99] : memref<2x22x22xf32, #tpu.memory_space<vmem>>, vector<1x22x16xf32>
    %178 = vector.shape_cast %177 : vector<1x22x16xf32> to vector<22x16xf32>
    %c1_100 = arith.constant 1 : index
    %179 = memref.load %arg1[%c1_100] : memref<98xf32, #tpu.memory_space<smem>>
    %180 = vector.extract_strided_slice %178 {offsets = [0, 0], sizes = [16, 16], strides = [1, 1]} : vector<22x16xf32> to vector<16x16xf32>
    %181 = vector.broadcast %179 : f32 to vector<16x16xf32>
    %182 = arith.mulf %181, %180 : vector<16x16xf32>
    %183 = arith.addf %161, %182 : vector<16x16xf32>
    %c8_101 = arith.constant 8 : index
    %184 = memref.load %arg1[%c8_101] : memref<98xf32, #tpu.memory_space<smem>>
    %185 = vector.extract_strided_slice %178 {offsets = [1, 0], sizes = [16, 16], strides = [1, 1]} : vector<22x16xf32> to vector<16x16xf32>
    %186 = vector.broadcast %184 : f32 to vector<16x16xf32>
    %187 = arith.mulf %186, %185 : vector<16x16xf32>
    %188 = arith.addf %166, %187 : vector<16x16xf32>
    %c15_102 = arith.constant 15 : index
    %189 = memref.load %arg1[%c15_102] : memref<98xf32, #tpu.memory_space<smem>>
    %190 = vector.extract_strided_slice %178 {offsets = [2, 0], sizes = [16, 16], strides = [1, 1]} : vector<22x16xf32> to vector<16x16xf32>
    %191 = vector.broadcast %189 : f32 to vector<16x16xf32>
    %192 = arith.mulf %191, %190 : vector<16x16xf32>
    %193 = arith.addf %171, %192 : vector<16x16xf32>
    %c22 = arith.constant 22 : index
    %194 = memref.load %arg1[%c22] : memref<98xf32, #tpu.memory_space<smem>>
    %195 = vector.extract_strided_slice %178 {offsets = [3, 0], sizes = [16, 16], strides = [1, 1]} : vector<22x16xf32> to vector<16x16xf32>
    %196 = vector.broadcast %194 : f32 to vector<16x16xf32>
    %197 = arith.mulf %196, %195 : vector<16x16xf32>
    %198 = arith.addf %176, %197 : vector<16x16xf32>
    %c29 = arith.constant 29 : index
    %199 = memref.load %arg1[%c29] : memref<98xf32, #tpu.memory_space<smem>>
    %200 = vector.extract_strided_slice %178 {offsets = [4, 0], sizes = [16, 16], strides = [1, 1]} : vector<22x16xf32> to vector<16x16xf32>
    %201 = vector.broadcast %199 : f32 to vector<16x16xf32>
    %202 = arith.mulf %201, %200 : vector<16x16xf32>
    %203 = arith.addf %183, %202 : vector<16x16xf32>
    %c36 = arith.constant 36 : index
    %204 = memref.load %arg1[%c36] : memref<98xf32, #tpu.memory_space<smem>>
    %205 = vector.extract_strided_slice %178 {offsets = [5, 0], sizes = [16, 16], strides = [1, 1]} : vector<22x16xf32> to vector<16x16xf32>
    %206 = vector.broadcast %204 : f32 to vector<16x16xf32>
    %207 = arith.mulf %206, %205 : vector<16x16xf32>
    %208 = arith.addf %188, %207 : vector<16x16xf32>
    %c43 = arith.constant 43 : index
    %209 = memref.load %arg1[%c43] : memref<98xf32, #tpu.memory_space<smem>>
    %210 = vector.extract_strided_slice %178 {offsets = [6, 0], sizes = [16, 16], strides = [1, 1]} : vector<22x16xf32> to vector<16x16xf32>
    %211 = vector.broadcast %209 : f32 to vector<16x16xf32>
    %212 = arith.mulf %211, %210 : vector<16x16xf32>
    %213 = arith.addf %193, %212 : vector<16x16xf32>
    %c0_103 = arith.constant 0 : index
    %c0_104 = arith.constant 0 : index
    %c2 = arith.constant 2 : index
    %214 = vector.load %arg4[%c0_103, %c0_104, %c2] : memref<2x22x22xf32, #tpu.memory_space<vmem>>, vector<1x22x16xf32>
    %215 = vector.shape_cast %214 : vector<1x22x16xf32> to vector<22x16xf32>
    %c2_105 = arith.constant 2 : index
    %216 = memref.load %arg1[%c2_105] : memref<98xf32, #tpu.memory_space<smem>>
    %217 = vector.extract_strided_slice %215 {offsets = [0, 0], sizes = [16, 16], strides = [1, 1]} : vector<22x16xf32> to vector<16x16xf32>
    %218 = vector.broadcast %216 : f32 to vector<16x16xf32>
    %219 = arith.mulf %218, %217 : vector<16x16xf32>
    %220 = arith.addf %198, %219 : vector<16x16xf32>
    %c9_106 = arith.constant 9 : index
    %221 = memref.load %arg1[%c9_106] : memref<98xf32, #tpu.memory_space<smem>>
    %222 = vector.extract_strided_slice %215 {offsets = [1, 0], sizes = [16, 16], strides = [1, 1]} : vector<22x16xf32> to vector<16x16xf32>
    %223 = vector.broadcast %221 : f32 to vector<16x16xf32>
    %224 = arith.mulf %223, %222 : vector<16x16xf32>
    %225 = arith.addf %203, %224 : vector<16x16xf32>
    %c16_107 = arith.constant 16 : index
    %226 = memref.load %arg1[%c16_107] : memref<98xf32, #tpu.memory_space<smem>>
    %227 = vector.extract_strided_slice %215 {offsets = [2, 0], sizes = [16, 16], strides = [1, 1]} : vector<22x16xf32> to vector<16x16xf32>
    %228 = vector.broadcast %226 : f32 to vector<16x16xf32>
    %229 = arith.mulf %228, %227 : vector<16x16xf32>
    %230 = arith.addf %208, %229 : vector<16x16xf32>
    %c23 = arith.constant 23 : index
    %231 = memref.load %arg1[%c23] : memref<98xf32, #tpu.memory_space<smem>>
    %232 = vector.extract_strided_slice %215 {offsets = [3, 0], sizes = [16, 16], strides = [1, 1]} : vector<22x16xf32> to vector<16x16xf32>
    %233 = vector.broadcast %231 : f32 to vector<16x16xf32>
    %234 = arith.mulf %233, %232 : vector<16x16xf32>
    %235 = arith.addf %213, %234 : vector<16x16xf32>
    %c30 = arith.constant 30 : index
    %236 = memref.load %arg1[%c30] : memref<98xf32, #tpu.memory_space<smem>>
    %237 = vector.extract_strided_slice %215 {offsets = [4, 0], sizes = [16, 16], strides = [1, 1]} : vector<22x16xf32> to vector<16x16xf32>
    %238 = vector.broadcast %236 : f32 to vector<16x16xf32>
    %239 = arith.mulf %238, %237 : vector<16x16xf32>
    %240 = arith.addf %220, %239 : vector<16x16xf32>
    %c37 = arith.constant 37 : index
    %241 = memref.load %arg1[%c37] : memref<98xf32, #tpu.memory_space<smem>>
    %242 = vector.extract_strided_slice %215 {offsets = [5, 0], sizes = [16, 16], strides = [1, 1]} : vector<22x16xf32> to vector<16x16xf32>
    %243 = vector.broadcast %241 : f32 to vector<16x16xf32>
    %244 = arith.mulf %243, %242 : vector<16x16xf32>
    %245 = arith.addf %225, %244 : vector<16x16xf32>
    %c44 = arith.constant 44 : index
    %246 = memref.load %arg1[%c44] : memref<98xf32, #tpu.memory_space<smem>>
    %247 = vector.extract_strided_slice %215 {offsets = [6, 0], sizes = [16, 16], strides = [1, 1]} : vector<22x16xf32> to vector<16x16xf32>
    %248 = vector.broadcast %246 : f32 to vector<16x16xf32>
    %249 = arith.mulf %248, %247 : vector<16x16xf32>
    %250 = arith.addf %230, %249 : vector<16x16xf32>
    %c0_108 = arith.constant 0 : index
    %c0_109 = arith.constant 0 : index
    %c3_110 = arith.constant 3 : index
    %251 = vector.load %arg4[%c0_108, %c0_109, %c3_110] : memref<2x22x22xf32, #tpu.memory_space<vmem>>, vector<1x22x16xf32>
    %252 = vector.shape_cast %251 : vector<1x22x16xf32> to vector<22x16xf32>
    %c3_111 = arith.constant 3 : index
    %253 = memref.load %arg1[%c3_111] : memref<98xf32, #tpu.memory_space<smem>>
    %254 = vector.extract_strided_slice %252 {offsets = [0, 0], sizes = [16, 16], strides = [1, 1]} : vector<22x16xf32> to vector<16x16xf32>
    %255 = vector.broadcast %253 : f32 to vector<16x16xf32>
    %256 = arith.mulf %255, %254 : vector<16x16xf32>
    %257 = arith.addf %235, %256 : vector<16x16xf32>
    %c10_112 = arith.constant 10 : index
    %258 = memref.load %arg1[%c10_112] : memref<98xf32, #tpu.memory_space<smem>>
    %259 = vector.extract_strided_slice %252 {offsets = [1, 0], sizes = [16, 16], strides = [1, 1]} : vector<22x16xf32> to vector<16x16xf32>
    %260 = vector.broadcast %258 : f32 to vector<16x16xf32>
    %261 = arith.mulf %260, %259 : vector<16x16xf32>
    %262 = arith.addf %240, %261 : vector<16x16xf32>
    %c17_113 = arith.constant 17 : index
    %263 = memref.load %arg1[%c17_113] : memref<98xf32, #tpu.memory_space<smem>>
    %264 = vector.extract_strided_slice %252 {offsets = [2, 0], sizes = [16, 16], strides = [1, 1]} : vector<22x16xf32> to vector<16x16xf32>
    %265 = vector.broadcast %263 : f32 to vector<16x16xf32>
    %266 = arith.mulf %265, %264 : vector<16x16xf32>
    %267 = arith.addf %245, %266 : vector<16x16xf32>
    %c24 = arith.constant 24 : index
    %268 = memref.load %arg1[%c24] : memref<98xf32, #tpu.memory_space<smem>>
    %269 = vector.extract_strided_slice %252 {offsets = [3, 0], sizes = [16, 16], strides = [1, 1]} : vector<22x16xf32> to vector<16x16xf32>
    %270 = vector.broadcast %268 : f32 to vector<16x16xf32>
    %271 = arith.mulf %270, %269 : vector<16x16xf32>
    %272 = arith.addf %250, %271 : vector<16x16xf32>
    %c31 = arith.constant 31 : index
    %273 = memref.load %arg1[%c31] : memref<98xf32, #tpu.memory_space<smem>>
    %274 = vector.extract_strided_slice %252 {offsets = [4, 0], sizes = [16, 16], strides = [1, 1]} : vector<22x16xf32> to vector<16x16xf32>
    %275 = vector.broadcast %273 : f32 to vector<16x16xf32>
    %276 = arith.mulf %275, %274 : vector<16x16xf32>
    %277 = arith.addf %257, %276 : vector<16x16xf32>
    %c38 = arith.constant 38 : index
    %278 = memref.load %arg1[%c38] : memref<98xf32, #tpu.memory_space<smem>>
    %279 = vector.extract_strided_slice %252 {offsets = [5, 0], sizes = [16, 16], strides = [1, 1]} : vector<22x16xf32> to vector<16x16xf32>
    %280 = vector.broadcast %278 : f32 to vector<16x16xf32>
    %281 = arith.mulf %280, %279 : vector<16x16xf32>
    %282 = arith.addf %262, %281 : vector<16x16xf32>
    %c45 = arith.constant 45 : index
    %283 = memref.load %arg1[%c45] : memref<98xf32, #tpu.memory_space<smem>>
    %284 = vector.extract_strided_slice %252 {offsets = [6, 0], sizes = [16, 16], strides = [1, 1]} : vector<22x16xf32> to vector<16x16xf32>
    %285 = vector.broadcast %283 : f32 to vector<16x16xf32>
    %286 = arith.mulf %285, %284 : vector<16x16xf32>
    %287 = arith.addf %267, %286 : vector<16x16xf32>
    %c0_114 = arith.constant 0 : index
    %c0_115 = arith.constant 0 : index
    %c4_116 = arith.constant 4 : index
    %288 = vector.load %arg4[%c0_114, %c0_115, %c4_116] : memref<2x22x22xf32, #tpu.memory_space<vmem>>, vector<1x22x16xf32>
    %289 = vector.shape_cast %288 : vector<1x22x16xf32> to vector<22x16xf32>
    %c4_117 = arith.constant 4 : index
    %290 = memref.load %arg1[%c4_117] : memref<98xf32, #tpu.memory_space<smem>>
    %291 = vector.extract_strided_slice %289 {offsets = [0, 0], sizes = [16, 16], strides = [1, 1]} : vector<22x16xf32> to vector<16x16xf32>
    %292 = vector.broadcast %290 : f32 to vector<16x16xf32>
    %293 = arith.mulf %292, %291 : vector<16x16xf32>
    %294 = arith.addf %272, %293 : vector<16x16xf32>
    %c11_118 = arith.constant 11 : index
    %295 = memref.load %arg1[%c11_118] : memref<98xf32, #tpu.memory_space<smem>>
    %296 = vector.extract_strided_slice %289 {offsets = [1, 0], sizes = [16, 16], strides = [1, 1]} : vector<22x16xf32> to vector<16x16xf32>
    %297 = vector.broadcast %295 : f32 to vector<16x16xf32>
    %298 = arith.mulf %297, %296 : vector<16x16xf32>
    %299 = arith.addf %277, %298 : vector<16x16xf32>
    %c18_119 = arith.constant 18 : index
    %300 = memref.load %arg1[%c18_119] : memref<98xf32, #tpu.memory_space<smem>>
    %301 = vector.extract_strided_slice %289 {offsets = [2, 0], sizes = [16, 16], strides = [1, 1]} : vector<22x16xf32> to vector<16x16xf32>
    %302 = vector.broadcast %300 : f32 to vector<16x16xf32>
    %303 = arith.mulf %302, %301 : vector<16x16xf32>
    %304 = arith.addf %282, %303 : vector<16x16xf32>
    %c25 = arith.constant 25 : index
    %305 = memref.load %arg1[%c25] : memref<98xf32, #tpu.memory_space<smem>>
    %306 = vector.extract_strided_slice %289 {offsets = [3, 0], sizes = [16, 16], strides = [1, 1]} : vector<22x16xf32> to vector<16x16xf32>
    %307 = vector.broadcast %305 : f32 to vector<16x16xf32>
    %308 = arith.mulf %307, %306 : vector<16x16xf32>
    %309 = arith.addf %287, %308 : vector<16x16xf32>
    %c32 = arith.constant 32 : index
    %310 = memref.load %arg1[%c32] : memref<98xf32, #tpu.memory_space<smem>>
    %311 = vector.extract_strided_slice %289 {offsets = [4, 0], sizes = [16, 16], strides = [1, 1]} : vector<22x16xf32> to vector<16x16xf32>
    %312 = vector.broadcast %310 : f32 to vector<16x16xf32>
    %313 = arith.mulf %312, %311 : vector<16x16xf32>
    %314 = arith.addf %294, %313 : vector<16x16xf32>
    %c39 = arith.constant 39 : index
    %315 = memref.load %arg1[%c39] : memref<98xf32, #tpu.memory_space<smem>>
    %316 = vector.extract_strided_slice %289 {offsets = [5, 0], sizes = [16, 16], strides = [1, 1]} : vector<22x16xf32> to vector<16x16xf32>
    %317 = vector.broadcast %315 : f32 to vector<16x16xf32>
    %318 = arith.mulf %317, %316 : vector<16x16xf32>
    %319 = arith.addf %299, %318 : vector<16x16xf32>
    %c46 = arith.constant 46 : index
    %320 = memref.load %arg1[%c46] : memref<98xf32, #tpu.memory_space<smem>>
    %321 = vector.extract_strided_slice %289 {offsets = [6, 0], sizes = [16, 16], strides = [1, 1]} : vector<22x16xf32> to vector<16x16xf32>
    %322 = vector.broadcast %320 : f32 to vector<16x16xf32>
    %323 = arith.mulf %322, %321 : vector<16x16xf32>
    %324 = arith.addf %304, %323 : vector<16x16xf32>
    %c0_120 = arith.constant 0 : index
    %c0_121 = arith.constant 0 : index
    %c5_122 = arith.constant 5 : index
    %325 = vector.load %arg4[%c0_120, %c0_121, %c5_122] : memref<2x22x22xf32, #tpu.memory_space<vmem>>, vector<1x22x16xf32>
    %326 = vector.shape_cast %325 : vector<1x22x16xf32> to vector<22x16xf32>
    %c5_123 = arith.constant 5 : index
    %327 = memref.load %arg1[%c5_123] : memref<98xf32, #tpu.memory_space<smem>>
    %328 = vector.extract_strided_slice %326 {offsets = [0, 0], sizes = [16, 16], strides = [1, 1]} : vector<22x16xf32> to vector<16x16xf32>
    %329 = vector.broadcast %327 : f32 to vector<16x16xf32>
    %330 = arith.mulf %329, %328 : vector<16x16xf32>
    %331 = arith.addf %309, %330 : vector<16x16xf32>
    %c12_124 = arith.constant 12 : index
    %332 = memref.load %arg1[%c12_124] : memref<98xf32, #tpu.memory_space<smem>>
    %333 = vector.extract_strided_slice %326 {offsets = [1, 0], sizes = [16, 16], strides = [1, 1]} : vector<22x16xf32> to vector<16x16xf32>
    %334 = vector.broadcast %332 : f32 to vector<16x16xf32>
    %335 = arith.mulf %334, %333 : vector<16x16xf32>
    %336 = arith.addf %314, %335 : vector<16x16xf32>
    %c19 = arith.constant 19 : index
    %337 = memref.load %arg1[%c19] : memref<98xf32, #tpu.memory_space<smem>>
    %338 = vector.extract_strided_slice %326 {offsets = [2, 0], sizes = [16, 16], strides = [1, 1]} : vector<22x16xf32> to vector<16x16xf32>
    %339 = vector.broadcast %337 : f32 to vector<16x16xf32>
    %340 = arith.mulf %339, %338 : vector<16x16xf32>
    %341 = arith.addf %319, %340 : vector<16x16xf32>
    %c26 = arith.constant 26 : index
    %342 = memref.load %arg1[%c26] : memref<98xf32, #tpu.memory_space<smem>>
    %343 = vector.extract_strided_slice %326 {offsets = [3, 0], sizes = [16, 16], strides = [1, 1]} : vector<22x16xf32> to vector<16x16xf32>
    %344 = vector.broadcast %342 : f32 to vector<16x16xf32>
    %345 = arith.mulf %344, %343 : vector<16x16xf32>
    %346 = arith.addf %324, %345 : vector<16x16xf32>
    %c33 = arith.constant 33 : index
    %347 = memref.load %arg1[%c33] : memref<98xf32, #tpu.memory_space<smem>>
    %348 = vector.extract_strided_slice %326 {offsets = [4, 0], sizes = [16, 16], strides = [1, 1]} : vector<22x16xf32> to vector<16x16xf32>
    %349 = vector.broadcast %347 : f32 to vector<16x16xf32>
    %350 = arith.mulf %349, %348 : vector<16x16xf32>
    %351 = arith.addf %331, %350 : vector<16x16xf32>
    %c40 = arith.constant 40 : index
    %352 = memref.load %arg1[%c40] : memref<98xf32, #tpu.memory_space<smem>>
    %353 = vector.extract_strided_slice %326 {offsets = [5, 0], sizes = [16, 16], strides = [1, 1]} : vector<22x16xf32> to vector<16x16xf32>
    %354 = vector.broadcast %352 : f32 to vector<16x16xf32>
    %355 = arith.mulf %354, %353 : vector<16x16xf32>
    %356 = arith.addf %336, %355 : vector<16x16xf32>
    %c47 = arith.constant 47 : index
    %357 = memref.load %arg1[%c47] : memref<98xf32, #tpu.memory_space<smem>>
    %358 = vector.extract_strided_slice %326 {offsets = [6, 0], sizes = [16, 16], strides = [1, 1]} : vector<22x16xf32> to vector<16x16xf32>
    %359 = vector.broadcast %357 : f32 to vector<16x16xf32>
    %360 = arith.mulf %359, %358 : vector<16x16xf32>
    %361 = arith.addf %341, %360 : vector<16x16xf32>
    %c0_125 = arith.constant 0 : index
    %c0_126 = arith.constant 0 : index
    %c6_127 = arith.constant 6 : index
    %362 = vector.load %arg4[%c0_125, %c0_126, %c6_127] : memref<2x22x22xf32, #tpu.memory_space<vmem>>, vector<1x22x16xf32>
    %363 = vector.shape_cast %362 : vector<1x22x16xf32> to vector<22x16xf32>
    %c6_128 = arith.constant 6 : index
    %364 = memref.load %arg1[%c6_128] : memref<98xf32, #tpu.memory_space<smem>>
    %365 = vector.extract_strided_slice %363 {offsets = [0, 0], sizes = [16, 16], strides = [1, 1]} : vector<22x16xf32> to vector<16x16xf32>
    %366 = vector.broadcast %364 : f32 to vector<16x16xf32>
    %367 = arith.mulf %366, %365 : vector<16x16xf32>
    %368 = arith.addf %346, %367 : vector<16x16xf32>
    %c13_129 = arith.constant 13 : index
    %369 = memref.load %arg1[%c13_129] : memref<98xf32, #tpu.memory_space<smem>>
    %370 = vector.extract_strided_slice %363 {offsets = [1, 0], sizes = [16, 16], strides = [1, 1]} : vector<22x16xf32> to vector<16x16xf32>
    %371 = vector.broadcast %369 : f32 to vector<16x16xf32>
    %372 = arith.mulf %371, %370 : vector<16x16xf32>
    %373 = arith.addf %351, %372 : vector<16x16xf32>
    %c20 = arith.constant 20 : index
    %374 = memref.load %arg1[%c20] : memref<98xf32, #tpu.memory_space<smem>>
    %375 = vector.extract_strided_slice %363 {offsets = [2, 0], sizes = [16, 16], strides = [1, 1]} : vector<22x16xf32> to vector<16x16xf32>
    %376 = vector.broadcast %374 : f32 to vector<16x16xf32>
    %377 = arith.mulf %376, %375 : vector<16x16xf32>
    %378 = arith.addf %356, %377 : vector<16x16xf32>
    %c27 = arith.constant 27 : index
    %379 = memref.load %arg1[%c27] : memref<98xf32, #tpu.memory_space<smem>>
    %380 = vector.extract_strided_slice %363 {offsets = [3, 0], sizes = [16, 16], strides = [1, 1]} : vector<22x16xf32> to vector<16x16xf32>
    %381 = vector.broadcast %379 : f32 to vector<16x16xf32>
    %382 = arith.mulf %381, %380 : vector<16x16xf32>
    %383 = arith.addf %361, %382 : vector<16x16xf32>
    %c34 = arith.constant 34 : index
    %384 = memref.load %arg1[%c34] : memref<98xf32, #tpu.memory_space<smem>>
    %385 = vector.extract_strided_slice %363 {offsets = [4, 0], sizes = [16, 16], strides = [1, 1]} : vector<22x16xf32> to vector<16x16xf32>
    %386 = vector.broadcast %384 : f32 to vector<16x16xf32>
    %387 = arith.mulf %386, %385 : vector<16x16xf32>
    %388 = arith.addf %368, %387 : vector<16x16xf32>
    %c41 = arith.constant 41 : index
    %389 = memref.load %arg1[%c41] : memref<98xf32, #tpu.memory_space<smem>>
    %390 = vector.extract_strided_slice %363 {offsets = [5, 0], sizes = [16, 16], strides = [1, 1]} : vector<22x16xf32> to vector<16x16xf32>
    %391 = vector.broadcast %389 : f32 to vector<16x16xf32>
    %392 = arith.mulf %391, %390 : vector<16x16xf32>
    %393 = arith.addf %373, %392 : vector<16x16xf32>
    %c48 = arith.constant 48 : index
    %394 = memref.load %arg1[%c48] : memref<98xf32, #tpu.memory_space<smem>>
    %395 = vector.extract_strided_slice %363 {offsets = [6, 0], sizes = [16, 16], strides = [1, 1]} : vector<22x16xf32> to vector<16x16xf32>
    %396 = vector.broadcast %394 : f32 to vector<16x16xf32>
    %397 = arith.mulf %396, %395 : vector<16x16xf32>
    %398 = arith.addf %378, %397 : vector<16x16xf32>
    %c1_130 = arith.constant 1 : index
    %c0_131 = arith.constant 0 : index
    %c0_132 = arith.constant 0 : index
    %399 = vector.load %arg4[%c1_130, %c0_131, %c0_132] : memref<2x22x22xf32, #tpu.memory_space<vmem>>, vector<1x22x16xf32>
    %400 = vector.shape_cast %399 : vector<1x22x16xf32> to vector<22x16xf32>
    %c49 = arith.constant 49 : index
    %401 = memref.load %arg1[%c49] : memref<98xf32, #tpu.memory_space<smem>>
    %402 = vector.extract_strided_slice %400 {offsets = [0, 0], sizes = [16, 16], strides = [1, 1]} : vector<22x16xf32> to vector<16x16xf32>
    %403 = vector.broadcast %401 : f32 to vector<16x16xf32>
    %404 = arith.mulf %403, %402 : vector<16x16xf32>
    %405 = arith.addf %383, %404 : vector<16x16xf32>
    %c56 = arith.constant 56 : index
    %406 = memref.load %arg1[%c56] : memref<98xf32, #tpu.memory_space<smem>>
    %407 = vector.extract_strided_slice %400 {offsets = [1, 0], sizes = [16, 16], strides = [1, 1]} : vector<22x16xf32> to vector<16x16xf32>
    %408 = vector.broadcast %406 : f32 to vector<16x16xf32>
    %409 = arith.mulf %408, %407 : vector<16x16xf32>
    %410 = arith.addf %388, %409 : vector<16x16xf32>
    %c63 = arith.constant 63 : index
    %411 = memref.load %arg1[%c63] : memref<98xf32, #tpu.memory_space<smem>>
    %412 = vector.extract_strided_slice %400 {offsets = [2, 0], sizes = [16, 16], strides = [1, 1]} : vector<22x16xf32> to vector<16x16xf32>
    %413 = vector.broadcast %411 : f32 to vector<16x16xf32>
    %414 = arith.mulf %413, %412 : vector<16x16xf32>
    %415 = arith.addf %393, %414 : vector<16x16xf32>
    %c70 = arith.constant 70 : index
    %416 = memref.load %arg1[%c70] : memref<98xf32, #tpu.memory_space<smem>>
    %417 = vector.extract_strided_slice %400 {offsets = [3, 0], sizes = [16, 16], strides = [1, 1]} : vector<22x16xf32> to vector<16x16xf32>
    %418 = vector.broadcast %416 : f32 to vector<16x16xf32>
    %419 = arith.mulf %418, %417 : vector<16x16xf32>
    %420 = arith.addf %398, %419 : vector<16x16xf32>
    %c77 = arith.constant 77 : index
    %421 = memref.load %arg1[%c77] : memref<98xf32, #tpu.memory_space<smem>>
    %422 = vector.extract_strided_slice %400 {offsets = [4, 0], sizes = [16, 16], strides = [1, 1]} : vector<22x16xf32> to vector<16x16xf32>
    %423 = vector.broadcast %421 : f32 to vector<16x16xf32>
    %424 = arith.mulf %423, %422 : vector<16x16xf32>
    %425 = arith.addf %405, %424 : vector<16x16xf32>
    %c84 = arith.constant 84 : index
    %426 = memref.load %arg1[%c84] : memref<98xf32, #tpu.memory_space<smem>>
    %427 = vector.extract_strided_slice %400 {offsets = [5, 0], sizes = [16, 16], strides = [1, 1]} : vector<22x16xf32> to vector<16x16xf32>
    %428 = vector.broadcast %426 : f32 to vector<16x16xf32>
    %429 = arith.mulf %428, %427 : vector<16x16xf32>
    %430 = arith.addf %410, %429 : vector<16x16xf32>
    %c91 = arith.constant 91 : index
    %431 = memref.load %arg1[%c91] : memref<98xf32, #tpu.memory_space<smem>>
    %432 = vector.extract_strided_slice %400 {offsets = [6, 0], sizes = [16, 16], strides = [1, 1]} : vector<22x16xf32> to vector<16x16xf32>
    %433 = vector.broadcast %431 : f32 to vector<16x16xf32>
    %434 = arith.mulf %433, %432 : vector<16x16xf32>
    %435 = arith.addf %415, %434 : vector<16x16xf32>
    %c1_133 = arith.constant 1 : index
    %c0_134 = arith.constant 0 : index
    %c1_135 = arith.constant 1 : index
    %436 = vector.load %arg4[%c1_133, %c0_134, %c1_135] : memref<2x22x22xf32, #tpu.memory_space<vmem>>, vector<1x22x16xf32>
    %437 = vector.shape_cast %436 : vector<1x22x16xf32> to vector<22x16xf32>
    %c50 = arith.constant 50 : index
    %438 = memref.load %arg1[%c50] : memref<98xf32, #tpu.memory_space<smem>>
    %439 = vector.extract_strided_slice %437 {offsets = [0, 0], sizes = [16, 16], strides = [1, 1]} : vector<22x16xf32> to vector<16x16xf32>
    %440 = vector.broadcast %438 : f32 to vector<16x16xf32>
    %441 = arith.mulf %440, %439 : vector<16x16xf32>
    %442 = arith.addf %420, %441 : vector<16x16xf32>
    %c57 = arith.constant 57 : index
    %443 = memref.load %arg1[%c57] : memref<98xf32, #tpu.memory_space<smem>>
    %444 = vector.extract_strided_slice %437 {offsets = [1, 0], sizes = [16, 16], strides = [1, 1]} : vector<22x16xf32> to vector<16x16xf32>
    %445 = vector.broadcast %443 : f32 to vector<16x16xf32>
    %446 = arith.mulf %445, %444 : vector<16x16xf32>
    %447 = arith.addf %425, %446 : vector<16x16xf32>
    %c64 = arith.constant 64 : index
    %448 = memref.load %arg1[%c64] : memref<98xf32, #tpu.memory_space<smem>>
    %449 = vector.extract_strided_slice %437 {offsets = [2, 0], sizes = [16, 16], strides = [1, 1]} : vector<22x16xf32> to vector<16x16xf32>
    %450 = vector.broadcast %448 : f32 to vector<16x16xf32>
    %451 = arith.mulf %450, %449 : vector<16x16xf32>
    %452 = arith.addf %430, %451 : vector<16x16xf32>
    %c71 = arith.constant 71 : index
    %453 = memref.load %arg1[%c71] : memref<98xf32, #tpu.memory_space<smem>>
    %454 = vector.extract_strided_slice %437 {offsets = [3, 0], sizes = [16, 16], strides = [1, 1]} : vector<22x16xf32> to vector<16x16xf32>
    %455 = vector.broadcast %453 : f32 to vector<16x16xf32>
    %456 = arith.mulf %455, %454 : vector<16x16xf32>
    %457 = arith.addf %435, %456 : vector<16x16xf32>
    %c78 = arith.constant 78 : index
    %458 = memref.load %arg1[%c78] : memref<98xf32, #tpu.memory_space<smem>>
    %459 = vector.extract_strided_slice %437 {offsets = [4, 0], sizes = [16, 16], strides = [1, 1]} : vector<22x16xf32> to vector<16x16xf32>
    %460 = vector.broadcast %458 : f32 to vector<16x16xf32>
    %461 = arith.mulf %460, %459 : vector<16x16xf32>
    %462 = arith.addf %442, %461 : vector<16x16xf32>
    %c85 = arith.constant 85 : index
    %463 = memref.load %arg1[%c85] : memref<98xf32, #tpu.memory_space<smem>>
    %464 = vector.extract_strided_slice %437 {offsets = [5, 0], sizes = [16, 16], strides = [1, 1]} : vector<22x16xf32> to vector<16x16xf32>
    %465 = vector.broadcast %463 : f32 to vector<16x16xf32>
    %466 = arith.mulf %465, %464 : vector<16x16xf32>
    %467 = arith.addf %447, %466 : vector<16x16xf32>
    %c92 = arith.constant 92 : index
    %468 = memref.load %arg1[%c92] : memref<98xf32, #tpu.memory_space<smem>>
    %469 = vector.extract_strided_slice %437 {offsets = [6, 0], sizes = [16, 16], strides = [1, 1]} : vector<22x16xf32> to vector<16x16xf32>
    %470 = vector.broadcast %468 : f32 to vector<16x16xf32>
    %471 = arith.mulf %470, %469 : vector<16x16xf32>
    %472 = arith.addf %452, %471 : vector<16x16xf32>
    %c1_136 = arith.constant 1 : index
    %c0_137 = arith.constant 0 : index
    %c2_138 = arith.constant 2 : index
    %473 = vector.load %arg4[%c1_136, %c0_137, %c2_138] : memref<2x22x22xf32, #tpu.memory_space<vmem>>, vector<1x22x16xf32>
    %474 = vector.shape_cast %473 : vector<1x22x16xf32> to vector<22x16xf32>
    %c51 = arith.constant 51 : index
    %475 = memref.load %arg1[%c51] : memref<98xf32, #tpu.memory_space<smem>>
    %476 = vector.extract_strided_slice %474 {offsets = [0, 0], sizes = [16, 16], strides = [1, 1]} : vector<22x16xf32> to vector<16x16xf32>
    %477 = vector.broadcast %475 : f32 to vector<16x16xf32>
    %478 = arith.mulf %477, %476 : vector<16x16xf32>
    %479 = arith.addf %457, %478 : vector<16x16xf32>
    %c58 = arith.constant 58 : index
    %480 = memref.load %arg1[%c58] : memref<98xf32, #tpu.memory_space<smem>>
    %481 = vector.extract_strided_slice %474 {offsets = [1, 0], sizes = [16, 16], strides = [1, 1]} : vector<22x16xf32> to vector<16x16xf32>
    %482 = vector.broadcast %480 : f32 to vector<16x16xf32>
    %483 = arith.mulf %482, %481 : vector<16x16xf32>
    %484 = arith.addf %462, %483 : vector<16x16xf32>
    %c65 = arith.constant 65 : index
    %485 = memref.load %arg1[%c65] : memref<98xf32, #tpu.memory_space<smem>>
    %486 = vector.extract_strided_slice %474 {offsets = [2, 0], sizes = [16, 16], strides = [1, 1]} : vector<22x16xf32> to vector<16x16xf32>
    %487 = vector.broadcast %485 : f32 to vector<16x16xf32>
    %488 = arith.mulf %487, %486 : vector<16x16xf32>
    %489 = arith.addf %467, %488 : vector<16x16xf32>
    %c72 = arith.constant 72 : index
    %490 = memref.load %arg1[%c72] : memref<98xf32, #tpu.memory_space<smem>>
    %491 = vector.extract_strided_slice %474 {offsets = [3, 0], sizes = [16, 16], strides = [1, 1]} : vector<22x16xf32> to vector<16x16xf32>
    %492 = vector.broadcast %490 : f32 to vector<16x16xf32>
    %493 = arith.mulf %492, %491 : vector<16x16xf32>
    %494 = arith.addf %472, %493 : vector<16x16xf32>
    %c79 = arith.constant 79 : index
    %495 = memref.load %arg1[%c79] : memref<98xf32, #tpu.memory_space<smem>>
    %496 = vector.extract_strided_slice %474 {offsets = [4, 0], sizes = [16, 16], strides = [1, 1]} : vector<22x16xf32> to vector<16x16xf32>
    %497 = vector.broadcast %495 : f32 to vector<16x16xf32>
    %498 = arith.mulf %497, %496 : vector<16x16xf32>
    %499 = arith.addf %479, %498 : vector<16x16xf32>
    %c86 = arith.constant 86 : index
    %500 = memref.load %arg1[%c86] : memref<98xf32, #tpu.memory_space<smem>>
    %501 = vector.extract_strided_slice %474 {offsets = [5, 0], sizes = [16, 16], strides = [1, 1]} : vector<22x16xf32> to vector<16x16xf32>
    %502 = vector.broadcast %500 : f32 to vector<16x16xf32>
    %503 = arith.mulf %502, %501 : vector<16x16xf32>
    %504 = arith.addf %484, %503 : vector<16x16xf32>
    %c93 = arith.constant 93 : index
    %505 = memref.load %arg1[%c93] : memref<98xf32, #tpu.memory_space<smem>>
    %506 = vector.extract_strided_slice %474 {offsets = [6, 0], sizes = [16, 16], strides = [1, 1]} : vector<22x16xf32> to vector<16x16xf32>
    %507 = vector.broadcast %505 : f32 to vector<16x16xf32>
    %508 = arith.mulf %507, %506 : vector<16x16xf32>
    %509 = arith.addf %489, %508 : vector<16x16xf32>
    %c1_139 = arith.constant 1 : index
    %c0_140 = arith.constant 0 : index
    %c3_141 = arith.constant 3 : index
    %510 = vector.load %arg4[%c1_139, %c0_140, %c3_141] : memref<2x22x22xf32, #tpu.memory_space<vmem>>, vector<1x22x16xf32>
    %511 = vector.shape_cast %510 : vector<1x22x16xf32> to vector<22x16xf32>
    %c52 = arith.constant 52 : index
    %512 = memref.load %arg1[%c52] : memref<98xf32, #tpu.memory_space<smem>>
    %513 = vector.extract_strided_slice %511 {offsets = [0, 0], sizes = [16, 16], strides = [1, 1]} : vector<22x16xf32> to vector<16x16xf32>
    %514 = vector.broadcast %512 : f32 to vector<16x16xf32>
    %515 = arith.mulf %514, %513 : vector<16x16xf32>
    %516 = arith.addf %494, %515 : vector<16x16xf32>
    %c59 = arith.constant 59 : index
    %517 = memref.load %arg1[%c59] : memref<98xf32, #tpu.memory_space<smem>>
    %518 = vector.extract_strided_slice %511 {offsets = [1, 0], sizes = [16, 16], strides = [1, 1]} : vector<22x16xf32> to vector<16x16xf32>
    %519 = vector.broadcast %517 : f32 to vector<16x16xf32>
    %520 = arith.mulf %519, %518 : vector<16x16xf32>
    %521 = arith.addf %499, %520 : vector<16x16xf32>
    %c66 = arith.constant 66 : index
    %522 = memref.load %arg1[%c66] : memref<98xf32, #tpu.memory_space<smem>>
    %523 = vector.extract_strided_slice %511 {offsets = [2, 0], sizes = [16, 16], strides = [1, 1]} : vector<22x16xf32> to vector<16x16xf32>
    %524 = vector.broadcast %522 : f32 to vector<16x16xf32>
    %525 = arith.mulf %524, %523 : vector<16x16xf32>
    %526 = arith.addf %504, %525 : vector<16x16xf32>
    %c73 = arith.constant 73 : index
    %527 = memref.load %arg1[%c73] : memref<98xf32, #tpu.memory_space<smem>>
    %528 = vector.extract_strided_slice %511 {offsets = [3, 0], sizes = [16, 16], strides = [1, 1]} : vector<22x16xf32> to vector<16x16xf32>
    %529 = vector.broadcast %527 : f32 to vector<16x16xf32>
    %530 = arith.mulf %529, %528 : vector<16x16xf32>
    %531 = arith.addf %509, %530 : vector<16x16xf32>
    %c80 = arith.constant 80 : index
    %532 = memref.load %arg1[%c80] : memref<98xf32, #tpu.memory_space<smem>>
    %533 = vector.extract_strided_slice %511 {offsets = [4, 0], sizes = [16, 16], strides = [1, 1]} : vector<22x16xf32> to vector<16x16xf32>
    %534 = vector.broadcast %532 : f32 to vector<16x16xf32>
    %535 = arith.mulf %534, %533 : vector<16x16xf32>
    %536 = arith.addf %516, %535 : vector<16x16xf32>
    %c87 = arith.constant 87 : index
    %537 = memref.load %arg1[%c87] : memref<98xf32, #tpu.memory_space<smem>>
    %538 = vector.extract_strided_slice %511 {offsets = [5, 0], sizes = [16, 16], strides = [1, 1]} : vector<22x16xf32> to vector<16x16xf32>
    %539 = vector.broadcast %537 : f32 to vector<16x16xf32>
    %540 = arith.mulf %539, %538 : vector<16x16xf32>
    %541 = arith.addf %521, %540 : vector<16x16xf32>
    %c94 = arith.constant 94 : index
    %542 = memref.load %arg1[%c94] : memref<98xf32, #tpu.memory_space<smem>>
    %543 = vector.extract_strided_slice %511 {offsets = [6, 0], sizes = [16, 16], strides = [1, 1]} : vector<22x16xf32> to vector<16x16xf32>
    %544 = vector.broadcast %542 : f32 to vector<16x16xf32>
    %545 = arith.mulf %544, %543 : vector<16x16xf32>
    %546 = arith.addf %526, %545 : vector<16x16xf32>
    %c1_142 = arith.constant 1 : index
    %c0_143 = arith.constant 0 : index
    %c4_144 = arith.constant 4 : index
    %547 = vector.load %arg4[%c1_142, %c0_143, %c4_144] : memref<2x22x22xf32, #tpu.memory_space<vmem>>, vector<1x22x16xf32>
    %548 = vector.shape_cast %547 : vector<1x22x16xf32> to vector<22x16xf32>
    %c53 = arith.constant 53 : index
    %549 = memref.load %arg1[%c53] : memref<98xf32, #tpu.memory_space<smem>>
    %550 = vector.extract_strided_slice %548 {offsets = [0, 0], sizes = [16, 16], strides = [1, 1]} : vector<22x16xf32> to vector<16x16xf32>
    %551 = vector.broadcast %549 : f32 to vector<16x16xf32>
    %552 = arith.mulf %551, %550 : vector<16x16xf32>
    %553 = arith.addf %531, %552 : vector<16x16xf32>
    %c60 = arith.constant 60 : index
    %554 = memref.load %arg1[%c60] : memref<98xf32, #tpu.memory_space<smem>>
    %555 = vector.extract_strided_slice %548 {offsets = [1, 0], sizes = [16, 16], strides = [1, 1]} : vector<22x16xf32> to vector<16x16xf32>
    %556 = vector.broadcast %554 : f32 to vector<16x16xf32>
    %557 = arith.mulf %556, %555 : vector<16x16xf32>
    %558 = arith.addf %536, %557 : vector<16x16xf32>
    %c67 = arith.constant 67 : index
    %559 = memref.load %arg1[%c67] : memref<98xf32, #tpu.memory_space<smem>>
    %560 = vector.extract_strided_slice %548 {offsets = [2, 0], sizes = [16, 16], strides = [1, 1]} : vector<22x16xf32> to vector<16x16xf32>
    %561 = vector.broadcast %559 : f32 to vector<16x16xf32>
    %562 = arith.mulf %561, %560 : vector<16x16xf32>
    %563 = arith.addf %541, %562 : vector<16x16xf32>
    %c74 = arith.constant 74 : index
    %564 = memref.load %arg1[%c74] : memref<98xf32, #tpu.memory_space<smem>>
    %565 = vector.extract_strided_slice %548 {offsets = [3, 0], sizes = [16, 16], strides = [1, 1]} : vector<22x16xf32> to vector<16x16xf32>
    %566 = vector.broadcast %564 : f32 to vector<16x16xf32>
    %567 = arith.mulf %566, %565 : vector<16x16xf32>
    %568 = arith.addf %546, %567 : vector<16x16xf32>
    %c81 = arith.constant 81 : index
    %569 = memref.load %arg1[%c81] : memref<98xf32, #tpu.memory_space<smem>>
    %570 = vector.extract_strided_slice %548 {offsets = [4, 0], sizes = [16, 16], strides = [1, 1]} : vector<22x16xf32> to vector<16x16xf32>
    %571 = vector.broadcast %569 : f32 to vector<16x16xf32>
    %572 = arith.mulf %571, %570 : vector<16x16xf32>
    %573 = arith.addf %553, %572 : vector<16x16xf32>
    %c88 = arith.constant 88 : index
    %574 = memref.load %arg1[%c88] : memref<98xf32, #tpu.memory_space<smem>>
    %575 = vector.extract_strided_slice %548 {offsets = [5, 0], sizes = [16, 16], strides = [1, 1]} : vector<22x16xf32> to vector<16x16xf32>
    %576 = vector.broadcast %574 : f32 to vector<16x16xf32>
    %577 = arith.mulf %576, %575 : vector<16x16xf32>
    %578 = arith.addf %558, %577 : vector<16x16xf32>
    %c95 = arith.constant 95 : index
    %579 = memref.load %arg1[%c95] : memref<98xf32, #tpu.memory_space<smem>>
    %580 = vector.extract_strided_slice %548 {offsets = [6, 0], sizes = [16, 16], strides = [1, 1]} : vector<22x16xf32> to vector<16x16xf32>
    %581 = vector.broadcast %579 : f32 to vector<16x16xf32>
    %582 = arith.mulf %581, %580 : vector<16x16xf32>
    %583 = arith.addf %563, %582 : vector<16x16xf32>
    %c1_145 = arith.constant 1 : index
    %c0_146 = arith.constant 0 : index
    %c5_147 = arith.constant 5 : index
    %584 = vector.load %arg4[%c1_145, %c0_146, %c5_147] : memref<2x22x22xf32, #tpu.memory_space<vmem>>, vector<1x22x16xf32>
    %585 = vector.shape_cast %584 : vector<1x22x16xf32> to vector<22x16xf32>
    %c54 = arith.constant 54 : index
    %586 = memref.load %arg1[%c54] : memref<98xf32, #tpu.memory_space<smem>>
    %587 = vector.extract_strided_slice %585 {offsets = [0, 0], sizes = [16, 16], strides = [1, 1]} : vector<22x16xf32> to vector<16x16xf32>
    %588 = vector.broadcast %586 : f32 to vector<16x16xf32>
    %589 = arith.mulf %588, %587 : vector<16x16xf32>
    %590 = arith.addf %568, %589 : vector<16x16xf32>
    %c61 = arith.constant 61 : index
    %591 = memref.load %arg1[%c61] : memref<98xf32, #tpu.memory_space<smem>>
    %592 = vector.extract_strided_slice %585 {offsets = [1, 0], sizes = [16, 16], strides = [1, 1]} : vector<22x16xf32> to vector<16x16xf32>
    %593 = vector.broadcast %591 : f32 to vector<16x16xf32>
    %594 = arith.mulf %593, %592 : vector<16x16xf32>
    %595 = arith.addf %573, %594 : vector<16x16xf32>
    %c68 = arith.constant 68 : index
    %596 = memref.load %arg1[%c68] : memref<98xf32, #tpu.memory_space<smem>>
    %597 = vector.extract_strided_slice %585 {offsets = [2, 0], sizes = [16, 16], strides = [1, 1]} : vector<22x16xf32> to vector<16x16xf32>
    %598 = vector.broadcast %596 : f32 to vector<16x16xf32>
    %599 = arith.mulf %598, %597 : vector<16x16xf32>
    %600 = arith.addf %578, %599 : vector<16x16xf32>
    %c75 = arith.constant 75 : index
    %601 = memref.load %arg1[%c75] : memref<98xf32, #tpu.memory_space<smem>>
    %602 = vector.extract_strided_slice %585 {offsets = [3, 0], sizes = [16, 16], strides = [1, 1]} : vector<22x16xf32> to vector<16x16xf32>
    %603 = vector.broadcast %601 : f32 to vector<16x16xf32>
    %604 = arith.mulf %603, %602 : vector<16x16xf32>
    %605 = arith.addf %583, %604 : vector<16x16xf32>
    %c82 = arith.constant 82 : index
    %606 = memref.load %arg1[%c82] : memref<98xf32, #tpu.memory_space<smem>>
    %607 = vector.extract_strided_slice %585 {offsets = [4, 0], sizes = [16, 16], strides = [1, 1]} : vector<22x16xf32> to vector<16x16xf32>
    %608 = vector.broadcast %606 : f32 to vector<16x16xf32>
    %609 = arith.mulf %608, %607 : vector<16x16xf32>
    %610 = arith.addf %590, %609 : vector<16x16xf32>
    %c89 = arith.constant 89 : index
    %611 = memref.load %arg1[%c89] : memref<98xf32, #tpu.memory_space<smem>>
    %612 = vector.extract_strided_slice %585 {offsets = [5, 0], sizes = [16, 16], strides = [1, 1]} : vector<22x16xf32> to vector<16x16xf32>
    %613 = vector.broadcast %611 : f32 to vector<16x16xf32>
    %614 = arith.mulf %613, %612 : vector<16x16xf32>
    %615 = arith.addf %595, %614 : vector<16x16xf32>
    %c96 = arith.constant 96 : index
    %616 = memref.load %arg1[%c96] : memref<98xf32, #tpu.memory_space<smem>>
    %617 = vector.extract_strided_slice %585 {offsets = [6, 0], sizes = [16, 16], strides = [1, 1]} : vector<22x16xf32> to vector<16x16xf32>
    %618 = vector.broadcast %616 : f32 to vector<16x16xf32>
    %619 = arith.mulf %618, %617 : vector<16x16xf32>
    %620 = arith.addf %600, %619 : vector<16x16xf32>
    %c1_148 = arith.constant 1 : index
    %c0_149 = arith.constant 0 : index
    %c6_150 = arith.constant 6 : index
    %621 = vector.load %arg4[%c1_148, %c0_149, %c6_150] : memref<2x22x22xf32, #tpu.memory_space<vmem>>, vector<1x22x16xf32>
    %622 = vector.shape_cast %621 : vector<1x22x16xf32> to vector<22x16xf32>
    %c55 = arith.constant 55 : index
    %623 = memref.load %arg1[%c55] : memref<98xf32, #tpu.memory_space<smem>>
    %624 = vector.extract_strided_slice %622 {offsets = [0, 0], sizes = [16, 16], strides = [1, 1]} : vector<22x16xf32> to vector<16x16xf32>
    %625 = vector.broadcast %623 : f32 to vector<16x16xf32>
    %626 = arith.mulf %625, %624 : vector<16x16xf32>
    %627 = arith.addf %605, %626 : vector<16x16xf32>
    %c62 = arith.constant 62 : index
    %628 = memref.load %arg1[%c62] : memref<98xf32, #tpu.memory_space<smem>>
    %629 = vector.extract_strided_slice %622 {offsets = [1, 0], sizes = [16, 16], strides = [1, 1]} : vector<22x16xf32> to vector<16x16xf32>
    %630 = vector.broadcast %628 : f32 to vector<16x16xf32>
    %631 = arith.mulf %630, %629 : vector<16x16xf32>
    %632 = arith.addf %610, %631 : vector<16x16xf32>
    %c69 = arith.constant 69 : index
    %633 = memref.load %arg1[%c69] : memref<98xf32, #tpu.memory_space<smem>>
    %634 = vector.extract_strided_slice %622 {offsets = [2, 0], sizes = [16, 16], strides = [1, 1]} : vector<22x16xf32> to vector<16x16xf32>
    %635 = vector.broadcast %633 : f32 to vector<16x16xf32>
    %636 = arith.mulf %635, %634 : vector<16x16xf32>
    %637 = arith.addf %615, %636 : vector<16x16xf32>
    %c76 = arith.constant 76 : index
    %638 = memref.load %arg1[%c76] : memref<98xf32, #tpu.memory_space<smem>>
    %639 = vector.extract_strided_slice %622 {offsets = [3, 0], sizes = [16, 16], strides = [1, 1]} : vector<22x16xf32> to vector<16x16xf32>
    %640 = vector.broadcast %638 : f32 to vector<16x16xf32>
    %641 = arith.mulf %640, %639 : vector<16x16xf32>
    %642 = arith.addf %620, %641 : vector<16x16xf32>
    %c83 = arith.constant 83 : index
    %643 = memref.load %arg1[%c83] : memref<98xf32, #tpu.memory_space<smem>>
    %644 = vector.extract_strided_slice %622 {offsets = [4, 0], sizes = [16, 16], strides = [1, 1]} : vector<22x16xf32> to vector<16x16xf32>
    %645 = vector.broadcast %643 : f32 to vector<16x16xf32>
    %646 = arith.mulf %645, %644 : vector<16x16xf32>
    %647 = arith.addf %627, %646 : vector<16x16xf32>
    %c90 = arith.constant 90 : index
    %648 = memref.load %arg1[%c90] : memref<98xf32, #tpu.memory_space<smem>>
    %649 = vector.extract_strided_slice %622 {offsets = [5, 0], sizes = [16, 16], strides = [1, 1]} : vector<22x16xf32> to vector<16x16xf32>
    %650 = vector.broadcast %648 : f32 to vector<16x16xf32>
    %651 = arith.mulf %650, %649 : vector<16x16xf32>
    %652 = arith.addf %632, %651 : vector<16x16xf32>
    %c97 = arith.constant 97 : index
    %653 = memref.load %arg1[%c97] : memref<98xf32, #tpu.memory_space<smem>>
    %654 = vector.extract_strided_slice %622 {offsets = [6, 0], sizes = [16, 16], strides = [1, 1]} : vector<22x16xf32> to vector<16x16xf32>
    %655 = vector.broadcast %653 : f32 to vector<16x16xf32>
    %656 = arith.mulf %655, %654 : vector<16x16xf32>
    %657 = arith.addf %637, %656 : vector<16x16xf32>
    %658 = arith.addf %652, %657 : vector<16x16xf32>
    %659 = arith.addf %642, %647 : vector<16x16xf32>
    %660 = arith.addf %658, %659 : vector<16x16xf32>
    %661 = arith.negf %660 : vector<16x16xf32>
    %662 = math.exp %661 : vector<16x16xf32>
    %cst_151 = arith.constant 1.000000e+00 : f32
    %663 = vector.broadcast %cst_151 : f32 to vector<16x16xf32>
    %664 = arith.addf %663, %662 : vector<16x16xf32>
    %665 = arith.divf %663, %664 : vector<16x16xf32>
    %666 = vector.extract_strided_slice %665 {offsets = [0, 0], sizes = [1, 16], strides = [1, 1]} : vector<16x16xf32> to vector<1x16xf32>
    %667 = vector.shape_cast %666 : vector<1x16xf32> to vector<16xf32>
    %c0_152 = arith.constant 0 : index
    %c0_153 = arith.constant 0 : index
    %668 = vector.load %arg5[%c0_152, %c0_153] : memref<1x256xf32, #tpu.memory_space<vmem>>, vector<1x16xf32>
    %669 = vector.shape_cast %668 : vector<1x16xf32> to vector<16xf32>
    %670 = vector.shape_cast %667 : vector<16xf32> to vector<1x16xf32>
    tpu.vector_store %arg5[%c0_152, %c0_153], %670 {strides = array<i32>} : memref<1x256xf32, #tpu.memory_space<vmem>>, vector<1x16xf32>,
    %671 = vector.extract_strided_slice %665 {offsets = [1, 0], sizes = [1, 16], strides = [1, 1]} : vector<16x16xf32> to vector<1x16xf32>
    %672 = vector.shape_cast %671 : vector<1x16xf32> to vector<16xf32>
    %c0_154 = arith.constant 0 : index
    %c16_155 = arith.constant 16 : index
    %673 = vector.load %arg5[%c0_154, %c16_155] : memref<1x256xf32, #tpu.memory_space<vmem>>, vector<1x16xf32>
    %674 = vector.shape_cast %673 : vector<1x16xf32> to vector<16xf32>
    %675 = vector.shape_cast %672 : vector<16xf32> to vector<1x16xf32>
    tpu.vector_store %arg5[%c0_154, %c16_155], %675 {strides = array<i32>} : memref<1x256xf32, #tpu.memory_space<vmem>>, vector<1x16xf32>,
    %676 = vector.extract_strided_slice %665 {offsets = [2, 0], sizes = [1, 16], strides = [1, 1]} : vector<16x16xf32> to vector<1x16xf32>
    %677 = vector.shape_cast %676 : vector<1x16xf32> to vector<16xf32>
    %c0_156 = arith.constant 0 : index
    %c32_157 = arith.constant 32 : index
    %678 = vector.load %arg5[%c0_156, %c32_157] : memref<1x256xf32, #tpu.memory_space<vmem>>, vector<1x16xf32>
    %679 = vector.shape_cast %678 : vector<1x16xf32> to vector<16xf32>
    %680 = vector.shape_cast %677 : vector<16xf32> to vector<1x16xf32>
    tpu.vector_store %arg5[%c0_156, %c32_157], %680 {strides = array<i32>} : memref<1x256xf32, #tpu.memory_space<vmem>>, vector<1x16xf32>,
    %681 = vector.extract_strided_slice %665 {offsets = [3, 0], sizes = [1, 16], strides = [1, 1]} : vector<16x16xf32> to vector<1x16xf32>
    %682 = vector.shape_cast %681 : vector<1x16xf32> to vector<16xf32>
    %c0_158 = arith.constant 0 : index
    %c48_159 = arith.constant 48 : index
    %683 = vector.load %arg5[%c0_158, %c48_159] : memref<1x256xf32, #tpu.memory_space<vmem>>, vector<1x16xf32>
    %684 = vector.shape_cast %683 : vector<1x16xf32> to vector<16xf32>
    %685 = vector.shape_cast %682 : vector<16xf32> to vector<1x16xf32>
    tpu.vector_store %arg5[%c0_158, %c48_159], %685 {strides = array<i32>} : memref<1x256xf32, #tpu.memory_space<vmem>>, vector<1x16xf32>,
    %686 = vector.extract_strided_slice %665 {offsets = [4, 0], sizes = [1, 16], strides = [1, 1]} : vector<16x16xf32> to vector<1x16xf32>
    %687 = vector.shape_cast %686 : vector<1x16xf32> to vector<16xf32>
    %c0_160 = arith.constant 0 : index
    %c64_161 = arith.constant 64 : index
    %688 = vector.load %arg5[%c0_160, %c64_161] : memref<1x256xf32, #tpu.memory_space<vmem>>, vector<1x16xf32>
    %689 = vector.shape_cast %688 : vector<1x16xf32> to vector<16xf32>
    %690 = vector.shape_cast %687 : vector<16xf32> to vector<1x16xf32>
    tpu.vector_store %arg5[%c0_160, %c64_161], %690 {strides = array<i32>} : memref<1x256xf32, #tpu.memory_space<vmem>>, vector<1x16xf32>,
    %691 = vector.extract_strided_slice %665 {offsets = [5, 0], sizes = [1, 16], strides = [1, 1]} : vector<16x16xf32> to vector<1x16xf32>
    %692 = vector.shape_cast %691 : vector<1x16xf32> to vector<16xf32>
    %c0_162 = arith.constant 0 : index
    %c80_163 = arith.constant 80 : index
    %693 = vector.load %arg5[%c0_162, %c80_163] : memref<1x256xf32, #tpu.memory_space<vmem>>, vector<1x16xf32>
    %694 = vector.shape_cast %693 : vector<1x16xf32> to vector<16xf32>
    %695 = vector.shape_cast %692 : vector<16xf32> to vector<1x16xf32>
    tpu.vector_store %arg5[%c0_162, %c80_163], %695 {strides = array<i32>} : memref<1x256xf32, #tpu.memory_space<vmem>>, vector<1x16xf32>,
    %696 = vector.extract_strided_slice %665 {offsets = [6, 0], sizes = [1, 16], strides = [1, 1]} : vector<16x16xf32> to vector<1x16xf32>
    %697 = vector.shape_cast %696 : vector<1x16xf32> to vector<16xf32>
    %c0_164 = arith.constant 0 : index
    %c96_165 = arith.constant 96 : index
    %698 = vector.load %arg5[%c0_164, %c96_165] : memref<1x256xf32, #tpu.memory_space<vmem>>, vector<1x16xf32>
    %699 = vector.shape_cast %698 : vector<1x16xf32> to vector<16xf32>
    %700 = vector.shape_cast %697 : vector<16xf32> to vector<1x16xf32>
    tpu.vector_store %arg5[%c0_164, %c96_165], %700 {strides = array<i32>} : memref<1x256xf32, #tpu.memory_space<vmem>>, vector<1x16xf32>,
    %701 = vector.extract_strided_slice %665 {offsets = [7, 0], sizes = [1, 16], strides = [1, 1]} : vector<16x16xf32> to vector<1x16xf32>
    %702 = vector.shape_cast %701 : vector<1x16xf32> to vector<16xf32>
    %c0_166 = arith.constant 0 : index
    %c112 = arith.constant 112 : index
    %703 = vector.load %arg5[%c0_166, %c112] : memref<1x256xf32, #tpu.memory_space<vmem>>, vector<1x16xf32>
    %704 = vector.shape_cast %703 : vector<1x16xf32> to vector<16xf32>
    %705 = vector.shape_cast %702 : vector<16xf32> to vector<1x16xf32>
    tpu.vector_store %arg5[%c0_166, %c112], %705 {strides = array<i32>} : memref<1x256xf32, #tpu.memory_space<vmem>>, vector<1x16xf32>,
    %706 = vector.extract_strided_slice %665 {offsets = [8, 0], sizes = [1, 16], strides = [1, 1]} : vector<16x16xf32> to vector<1x16xf32>
    %707 = vector.shape_cast %706 : vector<1x16xf32> to vector<16xf32>
    %c0_167 = arith.constant 0 : index
    %c128 = arith.constant 128 : index
    %708 = vector.load %arg5[%c0_167, %c128] : memref<1x256xf32, #tpu.memory_space<vmem>>, vector<1x16xf32>
    %709 = vector.shape_cast %708 : vector<1x16xf32> to vector<16xf32>
    %710 = vector.shape_cast %707 : vector<16xf32> to vector<1x16xf32>
    tpu.vector_store %arg5[%c0_167, %c128], %710 {strides = array<i32>} : memref<1x256xf32, #tpu.memory_space<vmem>>, vector<1x16xf32>,
    %711 = vector.extract_strided_slice %665 {offsets = [9, 0], sizes = [1, 16], strides = [1, 1]} : vector<16x16xf32> to vector<1x16xf32>
    %712 = vector.shape_cast %711 : vector<1x16xf32> to vector<16xf32>
    %c0_168 = arith.constant 0 : index
    %c144 = arith.constant 144 : index
    %713 = vector.load %arg5[%c0_168, %c144] : memref<1x256xf32, #tpu.memory_space<vmem>>, vector<1x16xf32>
    %714 = vector.shape_cast %713 : vector<1x16xf32> to vector<16xf32>
    %715 = vector.shape_cast %712 : vector<16xf32> to vector<1x16xf32>
    tpu.vector_store %arg5[%c0_168, %c144], %715 {strides = array<i32>} : memref<1x256xf32, #tpu.memory_space<vmem>>, vector<1x16xf32>,
    %716 = vector.extract_strided_slice %665 {offsets = [10, 0], sizes = [1, 16], strides = [1, 1]} : vector<16x16xf32> to vector<1x16xf32>
    %717 = vector.shape_cast %716 : vector<1x16xf32> to vector<16xf32>
    %c0_169 = arith.constant 0 : index
    %c160 = arith.constant 160 : index
    %718 = vector.load %arg5[%c0_169, %c160] : memref<1x256xf32, #tpu.memory_space<vmem>>, vector<1x16xf32>
    %719 = vector.shape_cast %718 : vector<1x16xf32> to vector<16xf32>
    %720 = vector.shape_cast %717 : vector<16xf32> to vector<1x16xf32>
    tpu.vector_store %arg5[%c0_169, %c160], %720 {strides = array<i32>} : memref<1x256xf32, #tpu.memory_space<vmem>>, vector<1x16xf32>,
    %721 = vector.extract_strided_slice %665 {offsets = [11, 0], sizes = [1, 16], strides = [1, 1]} : vector<16x16xf32> to vector<1x16xf32>
    %722 = vector.shape_cast %721 : vector<1x16xf32> to vector<16xf32>
    %c0_170 = arith.constant 0 : index
    %c176 = arith.constant 176 : index
    %723 = vector.load %arg5[%c0_170, %c176] : memref<1x256xf32, #tpu.memory_space<vmem>>, vector<1x16xf32>
    %724 = vector.shape_cast %723 : vector<1x16xf32> to vector<16xf32>
    %725 = vector.shape_cast %722 : vector<16xf32> to vector<1x16xf32>
    tpu.vector_store %arg5[%c0_170, %c176], %725 {strides = array<i32>} : memref<1x256xf32, #tpu.memory_space<vmem>>, vector<1x16xf32>,
    %726 = vector.extract_strided_slice %665 {offsets = [12, 0], sizes = [1, 16], strides = [1, 1]} : vector<16x16xf32> to vector<1x16xf32>
    %727 = vector.shape_cast %726 : vector<1x16xf32> to vector<16xf32>
    %c0_171 = arith.constant 0 : index
    %c192 = arith.constant 192 : index
    %728 = vector.load %arg5[%c0_171, %c192] : memref<1x256xf32, #tpu.memory_space<vmem>>, vector<1x16xf32>
    %729 = vector.shape_cast %728 : vector<1x16xf32> to vector<16xf32>
    %730 = vector.shape_cast %727 : vector<16xf32> to vector<1x16xf32>
    tpu.vector_store %arg5[%c0_171, %c192], %730 {strides = array<i32>} : memref<1x256xf32, #tpu.memory_space<vmem>>, vector<1x16xf32>,
    %731 = vector.extract_strided_slice %665 {offsets = [13, 0], sizes = [1, 16], strides = [1, 1]} : vector<16x16xf32> to vector<1x16xf32>
    %732 = vector.shape_cast %731 : vector<1x16xf32> to vector<16xf32>
    %c0_172 = arith.constant 0 : index
    %c208 = arith.constant 208 : index
    %733 = vector.load %arg5[%c0_172, %c208] : memref<1x256xf32, #tpu.memory_space<vmem>>, vector<1x16xf32>
    %734 = vector.shape_cast %733 : vector<1x16xf32> to vector<16xf32>
    %735 = vector.shape_cast %732 : vector<16xf32> to vector<1x16xf32>
    tpu.vector_store %arg5[%c0_172, %c208], %735 {strides = array<i32>} : memref<1x256xf32, #tpu.memory_space<vmem>>, vector<1x16xf32>,
    %736 = vector.extract_strided_slice %665 {offsets = [14, 0], sizes = [1, 16], strides = [1, 1]} : vector<16x16xf32> to vector<1x16xf32>
    %737 = vector.shape_cast %736 : vector<1x16xf32> to vector<16xf32>
    %c0_173 = arith.constant 0 : index
    %c224 = arith.constant 224 : index
    %738 = vector.load %arg5[%c0_173, %c224] : memref<1x256xf32, #tpu.memory_space<vmem>>, vector<1x16xf32>
    %739 = vector.shape_cast %738 : vector<1x16xf32> to vector<16xf32>
    %740 = vector.shape_cast %737 : vector<16xf32> to vector<1x16xf32>
    tpu.vector_store %arg5[%c0_173, %c224], %740 {strides = array<i32>} : memref<1x256xf32, #tpu.memory_space<vmem>>, vector<1x16xf32>,
    %741 = vector.extract_strided_slice %665 {offsets = [15, 0], sizes = [1, 16], strides = [1, 1]} : vector<16x16xf32> to vector<1x16xf32>
    %742 = vector.shape_cast %741 : vector<1x16xf32> to vector<16xf32>
    %c0_174 = arith.constant 0 : index
    %c240 = arith.constant 240 : index
    %743 = vector.load %arg5[%c0_174, %c240] : memref<1x256xf32, #tpu.memory_space<vmem>>, vector<1x16xf32>
    %744 = vector.shape_cast %743 : vector<1x16xf32> to vector<16xf32>
    %745 = vector.shape_cast %742 : vector<16xf32> to vector<1x16xf32>
    tpu.vector_store %arg5[%c0_174, %c240], %745 {strides = array<i32>} : memref<1x256xf32, #tpu.memory_space<vmem>>, vector<1x16xf32>,
    %c0_175 = arith.constant 0 : index
    %c0_176 = arith.constant 0 : index
    %746 = vector.load %arg5[%c0_175, %c0_176] : memref<1x256xf32, #tpu.memory_space<vmem>>, vector<1x256xf32>
    %747 = vector.shape_cast %746 : vector<1x256xf32> to vector<256xf32>
    %748 = vector.shape_cast %747 : vector<256xf32> to vector<1x256xf32>
    %749 = vector.broadcast %748 : vector<1x256xf32> to vector<4x256xf32>
    %750 = arith.mulf %1, %749 : vector<4x256xf32>
    %c0_177 = arith.constant 0 : index
    %c0_178 = arith.constant 0 : index
    %c0_179 = arith.constant 0 : index
    %751 = vector.load %arg3[%c0_177, %c0_178, %c0_179] : memref<1x4x256xf32, #tpu.memory_space<vmem>>, vector<1x4x256xf32>
    %752 = vector.shape_cast %751 : vector<1x4x256xf32> to vector<4x256xf32>
    %753 = vector.shape_cast %750 : vector<4x256xf32> to vector<1x4x256xf32>
    tpu.vector_store %arg3[%c0_177, %c0_178, %c0_179], %753 {strides = array<i32>} : memref<1x4x256xf32, #tpu.memory_space<vmem>>, vector<1x4x256xf32>,
    return
  }
  func.func @transform_0(%arg0: i32) -> i32 {
    %c0_i32 = arith.constant 0 : i32
    %c0_i32_0 = arith.constant 0 : i32
    return %c0_i32 : i32
  }
  func.func @transform_1(%arg0: i32) -> (i32, i32, i32) {
    %c0_i32 = arith.constant 0 : i32
    %c0_i32_0 = arith.constant 0 : i32
    %c0_i32_1 = arith.constant 0 : i32
    return %arg0, %c0_i32, %c0_i32_0 : i32, i32, i32
  }
  func.func @transform_2(%arg0: i32) -> (i32, i32, i32) {
    %c0_i32 = arith.constant 0 : i32
    %c0_i32_0 = arith.constant 0 : i32
    %c0_i32_1 = arith.constant 0 : i32
    return %arg0, %c0_i32, %c0_i32_0 : i32, i32, i32
  }
}

</mosaic_0001>

<bundles_post_ra>
// kernel: spatial_attention.1
= control target key start
LH: loop header
LB: loop body
LE: loop exit
PB: predicated region body
PF: predicated region fallthrough
CT: control target
= control target key end

     0   :  { %s5918_s0 = inlined_call_operand.vmem [shape: f32[98], index: 0, kind: input, shape index: {}]   ;;  %s5919_s1 = inlined_call_operand.vmem [shape: f32[2,4,256], index: 1, kind: input, shape index: {}]   ;;  %s5920_s2 = inlined_call_operand.vmem [shape: f32[2,4,256], index: 2, kind: output, shape index: {}]  }
   0x1   :  { %6041 = sst [smem:[#allocation141_spill]] %s5918_s0 }
   0x2   :  { %6042 = sst [smem:[#allocation142_spill]] %s5919_s1 }
   0x3   :  { %6043 = sst [smem:[#allocation143_spill]] %s5920_s2 }
   0x4   :  { %7 = vsyncpa [#allocation5], 0  ;;  %s3021_s9 = smov 0  }
   0x5 LB: > { %6044 = sst [smem:[#allocation7_spill]] %s2980_s9  ;;  %s3027_s10 = sadd.s32 4294967295, %s2980_s9   ;;  %s2980_s9 = sphi %s3021_s9, %s13_s9  }
   0x6   : > { %p2785_p0 = scmp.ge.s32.totalorder %s2980_s9, 1  ;;  %p91_p1 = scmp.lt.s32.totalorder %s2980_s9, 3 }
   0x7   : > { %s6045_s0 = sld [smem:[#allocation141_spill]]  ;;  %p2905_p3 = scmp.eq.s32.totalorder %s3027_s10, 0 }
   0x8   : > { %p3034_p2 = pnand %p2785_p0, %p91_p1 }
   0xa   : > { %p2901_p4 = pneg %p3034_p2 }
   0xc   : > { %p2902_p5 = pnand %p2905_p3, %p2901_p4 }
   0xd   : > { %s104_s13 = sshll.u32 %s6045_s0, 4  ;;  %s105_s13 = int_to_ptr.vmem [resolvable:$true] %s104_s13 }
   0xe   : > { %s2955_s15 = scalar_lea.vmem %s105_s13, 16  ;;  %p2957_p7 = pneg %p2902_p5 }
   0xf   : > { %p2956_p6 = scmp.ne.s32.totalorder %s105_s13, %s2955_s15  ;;  %p2963_p10 = scmp.lt.s32.totalorder %s105_s13, %s105_s13 }
  0x10   : > { %p2964_p11 = scmp.lt.s32.totalorder %s2955_s15, %s2955_s15 }
  0x11   : > { %p2958_p8 = pnand %p2957_p7, %p2956_p6 }
  0x12   : > { %p2965_p12 = por %p2964_p11, %p2963_p10 }
  0x13   : > { %p2959_p9 = pneg %p2958_p8 }
  0x15   : > { %p2966_p13 = pnand %p2965_p12, %p2959_p9 }
  0x17   : > { %2969 = shalt.err (!%p2966_p13)
}
  0x18   : > { %s2982_s16 = smov [#allocation4]   ;;  %125 = sbr.rel (%p3034_p2) target bundleno = 1013 (0x3f5), region = 28 }
  0x19   : > { %2904 = dma.vmem_to_smem (!%p2902_p5), %s105_s13, 16, %s2982_s16, [#allocation5]  }
  0x1f   : > { %2975 = dma.done.wait (%p2905_p3), [#allocation5], 16  }
  0x20   : > { %2977 = vsyncadd (%p2905_p3), [#allocation5], 4294967280 }
  0x21   : > { %131 = sfence }
  0x22   : > { %p148_p0 = scmp.lt.s32.totalorder %s3027_s10, 1  ;;  %vm193_vm0 = vcmask 179200   ;;  %v2983_v0 = vmov 0.0   ;;  %vm162_vm1 = vcmask 1043456   ;;  %s6048_s1 = sld [smem:[#allocation142_spill]]  ;;  %vm196_vm2 = vcmask 177152  }
  0x23   : > { %198 = vst.msk [vmem:[#allocation2 + $0x18] sm:$0xff] %vm193_vm0, %v2983_v0  ;;  %194 = vst.msk [vmem:[#allocation2] sm:$0xff] %vm193_vm0, %v2983_v0  ;;  %s2984_s21 = smov 115   ;;  %s2985_s22 = smov 3   ;;  %vm205_vm3 = vcmask 147480   ;;  %vm594_vm4 = vcmask 1041408  }
  0x24   : > { %195 = vst.msk [vmem:[#allocation2 + $0x8] sm:$0xff] %vm193_vm0, %v2983_v0  ;;  %199 = vst.msk [vmem:[#allocation2 + $0x20] sm:$0xff] %vm193_vm0, %v2983_v0  ;;  %s6634_s10 = smov (!%p148_p0, %s3027_s10), 1  ;;  %s2986_s23 = smov 99   ;;  %vm643_vm5 = vcmask 1045504   ;;  %vm759_vm6 = vcmask 1040384  }
  0x25   : > { %6047 = sst [smem:[#allocation8_spill]] %s6634_s10  ;;  %s5921_s17 = sshll.u32 %s6634_s10, 3  ;;  %200 = vst.msk [vmem:[#allocation2 + $0x28] sm:$0x3f] %vm196_vm2, %v2983_v0  ;;  %197 = vst.msk [vmem:[#allocation2 + $0x10] sm:$0x3f] %vm196_vm2, %v2983_v0 }
  0x26   : > { %s2987_s24 = smov 83   ;;  %s2988_s25 = smov 67   ;;  %vm453_vm7 = vcmask 1046528   ;;  %vm429_vm8 = vcmask 1042432   ;;  %vm833_vm9 = vcmask 1044480  }
  0x27   : > { %s2989_s26 = smov 51   ;;  %s2990_s27 = smov 35  }
  0x28   : > { %s3063_s20 = scalar_lea.vmem %s6048_s1, %s5921_s17  ;;  %s2991_s28 = smov 19  }
  0x29   : > { %6049 = sst [smem:[#allocation9_spill]] %s3063_s20  ;;  %v158_v1 = vld [vmem:[%s3063_s20] sm:$0xff]  ;;  %s3106_s30 = sld [smem:[#allocation4 + $0x1]] }
  0x2a   : > { %v179_v2 = vsel %vm162_vm1, %v158_v1, -inf  ;;  %v163_v3 = vsel %vm162_vm1, %v158_v1, 0.0  ;;  %v160_v14 = vcombine.high %v158_v1, %v158_v1  ;;  %s3104_s29 = sld [smem:[#allocation4 + $0x2]]  ;;  %s3112_s4 = sld [smem:[#allocation4 + $0x9]] }
  0x2b   : > { %v180_v4 = vrot.slane %v179_v2, 4  ;;  %v164_v5 = vrot.slane %v163_v3, 4  ;;  %s3108_s3 = sld [smem:[#allocation4 + $0xa]]  ;;  %s3114_s5 = sld [smem:[#allocation4 + $0x3]] }
  0x2c   : > { %v170_v18 = vsel %vm162_vm1, %v160_v14, 0.0  ;;  %v186_v20 = vsel %vm162_vm1, %v160_v14, -inf  ;;  %s3116_s6 = sld [smem:[#allocation4 + $0x11]]  ;;  %s3118_s7 = sld [smem:[#allocation4 + $0x16]] }
  0x2d   : > { %v181_v6 = vmax.f32 %v179_v2, %v180_v4  ;;  %v165_v7 = vadd.f32 %v164_v5, %v163_v3  ;;  %v171_v19 = vrot.slane %v170_v18, 4  ;;  %v187_v21 = vrot.slane %v186_v20, 4  ;;  %s3120_s8 = sld [smem:[#allocation4 + $0xf]]  ;;  %s3122_s11 = sld [smem:[#allocation4 + $0x2b]] }
  0x2e   : > { %s3124_s12 = sld [smem:[#allocation4 + $0x1d]]  ;;  %s3126_s13 = sld [smem:[#allocation4 + $0x1e]] }
  0x2f   : > { %v182_v8 = vrot.slane %v181_v6, 2  ;;  %v166_v9 = vrot.slane %v165_v7, 2  ;;  %v172_v22 = vadd.f32 %v171_v19, %v170_v18  ;;  %v188_v23 = vmax.f32 %v186_v20, %v187_v21  ;;  %6051 = sst [smem:[#allocation11_spill]] %s3106_s30  ;;  %s3130_s14 = sld [smem:[#allocation4 + $0x17]] }
  0x30   : > { %6050 = sst [smem:[#allocation10_spill]] %s3104_s29  ;;  %s3132_s15 = sld [smem:[#allocation4 + $0x25]]  ;;  %v5936_v47 = vstv %s3104_s29  ;;  %v5937_v48 = vstv %s3106_s30  ;;  %v3162_v53 = vstv %s3112_s4 }
  0x31   : > { %v183_v10 = vmax.f32 %v181_v6, %v182_v8  ;;  %v167_v11 = vadd.f32 %v166_v9, %v165_v7  ;;  %v173_v24 = vrot.slane %v172_v22, 2  ;;  %v189_v25 = vrot.slane %v188_v23, 2  ;;  %s3134_s16 = sld [smem:[#allocation4 + $0x8]]  ;;  %s3136_s18 = sld [smem:[#allocation4 + $0x24]] }
  0x32   : > { %s3138_s19 = sld [smem:[#allocation4 + $0x10]]  ;;  %v3159_v52 = vstv %s3108_s3  ;;  %s3180_s3 = sld [smem:[#allocation4 + $0x2a]]  ;;  %v5935_v62 = vstv %s3114_s5  ;;  %v3216_v63 = vstv %s3116_s6  ;;  %v3223_v0 = vstv %s3118_s7 }
  0x33   : > { %v184_v12 = vrot.slane %v183_v10, 1  ;;  %v168_v13 = vrot.slane %v167_v11, 1  ;;  %v174_v26 = vadd.f32 %v173_v24, %v172_v22  ;;  %v190_v27 = vmax.f32 %v188_v23, %v189_v25  ;;  %s3182_s4 = sld [smem:[#allocation4 + $0x20]]  ;;  %s3184_s17 = sld [smem:[#allocation4 + $0x27]] }
  0x34   : > { %s3186_s0 = sld [smem:[#allocation4 + $0x2e]]  ;;  %s3198_s1 = sld [smem:[#allocation4]]  ;;  %v3226_v1 = vstv %s3120_s8  ;;  %v3229_v2 = vstv %s3122_s11  ;;  %v3232_v3 = vstv %s3124_s12  ;;  %v3246_v7 = vstv %s3126_s13 }
  0x35   : > { %v185_v15 = vmax.f32 %v183_v10, %v184_v12  ;;  %v169_v16 = vadd.f32 %v168_v13, %v167_v11  ;;  %v175_v28 = vrot.slane %v174_v26, 1  ;;  %v191_v29 = vrot.slane %v190_v27, 1  ;;  %s3200_s9 = sld [smem:[#allocation4 + $0x1c]]  ;;  %s3203_s2 = sld [smem:[#allocation4 + $0x5]] }
  0x36   : > { %s3205_s20 = sld [smem:[#allocation4 + $0xc]]  ;;  %s5927_s10 = smov 126   ;;  %v3253_v10 = vstv %s3130_s14  ;;  %v3256_v11 = vstv %s3132_s15 }
  0x37   : > { %217 = vrot.lane.b32.xlu1 %v185_v15, %s2984_s21  ;;  %208 = vrot.lane.b32.xlu0 %v185_v15, %s2985_s22  ;;  %v177_v17 = vmul.f32 0.25, %v169_v16  ;;  %v176_v30 = vadd.f32 %v175_v28, %v174_v26  ;;  %v192_v31 = vmax.f32 %v190_v27, %v191_v29  ;;  %s2993_s29 = smov 127   ;;  %s3218_s30 = sld [smem:[#allocation4 + $0x13]]  ;;  %v3259_v12 = vstv %s3134_s16 }
  0x38   : > { %s3236_s6 = sld [smem:[#allocation4 + $0x28]]  ;;  %s3248_s7 = sld [smem:[#allocation4 + $0x2f]]  ;;  %v3262_v13 = vstv %s3136_s18  ;;  %v3277_v14 = vstv %s3138_s19  ;;  %v3317_v27 = vstv %s3180_s3 }
  0x39   : > { %v178_v32 = vmul.f32 0.25, %v176_v30  ;;  %s3250_s8 = sld [smem:[#allocation4 + $0x6]]  ;;  %s3264_s11 = sld [smem:[#allocation4 + $0xd]]  ;;  %v3320_v28 = vstv %s3182_s4  ;;  %v3323_v29 = vstv %s3184_s17 }
  0x3a   : > { %s3266_s12 = sld [smem:[#allocation4 + $0x14]]  ;;  %s2994_s13 = smov 125   ;;  %6062 = vst [vmem:[#allocation20_spill] sm:$0xff] %v3320_v28  ;;  %6063 = vst [vmem:[#allocation21_spill] sm:$0xff] %v3323_v29  ;;  %v3331_v30 = vstv %s3186_s0 }
  0x3b   : > { %225 = vrot.lane.b32.xlu1 %v185_v15, %s2986_s23  ;;  %202 = vrot.lane.b32.xlu0 %v177_v17, %s2985_s22  ;;  %s6055_s14 = smov 126   ;;  %s3282_s15 = sld [smem:[#allocation4 + $0x1b]]  ;;  %6064 = vst [vmem:[#allocation22_spill] sm:$0xff] %v3331_v30 }
  0x3c   : > { %6053 = sst [smem:[#allocation13_spill]] %s3205_s20  ;;  %s3220_s20 = sld [smem:[#allocation4 + $0x1a]] }
  0x3d   : > { %s3284_s16 = sld [smem:[#allocation4 + $0x22]]  ;;  %s3298_s18 = sld [smem:[#allocation4 + $0x29]] }
  0x3e   : > { %s3300_s19 = sld [smem:[#allocation4 + $0x30]]  ;;  %s6087_s0 = sld [smem:[#allocation11_spill]] }
  0x3f   : > { %233 = vrot.lane.b32.xlu1 %v185_v15, %s2987_s24  ;;  %221 = vrot.lane.b32.xlu0 %v177_v17, %s2986_s23  ;;  %s2823_s17 = sld [smem:[#allocation4 + $0x12]]  ;;  %s4646_s3 = sld [smem:[#allocation4 + $0x33]] }
  0x40   : > { %s2857_s4 = sld [smem:[#allocation4 + $0x3a]] }
  0x43   : > { %241 = vrot.lane.b32.xlu1 %v185_v15, %s2988_s25  ;;  %229 = vrot.lane.b32.xlu0 %v177_v17, %s2987_s24 }
  0x47   : > { %249 = vrot.lane.b32.xlu1 %v185_v15, %s2989_s26  ;;  %237 = vrot.lane.b32.xlu0 %v177_v17, %s2988_s25 }
  0x4b   : > { %213 = vrot.lane.b32.xlu1 %v177_v17, %s2984_s21  ;;  %245 = vrot.lane.b32.xlu0 %v177_v17, %s2989_s26 }
  0x4f   : > { %257 = vrot.lane.b32.xlu1 %v185_v15, %s2990_s27  ;;  %253 = vrot.lane.b32.xlu0 %v177_v17, %s2990_s27 }
  0x53   : > { %265 = vrot.lane.b32.xlu1 %v185_v15, %s2991_s28  ;;  %261 = vrot.lane.b32.xlu0 %v177_v17, %s2991_s28 }
  0x57   : > { %275 = vrot.lane.b32.xlu1 %v192_v31, %s2985_s22  ;;  %270 = vrot.lane.b32.xlu0 %v178_v32, %s2985_s22  ;;  %s3144_s22 = sld [smem:[#allocation4 + $0x18]] }
  0x5b   : > { %283 = vrot.lane.b32.xlu1 %v192_v31, %s2984_s21  ;;  %279 = vrot.lane.b32.xlu0 %v178_v32, %s2984_s21  ;;  %s3140_s21 = sld [smem:[#allocation4 + $0x2c]] }
  0x5d   : > { %v3287_v16 = vstv %s3144_s22  ;;  %s2849_s22 = sld [smem:[#allocation4 + $0x32]] }
  0x5f   : > { %291 = vrot.lane.b32.xlu1 %v192_v31, %s2986_s23  ;;  %287 = vrot.lane.b32.xlu0 %v178_v32, %s2986_s23  ;;  %s3148_s23 = sld [smem:[#allocation4 + $0x1f]] }
  0x61   : > { %v3280_v15 = vstv %s3140_s21  ;;  %s6059_s21 = sld [smem:[#allocation13_spill]] }
  0x63   : > { %299 = vrot.lane.b32.xlu1 %v192_v31, %s2987_s24  ;;  %295 = vrot.lane.b32.xlu0 %v178_v32, %s2987_s24  ;;  %s3150_s24 = sld [smem:[#allocation4 + $0x26]] }
  0x65   : > { %v3290_v17 = vstv %s3148_s23  ;;  %s2850_s23 = sld [smem:[#allocation4 + $0x39]] }
  0x66   : > { %6056 = vst [vmem:[#allocation15_spill] sm:$0xff] %v3290_v17 }
  0x67   : > { %307 = vrot.lane.b32.xlu1 %v192_v31, %s2988_s25  ;;  %303 = vrot.lane.b32.xlu0 %v178_v32, %s2988_s25  ;;  %s3152_s25 = sld [smem:[#allocation4 + $0x2d]] }
  0x69   : > { %v3293_v18 = vstv %s3150_s24  ;;  %s2851_s24 = sld [smem:[#allocation4 + $0x40]] }
  0x6a   : > { %6057 = vst [vmem:[#allocation16_spill] sm:$0xff] %v3293_v18 }
  0x6b   : > { %315 = vrot.lane.b32.xlu1 %v192_v31, %s2989_s26  ;;  %311 = vrot.lane.b32.xlu0 %v178_v32, %s2989_s26  ;;  %s3154_s26 = sld [smem:[#allocation4 + $0x7]] }
  0x6d   : > { %v3296_v19 = vstv %s3152_s25  ;;  %s2853_s25 = sld [smem:[#allocation4 + $0x4e]] }
  0x6e   : > { %6058 = vst [vmem:[#allocation17_spill] sm:$0xff] %v3296_v19 }
  0x6f   : > { %323 = vrot.lane.b32.xlu1 %v192_v31, %s2990_s27  ;;  %319 = vrot.lane.b32.xlu0 %v178_v32, %s2990_s27  ;;  %s3164_s27 = sld [smem:[#allocation4 + $0x23]] }
  0x71   : > { %v3308_v22 = vstv %s3154_s26  ;;  %s2852_s26 = sld [smem:[#allocation4 + $0x47]] }
  0x72   : > { %6060 = vst [vmem:[#allocation18_spill] sm:$0xff] %v3308_v22 }
  0x73   : > { %331 = vrot.lane.b32.xlu1 %v192_v31, %s2991_s28  ;;  %327 = vrot.lane.b32.xlu0 %v178_v32, %s2991_s28  ;;  %s3166_s28 = sld [smem:[#allocation4 + $0xe]]  ;;  %v3335_v32 = vstv %s3200_s9  ;;  %v6081_v31 = vstv %s3203_s2  ;;  %s6103_s9 = sld [smem:[#allocation10_spill]] }
  0x75   : > { %v3311_v23 = vstv %s3164_s27  ;;  %s2854_s27 = sld [smem:[#allocation4 + $0x55]] }
  0x79   : > { %v3314_v26 = vstv %s3166_s28  ;;  %s2855_s28 = sld [smem:[#allocation4 + $0x5c]] }
  0x7a   : > { %6061 = vst [vmem:[#allocation19_spill] sm:$0xff] %v3314_v26 }
  0xa9   : > { %v218_v33 = vpop.permute.xlu1 %217  ;;  %v209_v34 = vpop.permute.xlu0 %208 }
  0xaa   : > { %220 = vst.msk [vmem:[#allocation2 + $0x1c] sm:$0x1] %vm205_vm3, %v218_v33  ;;  %212 = vst.msk [vmem:[#allocation2 + $0x1b] sm:$0x1] %vm205_vm3, %v209_v34  ;;  %v3339_v34 = vstv %s6059_s21  ;;  %s2867_s21 = sld [smem:[#allocation4 + $0x50]] }
  0xab   : > { %6065 = vst [vmem:[#allocation23_spill] sm:$0xff] %v3339_v34 }
  0xad   : > { %v226_v35 = vpop.permute.xlu1 %225  ;;  %v203_v36 = vpop.permute.xlu0 %202 }
  0xae   : > { %228 = vst.msk [vmem:[#allocation2 + $0x1d] sm:$0x1] %vm205_vm3, %v226_v35  ;;  %206 = vst.msk [vmem:[#allocation2 + $0x3] sm:$0x1] %vm205_vm3, %v203_v36  ;;  %v3342_v35 = vstv %s3218_s30  ;;  %v3345_v36 = vstv %s3220_s20  ;;  %s2824_s20 = sld [smem:[#allocation4 + $0x19]]  ;;  %s2996_s30 = smov 123  }
  0xaf   : > { %6066 = vst [vmem:[#allocation24_spill] sm:$0xff] %v3342_v35  ;;  %6067 = vst [vmem:[#allocation25_spill] sm:$0xff] %v3345_v36 }
  0xb1   : > { %v234_v37 = vpop.permute.xlu1 %233  ;;  %v222_v38 = vpop.permute.xlu0 %221 }
  0xb2   : > { %236 = vst.msk [vmem:[#allocation2 + $0x1e] sm:$0x1] %vm205_vm3, %v234_v37  ;;  %224 = vst.msk [vmem:[#allocation2 + $0x5] sm:$0x1] %vm205_vm3, %v222_v38 }
  0xb5   : > { %v242_v39 = vpop.permute.xlu1 %241  ;;  %v230_v40 = vpop.permute.xlu0 %229 }
  0xb6   : > { %244 = vst.msk [vmem:[#allocation2 + $0x1f] sm:$0x1] %vm205_vm3, %v242_v39  ;;  %232 = vst.msk [vmem:[#allocation2 + $0x6] sm:$0x1] %vm205_vm3, %v230_v40 }
  0xb9   : > { %v250_v41 = vpop.permute.xlu1 %249  ;;  %v238_v42 = vpop.permute.xlu0 %237 }
  0xba   : > { %252 = vst.msk [vmem:[#allocation2 + $0x20] sm:$0x1] %vm205_vm3, %v250_v41  ;;  %240 = vst.msk [vmem:[#allocation2 + $0x7] sm:$0x1] %vm205_vm3, %v238_v42 }
  0xbd   : > { %v214_v43 = vpop.permute.xlu1 %213  ;;  %v246_v44 = vpop.permute.xlu0 %245 }
  0xbe   : > { %216 = vst.msk [vmem:[#allocation2 + $0x4] sm:$0x1] %vm205_vm3, %v214_v43  ;;  %248 = vst.msk [vmem:[#allocation2 + $0x8] sm:$0x1] %vm205_vm3, %v246_v44  ;;  %v3360_v43 = vstv %s3236_s6  ;;  %v3363_v44 = vstv %s3248_s7  ;;  %s2858_s6 = sld [smem:[#allocation4 + $0x41]]  ;;  %s2859_s7 = sld [smem:[#allocation4 + $0x48]] }
  0xbf   : > { %6069 = vst [vmem:[#allocation27_spill] sm:$0xff] %v3360_v43  ;;  %6070 = vst [vmem:[#allocation28_spill] sm:$0xff] %v3363_v44 }
  0xc1   : > { %v258_v45 = vpop.permute.xlu1 %257  ;;  %v254_v46 = vpop.permute.xlu0 %253 }
  0xc2   : > { %260 = vst.msk [vmem:[#allocation2 + $0x21] sm:$0x1] %vm205_vm3, %v258_v45  ;;  %256 = vst.msk [vmem:[#allocation2 + $0x9] sm:$0x1] %vm205_vm3, %v254_v46  ;;  %v3367_v46 = vstv %s3264_s11  ;;  %s2864_s11 = sld [smem:[#allocation4 + $0x3b]] }
  0xc3   : > { %6071 = vst [vmem:[#allocation29_spill] sm:$0xff] %v3367_v46 }
  0xc5   : > { %v3156_v49 = vld [vmem:[#allocation2] sm:$0xff]  ;;  %v266_v50 = vpop.permute.xlu1 %265  ;;  %v262_v51 = vpop.permute.xlu0 %261 }
  0xc6   : > { %6052 = vst [vmem:[#allocation12_spill] sm:$0xff] %v3156_v49  ;;  %268 = vst.msk [vmem:[#allocation2 + $0x22] sm:$0x1] %vm205_vm3, %v266_v50  ;;  %v3173_v54 = vmul.f32 %v5936_v47, %v3156_v49  ;;  %v3178_v55 = vmul.f32 %v5937_v48, %v3156_v49  ;;  %v3192_v58 = vmul.f32 %v3159_v52, %v3156_v49 }
  0xc7   : > { %264 = vst.msk [vmem:[#allocation2 + $0xa] sm:$0x1] %vm205_vm3, %v262_v51  ;;  %v3196_v59 = vmul.f32 %v3162_v53, %v3156_v49  ;;  %v3243_v6 = vmul.f32 %v5935_v62, %v3156_v49  ;;  %v3305_v21 = vmul.f32 %v3216_v63, %v3156_v49  ;;  %v3350_v38 = vmul.f32 %v3259_v12, %v3156_v49 }
  0xc8   : > { %v5931_v56 = vrot.slane %v3173_v54, 6  ;;  %v5932_v57 = vrot.slane %v3178_v55, 5  ;;  %v5933_v4 = vrot.slane %v3192_v58, 7  ;;  %v3354_v39 = vmul.f32 %v3223_v0, %v3156_v49 }
  0xc9   : > { %v276_v60 = vpop.permute.xlu1 %275  ;;  %v271_v61 = vpop.permute.xlu0 %270  ;;  %v5934_v5 = vrot.slane %v3196_v59, 6  ;;  %6054 = vst [vmem:[#allocation14_spill] sm:$0xff] %v3243_v6  ;;  %v5929_v20 = vrot.slane %v3243_v6, 7  ;;  %v5930_v37 = vrot.slane %v3305_v21, 7  ;;  %v3376_v50 = vmul.f32 %v3226_v1, %v3156_v49 }
  0xca   : > { %278 = vst.msk [vmem:[#allocation2 + $0x23] sm:$0x1] %vm205_vm3, %v276_v60  ;;  %273 = vst.msk [vmem:[#allocation2 + $0xb] sm:$0x1] %vm205_vm3, %v271_v61  ;;  %598 = vrot.lane.b32.xlu1 %v5931_v56, %s5927_s10  ;;  %433 = vrot.lane.b32.xlu0 %v5932_v57, %s2993_s29  ;;  %s3234_s10 = sld [smem:[#allocation4 + $0x21]]  ;;  %v3379_v51 = vstv %s3266_s12  ;;  %v3382_v60 = vstv %s3282_s15  ;;  %v3432_v47 = vmul.f32 %v3277_v14, %v3156_v49  ;;  %s2868_s12 = sld [smem:[#allocation4 + $0x57]] }
  0xcb   : > { %6072 = vst [vmem:[#allocation30_spill] sm:$0xff] %v3379_v51  ;;  %6073 = vst [vmem:[#allocation31_spill] sm:$0xff] %v3382_v60  ;;  %v3385_v61 = vstv %s3284_s16  ;;  %v3436_v45 = vmul.f32 %v3290_v17, %v3156_v49  ;;  %v3440_v48 = vmul.f32 %v3296_v19, %v3156_v49  ;;  %v3450_v62 = vmul.f32 %v3331_v30, %v3156_v49  ;;  %s2863_s15 = sld [smem:[#allocation4 + $0x34]]  ;;  %s2866_s16 = sld [smem:[#allocation4 + $0x49]] }
  0xcc   : > { %6074 = vst [vmem:[#allocation32_spill] sm:$0xff] %v3385_v61  ;;  %6078 = vst [vmem:[#allocation36_spill] sm:$0xff] %v3432_v47  ;;  %v3456_v47 = vmul.f32 %v3323_v29, %v3156_v49  ;;  %v3494_v6 = vmul.f32 %v3339_v34, %v3156_v49  ;;  %v3498_v33 = vmul.f32 %v3311_v23, %v3156_v49  ;;  %v6096_v34 = vstv %s3250_s8 }
  0xcd   : > { %v284_v8 = vpop.permute.xlu1 %283  ;;  %v280_v9 = vpop.permute.xlu0 %279  ;;  %6079 = vst [vmem:[#allocation37_spill] sm:$0xff] %v3450_v62 }
  0xce   : > { %286 = vst.msk [vmem:[#allocation2 + $0x24] sm:$0x1] %vm205_vm3, %v284_v8  ;;  %282 = vst.msk [vmem:[#allocation2 + $0xc] sm:$0x1] %vm205_vm3, %v280_v9  ;;  %788 = vrot.lane.b32.xlu1 %v5933_v4, %s2994_s13  ;;  %623 = vrot.lane.b32.xlu0 %v5934_v5, %s6055_s14  ;;  %v3389_v8 = vmul.f32 %v3262_v13, %v3156_v49  ;;  %v3393_v9 = vmul.f32 %v3232_v3, %v3156_v49 }
  0xcf   : > { %v3413_v4 = vmul.f32 %v3256_v11, %v3156_v49  ;;  %v3417_v5 = vmul.f32 %v3280_v15, %v3156_v49  ;;  %6080 = vst [vmem:[#allocation38_spill] sm:$0xff] %v3456_v47  ;;  %6089 = vst [vmem:[#allocation44_spill] sm:$0xff] %v3494_v6 }
  0xd0   : > { %v3357_v40 = vstv %s3234_s10  ;;  %6090 = vst [vmem:[#allocation45_spill] sm:$0xff] %v3498_v33  ;;  %s2995_s10 = smov 124  }
  0xd1   : > { %v292_v24 = vpop.permute.xlu1 %291  ;;  %v288_v25 = vpop.permute.xlu0 %287  ;;  %6068 = vst [vmem:[#allocation26_spill] sm:$0xff] %v3357_v40  ;;  %v3508_v29 = vmul.f32 %v3357_v40, %v3156_v49  ;;  %v3546_v40 = vmul.f32 %v3382_v60, %v3156_v49  ;;  %v3570_v60 = vmul.f32 %v3385_v61, %v3156_v49  ;;  %v6113_v33 = vrot.slane %v3413_v4, 2 }
  0xd2   : > { %294 = vst.msk [vmem:[#allocation2 + $0x25] sm:$0x1] %vm205_vm3, %v292_v24  ;;  %290 = vst.msk [vmem:[#allocation2 + $0xd] sm:$0x1] %vm205_vm3, %v288_v25  ;;  %763 = vrot.lane.b32.xlu0 %v5929_v20, %s2994_s13  ;;  %v3396_v24 = vstv %s3298_s18  ;;  %v3399_v25 = vstv %s3300_s19  ;;  %v3405_v20 = vmul.f32 %v3229_v2, %v3156_v49  ;;  %s2861_s18 = sld [smem:[#allocation4 + $0x56]]  ;;  %s2872_s19 = sld [smem:[#allocation4 + $0x43]] }
  0xd3   : > { %6075 = vst [vmem:[#allocation33_spill] sm:$0xff] %v3396_v24  ;;  %6076 = vst [vmem:[#allocation34_spill] sm:$0xff] %v3399_v25  ;;  %v3577_v62 = vmul.f32 %v3399_v25, %v3156_v49 }
  0xd4   : > { %6077 = vst [vmem:[#allocation35_spill] sm:$0xff] %v3405_v20  ;;  %6092 = vst [vmem:[#allocation47_spill] sm:$0xff] %v3508_v29 }
  0xd5   : > { %v300_v41 = vpop.permute.xlu1 %299  ;;  %v296_v42 = vpop.permute.xlu0 %295  ;;  %6101 = vst [vmem:[#allocation54_spill] sm:$0xff] %v3546_v40 }
  0xd6   : > { %302 = vst.msk [vmem:[#allocation2 + $0x26] sm:$0x1] %vm205_vm3, %v300_v41  ;;  %298 = vst.msk [vmem:[#allocation2 + $0xe] sm:$0x1] %vm205_vm3, %v296_v42  ;;  %813 = vrot.lane.b32.xlu0 %v5930_v37, %s2994_s13  ;;  %v3409_v37 = vmul.f32 %v3246_v7, %v3156_v49  ;;  %v3421_v42 = vmul.f32 %v3287_v16, %v3156_v49  ;;  %v3425_v41 = vmul.f32 %v3293_v18, %v3156_v49 }
  0xd7   : > { %v3478_v18 = vmul.f32 %v3335_v32, %v3156_v49 }
  0xd9   : > { %v308_v56 = vpop.permute.xlu1 %307  ;;  %v304_v57 = vpop.permute.xlu0 %303  ;;  %6085 = vst [vmem:[#allocation41_spill] sm:$0xff] %v3478_v18 }
  0xda   : > { %310 = vst.msk [vmem:[#allocation2 + $0x27] sm:$0x1] %vm205_vm3, %v308_v56  ;;  %306 = vst.msk [vmem:[#allocation2 + $0xf] sm:$0x1] %vm205_vm3, %v304_v57  ;;  %v3446_v57 = vmul.f32 %v3320_v28, %v3156_v49  ;;  %v3461_v56 = vmul.f32 %v6081_v31, %v3156_v49  ;;  %v6083_v31 = vstv %s3198_s1 }
  0xdb   : > { %v3474_v20 = vmul.f32 %v6083_v31, %v3156_v49  ;;  %v3512_v31 = vmul.f32 %v3345_v36, %v3156_v49  ;;  %v3529_v36 = vmul.f32 %v6096_v34, %v3156_v49 }
  0xdc   : > { %6082 = vst [vmem:[#allocation39_spill] sm:$0xff] %v3461_v56  ;;  %v3516_v56 = vmul.f32 %v3360_v43, %v3156_v49  ;;  %v3533_v43 = vmul.f32 %v3363_v44, %v3156_v49  ;;  %v3552_v44 = vmul.f32 %v3308_v22, %v3156_v49 }
  0xdd   : > { %v316_v19 = vpop.permute.xlu1 %315  ;;  %v312_v28 = vpop.permute.xlu0 %311  ;;  %6084 = vst [vmem:[#allocation40_spill] sm:$0xff] %v3474_v20  ;;  %6093 = vst [vmem:[#allocation48_spill] sm:$0xff] %v3512_v31  ;;  %v6095_v20 = vstv %s6087_s0  ;;  %v6107_v31 = vstv %s3114_s5  ;;  %s2997_s5 = smov 122   ;;  %s4826_s0 = sld [smem:[#allocation4 + $0x35]] }
  0xde   : > { %318 = vst.msk [vmem:[#allocation2 + $0x28] sm:$0x1] %vm205_vm3, %v316_v19  ;;  %314 = vst.msk [vmem:[#allocation2 + $0x10] sm:$0x1] %vm205_vm3, %v312_v28  ;;  %v3484_v19 = vmul.f32 %v3314_v26, %v3156_v49  ;;  %v3488_v28 = vmul.f32 %v3317_v27, %v3156_v49 }
  0xdf   : > { %6094 = vst [vmem:[#allocation49_spill] sm:$0xff] %v3516_v56  ;;  %6097 = vst [vmem:[#allocation50_spill] sm:$0xff] %v3529_v36  ;;  %v6110_v56 = vrot.slane %v3409_v37, 2 }
  0xe0   : > { %6086 = vst [vmem:[#allocation42_spill] sm:$0xff] %v3484_v19  ;;  %6088 = vst [vmem:[#allocation43_spill] sm:$0xff] %v3488_v28  ;;  %v3504_v19 = vmul.f32 %v3342_v35, %v3156_v49 }
  0xe1   : > { %v3500_v30 = vld [vmem:[#allocation2 + $0x8] sm:$0xff]  ;;  %v324_v17 = vpop.permute.xlu1 %323  ;;  %v320_v26 = vpop.permute.xlu0 %319  ;;  %6098 = vst [vmem:[#allocation51_spill] sm:$0xff] %v3533_v43  ;;  %6102 = vst [vmem:[#allocation55_spill] sm:$0xff] %v3552_v44  ;;  %v6108_v44 = vrot.slane %v3196_v59, 6 }
  0xe2   : > { %6091 = vst [vmem:[#allocation46_spill] sm:$0xff] %v3504_v19  ;;  %326 = vst.msk [vmem:[#allocation2 + $0x29] sm:$0x1] %vm205_vm3, %v324_v17  ;;  %v3523_v35 = vmul.f32 %v6095_v20, %v3500_v30  ;;  %v3542_v20 = vmul.f32 %v3379_v51, %v3156_v49  ;;  %v3566_v51 = vmul.f32 %v3396_v24, %v3156_v49 }
  0xe3   : > { %322 = vst.msk [vmem:[#allocation2 + $0x11] sm:$0x1] %vm205_vm3, %v320_v26  ;;  %v3538_v26 = vmul.f32 %v3367_v46, %v3156_v49  ;;  %v3586_v17 = vmul.f32 %v3259_v12, %v3500_v30  ;;  %v3594_v47 = vmul.f32 %v3162_v53, %v3500_v30  ;;  %v3606_v49 = vmul.f32 %v3280_v15, %v3500_v30 }
  0xe4   : > { %6100 = vst [vmem:[#allocation53_spill] sm:$0xff] %v3542_v20  ;;  %v431_v34 = vrot.slane %v3523_v35, 5  ;;  %v6104_v35 = vstv %s6103_s9  ;;  %v3610_v25 = vmul.f32 %v3159_v52, %v3500_v30  ;;  %v3614_v24 = vmul.f32 %v3223_v0, %v3500_v30  ;;  %s2865_s9 = sld [smem:[#allocation4 + $0x42]] }
  0xe5   : > { %6099 = vst [vmem:[#allocation52_spill] sm:$0xff] %v3538_v26  ;;  %v332_v46 = vpop.permute.xlu1 %331  ;;  %v328_v28 = vpop.permute.xlu0 %327  ;;  %v3582_v18 = vmul.f32 %v6104_v35, %v3500_v30  ;;  %v3602_v35 = vmul.f32 %v3256_v11, %v3500_v30  ;;  %v3618_v61 = vmul.f32 %v3232_v3, %v3500_v30  ;;  %v3622_v40 = vmul.f32 %v3262_v13, %v3500_v30 }
  0xe6   : > { %334 = vst.msk [vmem:[#allocation2 + $0x2a] sm:$0x1] %vm205_vm3, %v332_v46  ;;  %330 = vst.msk [vmem:[#allocation2 + $0x12] sm:$0x1] %vm205_vm3, %v328_v28  ;;  %437 = vrot.lane.b32.xlu0 %v431_v34, %s2993_s29  ;;  %v3590_v46 = vmul.f32 %v3226_v1, %v3500_v30  ;;  %v3598_v28 = vmul.f32 %v3246_v7, %v3500_v30  ;;  %v5999_v20 = vrot.slane %v3594_v47, 6  ;;  %v741_v43 = vrot.slane %v3606_v49, 6 }
  0xe7   : > { %6106 = vst [vmem:[#allocation57_spill] sm:$0xff] %v3602_v35  ;;  %v3632_v29 = vmul.f32 %v6107_v31, %v3500_v30  ;;  %v6112_v19 = vrot.slane %v3602_v35, 2 }
  0xe8   : > { %6105 = vst [vmem:[#allocation56_spill] sm:$0xff] %v3598_v28  ;;  %v3640_v6 = vsel %vm594_vm4, %v6108_v44, %v5999_v20  ;;  %v6109_v49 = vrot.slane %v3598_v28, 2  ;;  %v6115_v44 = vrot.slane %v3417_v5, 6  ;;  %v6117_v20 = vrot.slane %v3610_v25, 7 }
  0xe9   : > { %v3657_v59 = vsel %vm643_vm5, %v6113_v33, %v6112_v19  ;;  %v6118_v28 = vrot.slane %v3192_v58, 7  ;;  %v596_v5 = vrot.slane %v3582_v18, 6  ;;  %v6121_v58 = vrot.slane %v3586_v17, 1 }
  0xea   : > { %v3650_v31 = vsel %vm643_vm5, %v6110_v56, %v6109_v49  ;;  %6114 = vst [vmem:[#allocation59_spill] sm:$0xff] %v3657_v59  ;;  %v3662_v36 = vsel %vm594_vm4, %v6115_v44, %v741_v43  ;;  %v6120_v44 = vrot.slane %v3178_v55, 5  ;;  %v6122_v19 = vrot.slane %v3350_v38, 1 }
  0xeb   : > { %6111 = vst [vmem:[#allocation58_spill] sm:$0xff] %v3650_v31  ;;  %6116 = vst [vmem:[#allocation60_spill] sm:$0xff] %v3662_v36  ;;  %v3669_v37 = vsel %vm759_vm6, %v6118_v28, %v6117_v20  ;;  %v3686_v20 = vmul.f32 %v3229_v2, %v3500_v30  ;;  %v6133_v31 = vrot.slane %v3305_v21, 7 }
  0xec   : > { %6119 = vst [vmem:[#allocation61_spill] sm:$0xff] %v3669_v37  ;;  %v3701_v49 = vsel %vm429_vm8, %v6120_v44, %v431_v34  ;;  %v3708_v33 = vsel %vm453_vm7, %v6122_v19, %v6121_v58  ;;  %v6124_v34 = vrot.slane %v3614_v24, 1  ;;  %v6125_v19 = vrot.slane %v3354_v39, 1 }
  0xed   : > { %v3643_v26 = vld [vmem:[#allocation2 + $0x10] sm:$0x3f]  ;;  %v6126_v44 = vrot.slane %v3173_v54, 6  ;;  %v6128_v39 = vrot.slane %v3376_v50, 1  ;;  %v6129_v54 = vrot.slane %v3622_v40, 5  ;;  %v6132_v37 = vrot.slane %v3393_v9, 1 }
  0xee   : > { %v3673_v56 = vmul.f32 %v3223_v0, %v3643_v26  ;;  %v3677_v4 = vmul.f32 %v3226_v1, %v3643_v26  ;;  %v3692_v1 = vmul.f32 %v3229_v2, %v3643_v26  ;;  %v3696_v18 = vmul.f32 %v3232_v3, %v3643_v26 }
  0xef   : > { %v3720_v3 = vmul.f32 %v3246_v7, %v3643_v26  ;;  %v3728_v58 = vsel %vm453_vm7, %v6125_v19, %v6124_v34  ;;  %v3733_v28 = vsel %vm594_vm4, %v6126_v44, %v596_v5  ;;  %v3741_v7 = vmul.f32 %v3259_v12, %v3643_v26 }
  0xf0   : > { %v6001_v0 = vrot.slane %v3673_v56, 1  ;;  %v6123_v55 = vrot.slane %v3677_v4, 1  ;;  %v6127_v2 = vrot.slane %v3590_v46, 1  ;;  %v6130_v19 = vrot.slane %v3389_v8, 5 }
  0xf1   : > { %v528_v38 = vrot.slane %v3696_v18, 1  ;;  %v6131_v12 = vrot.slane %v3618_v61, 1  ;;  %v3773_v8 = vmul.f32 %v3277_v14, %v3500_v30  ;;  %v736_v18 = vmul.f32 %v3280_v15, %v3643_v26 }
  0xf2   : > { %509 = vrot.lane.b32.xlu0 %v6001_v0, %s2993_s29  ;;  %484 = vrot.lane.b32.xlu1 %v6123_v55, %s2993_s29  ;;  %v3737_v55 = vmul.f32 %v3253_v10, %v3643_v26  ;;  %v3748_v34 = vsel %vm453_vm7, %v6128_v39, %v6127_v2  ;;  %v3755_v44 = vsel %vm429_vm8, %v6130_v19, %v6129_v54  ;;  %v6002_v0 = vrot.slane %v3692_v1, 5 }
  0xf3   : > { %v3764_v50 = vsel %vm453_vm7, %v6132_v37, %v6131_v12  ;;  %v3769_v39 = vmul.f32 %v3256_v11, %v3643_v26  ;;  %v803_v54 = vmul.f32 %v3216_v63, %v3500_v30  ;;  %v804_v11 = vmul.f32 %v3216_v63, %v3643_v26 }
  0xf4   : > { %v779_v37 = vmul.f32 %v3159_v52, %v3643_v26  ;;  %v828_v15 = vmul.f32 %v3287_v16, %v3500_v30  ;;  %v457_v12 = vrot.slane %v3741_v7, 1  ;;  %v743_v2 = vrot.slane %v736_v18, 6  ;;  %v6134_v7 = vld [vmem:[#allocation15_spill] sm:$0xff] }
  0xf5   : > { %v809_v36 = vrot.slane %v803_v54, 7  ;;  %v811_v59 = vrot.slane %v804_v11, 7  ;;  %v829_v63 = vmul.f32 %v3287_v16, %v3643_v26  ;;  %v850_v18 = vmul.f32 %v6134_v7, %v3500_v30 }
  0xf6   : > { %580 = vrot.lane.b32.xlu0 %v6002_v0, %s2993_s29  ;;  %534 = vrot.lane.b32.xlu1 %v528_v38, %s2993_s29  ;;  %v546_v0 = vmul.f32 %v3262_v13, %v3643_v26  ;;  %v786_v9 = vrot.slane %v779_v37, 7  ;;  %v3797_v35 = vsel %vm594_vm4, %v741_v43, %v743_v2  ;;  %v835_v52 = vrot.slane %v828_v15, 3  ;;  %v6141_v15 = vld [vmem:[#allocation17_spill] sm:$0xff] }
  0xf7   : > { %v3802_v19 = vsel %vm759_vm6, %v6133_v31, %v809_v36  ;;  %v6135_v13 = vrot.slane %v3720_v3, 2  ;;  %v3811_v16 = vsel %vm759_vm6, %v809_v36, %v811_v59  ;;  %v6136_v43 = vrot.slane %v3610_v25, 7 }
  0xf8   : > { %v837_v21 = vrot.slane %v829_v63, 3  ;;  %v3820_v31 = vmul.f32 %v6134_v7, %v3643_v26  ;;  %v856_v54 = vrot.slane %v850_v18, 3  ;;  %v6138_v11 = vrot.slane %v3421_v42, 3 }
  0xf9   : > { %v3816_v2 = vsel %vm759_vm6, %v6136_v43, %v786_v9  ;;  %v900_v63 = vmul.f32 %v6141_v15, %v3500_v30  ;;  %v3841_v42 = vmul.f32 %v6141_v15, %v3643_v26  ;;  %v614_v7 = vmul.f32 %v3162_v53, %v3643_v26 }
  0xfa   : > { %699 = vrot.lane.b32.xlu0 %v6135_v13, %s6055_s14  ;;  %602 = vrot.lane.b32.xlu1 %v596_v5, %s6055_s14  ;;  %6137 = vst [vmem:[#allocation15_spill] sm:$0xff] %v3820_v31  ;;  %v3825_v37 = vsel %vm833_vm9, %v6138_v11, %v835_v52  ;;  %v6140_v5 = vld [vmem:[#allocation16_spill] sm:$0xff]  ;;  %v3834_v59 = vsel %vm833_vm9, %v835_v52, %v837_v21  ;;  %v6005_v9 = vrot.slane %v3820_v31, 3  ;;  %v6142_v13 = vrot.slane %v3436_v45, 3 }
  0xfb   : > { %6139 = vst [vmem:[#allocation62_spill] sm:$0xff] %v3825_v37  ;;  %v875_v36 = vmul.f32 %v6140_v5, %v3500_v30  ;;  %v3831_v25 = vmul.f32 %v6140_v5, %v3643_v26  ;;  %v6144_v21 = vrot.slane %v3632_v29, 7  ;;  %v6145_v11 = vrot.slane %v3737_v55, 2 }
  0xfc   : > { %v3848_v43 = vsel %vm833_vm9, %v6142_v13, %v856_v54  ;;  %v3859_v5 = vmul.f32 %v3253_v10, %v3500_v30  ;;  %v3864_v53 = vsel %vm833_vm9, %v856_v54, %v6005_v9  ;;  %v906_v45 = vrot.slane %v900_v63, 3  ;;  %v6147_v13 = vld [vmem:[#allocation35_spill] sm:$0xff] }
  0xfd   : > { %v881_v18 = vrot.slane %v875_v36, 3  ;;  %6143 = vst [vmem:[#allocation16_spill] sm:$0xff] %v3848_v43  ;;  %v6006_v36 = vrot.slane %v3841_v42, 3  ;;  %v6146_v15 = vrot.slane %v3686_v20, 5  ;;  %v6149_v43 = vrot.slane %v3425_v41, 3 }
  0xfe   : > { %767 = vrot.lane.b32.xlu0 %v6144_v21, %s2994_s13  ;;  %674 = vrot.lane.b32.xlu1 %v6145_v11, %s6055_s14  ;;  %v6148_v21 = vrot.slane %v6147_v13, 5  ;;  %v553_v11 = vrot.slane %v546_v0, 5  ;;  %v6150_v31 = vrot.slane %v3831_v25, 3  ;;  %v6007_v63 = vrot.slane %v3769_v39, 2 }
  0xff   : > { %v3877_v37 = vsel %vm833_vm9, %v6149_v43, %v881_v18  ;;  %v6151_v9 = vrot.slane %v3677_v4, 1  ;;  %v6152_v13 = vrot.slane %v3590_v46, 1  ;;  %v3893_v41 = vsel %vm833_vm9, %v906_v45, %v6006_v36 }
 0x100   : > { %v3872_v52 = vsel %vm429_vm8, %v6148_v21, %v6146_v15  ;;  %v3882_v54 = vsel %vm833_vm9, %v881_v18, %v6150_v31  ;;  %v6153_v0 = vrot.slane %v3440_v48, 3  ;;  %v6154_v31 = vrot.slane %v3586_v17, 1 }
 0x101   : > { %v479_v15 = vsel %vm453_vm7, %v6152_v13, %v6151_v9  ;;  %v6155_v4 = vrot.slane %v3618_v61, 1  ;;  %v621_v21 = vrot.slane %v614_v7, 6  ;;  %v3908_v9 = vmul.f32 %v3311_v23, %v3643_v26 }
 0x102   : > { %v3898_v43 = vsel %vm833_vm9, %v6153_v0, %v906_v45  ;;  %v458_v18 = vsel %vm453_vm7, %v6154_v31, %v457_v12  ;;  %724 = vrot.lane.b32.xlu1 %v6007_v63, %s6055_s14  ;;  %v6157_v48 = vrot.slane %v3673_v56, 1  ;;  %v6158_v17 = vrot.slane %v3614_v24, 1 }
 0x103   : > { %v529_v46 = vsel %vm453_vm7, %v6155_v4, %v528_v38  ;;  %6156 = vst [vmem:[#allocation17_spill] sm:$0xff] %v3908_v9  ;;  %461 = vrot.lane.b32.xlu0 %v458_v18, %s2993_s29  ;;  %v6159_v38 = vld [vmem:[#allocation20_spill] sm:$0xff]  ;;  %v6160_v13 = vrot.slane %v3622_v40, 5  ;;  %v6161_v56 = vrot.slane %v3692_v1, 5  ;;  %v6162_v24 = vrot.slane %v3686_v20, 5  ;;  %v6163_v4 = vld [vmem:[#allocation21_spill] sm:$0xff] }
 0x104   : > { %v3919_v12 = vsel %vm453_vm7, %v6158_v17, %v6157_v48  ;;  %v999_v7 = vmul.f32 %v6159_v38, %v3500_v30  ;;  %v1000_v45 = vmul.f32 %v6159_v38, %v3643_v26  ;;  %v3940_v18 = vmul.f32 %v3277_v14, %v3643_v26  ;;  %v6165_v1 = vld [vmem:[#allocation22_spill] sm:$0xff] }
 0x105   : > { %v3929_v0 = vsel %vm429_vm8, %v6160_v13, %v553_v11  ;;  %v3936_v31 = vsel %vm429_vm8, %v6162_v24, %v6161_v56  ;;  %v1020_v48 = vmul.f32 %v6163_v4, %v3500_v30  ;;  %v3946_v40 = vmul.f32 %v6163_v4, %v3643_v26 }
 0x106   : > { %v1005_v17 = vrot.slane %v999_v7, 4  ;;  %v1007_v38 = vrot.slane %v1000_v45, 4  ;;  %v1045_v11 = vmul.f32 %v6165_v1, %v3500_v30  ;;  %v6166_v20 = vrot.slane %v3594_v47, 6  ;;  %435 = vrot.lane.b32.xlu1 %v3701_v49, %s2993_s29 }
 0x107   : > { %6164 = vst [vmem:[#allocation35_spill] sm:$0xff] %v3946_v40  ;;  %v3958_v56 = vmul.f32 %v3317_v27, %v3643_v26  ;;  %v1026_v7 = vrot.slane %v1020_v48, 4  ;;  %482 = vrot.lane.b32.xlu0 %v479_v15, %s2993_s29  ;;  %v6008_v47 = vrot.slane %v3946_v40, 4  ;;  %v371_v48 = vmul.f32 %v3335_v32, %v3500_v30 }
 0x108   : > { %v3953_v13 = vsel %vm594_vm4, %v6166_v20, %v621_v21  ;;  %v3964_v45 = vsel %vm162_vm1, %v1005_v17, %v1007_v38  ;;  %v6168_v21 = vrot.slane %v3446_v57, 4  ;;  %v1051_v4 = vrot.slane %v1045_v11, 4  ;;  %v6170_v20 = vld [vmem:[#allocation38_spill] sm:$0xff] }
 0x109   : > { %6167 = vst [vmem:[#allocation20_spill] sm:$0xff] %v3958_v56  ;;  %v372_v49 = vmul.f32 %v3335_v32, %v3643_v26  ;;  %v6171_v15 = vrot.slane %v6170_v20, 4  ;;  %v3983_v36 = vmul.f32 %v6165_v1, %v3643_v26  ;;  %v3988_v57 = vsel %vm162_vm1, %v1026_v7, %v6008_v47  ;;  %v6179_v1 = vld [vmem:[#allocation41_spill] sm:$0xff] }
 0x10a   : > { %v3970_v24 = vsel %vm162_vm1, %v6168_v21, %v1005_v17  ;;  %v6173_v17 = vld [vmem:[#allocation37_spill] sm:$0xff]  ;;  %v6176_v32 = vstv %s3198_s1  ;;  %v377_v63 = vrot.slane %v371_v48, 4  ;;  %v388_v14 = vmul.f32 %v3311_v23, %v3500_v30  ;;  %459 = vrot.lane.b32.xlu1 %v3708_v33, %s2993_s29  ;;  %s2821_s1 = sld [smem:[#allocation4 + $0x4]] }
 0x10b   : > { %6169 = vst [vmem:[#allocation21_spill] sm:$0xff] %v3970_v24  ;;  %v3979_v38 = vsel %vm162_vm1, %v6171_v15, %v1026_v7  ;;  %v6174_v11 = vrot.slane %v6173_v17, 4  ;;  %v341_v20 = vmul.f32 %v6176_v32, %v3500_v30  ;;  %v347_v15 = vmul.f32 %v3308_v22, %v3500_v30  ;;  %505 = vrot.lane.b32.xlu0 %v3728_v58, %s2993_s29  ;;  %v6186_v24 = vld [vmem:[#allocation45_spill] sm:$0xff] }
 0x10c   : > { %6172 = vst [vmem:[#allocation22_spill] sm:$0xff] %v3979_v38  ;;  %v379_v61 = vrot.slane %v372_v49, 4  ;;  %v6177_v17 = vstv %s3203_s2  ;;  %v407_v48 = vmul.f32 %v3317_v27, %v3500_v30  ;;  %v6178_v49 = vld [vmem:[#allocation23_spill] sm:$0xff]  ;;  %v394_v47 = vrot.slane %v388_v14, 4  ;;  %v6183_v27 = vld [vmem:[#allocation40_spill] sm:$0xff]  ;;  %s2822_s2 = sld [smem:[#allocation4 + $0xb]] }
 0x10d   : > { %v3993_v21 = vsel %vm162_vm1, %v6174_v11, %v1051_v4  ;;  %v4011_v11 = vmul.f32 %v6177_v17, %v3500_v30  ;;  %v1091_v32 = vmul.f32 %v6178_v49, %v3500_v30  ;;  %v6180_v33 = vrot.slane %v6179_v1, 4 }
 0x10e   : > { %6175 = vst [vmem:[#allocation38_spill] sm:$0xff] %v3993_v21  ;;  %v380_v23 = vsel %vm162_vm1, %v377_v63, %v379_v61  ;;  %v6181_v58 = vrot.slane %v3983_v36, 4  ;;  %v413_v21 = vrot.slane %v407_v48, 4  ;;  %v6185_v61 = vrot.slane %v3908_v9, 4  ;;  %480 = vrot.lane.b32.xlu1 %v3748_v34, %s2993_s29  ;;  %v6190_v48 = vld [vmem:[#allocation39_spill] sm:$0xff]  ;;  %v6196_v34 = vld [vmem:[#allocation44_spill] sm:$0xff] }
 0x10f   : > { %v378_v22 = vsel %vm162_vm1, %v6180_v33, %v377_v63  ;;  %v4026_v17 = vadd.f32 %v380_v23, %v341_v20  ;;  %v6011_v40 = vrot.slane %v4011_v11, 5  ;;  %v1097_v1 = vrot.slane %v1091_v32, 1  ;;  %532 = vrot.lane.b32.xlu0 %v529_v46, %s2993_s29 }
 0x110   : > { %v4024_v7 = vsel %vm162_vm1, %v1051_v4, %v6181_v58  ;;  %v4030_v38 = vadd.f32 %v378_v22, %v6183_v27  ;;  %v397_v14 = vsel %vm162_vm1, %v394_v47, %v6185_v61  ;;  %v6187_v63 = vrot.slane %v6186_v24, 4  ;;  %v6188_v4 = vld [vmem:[#allocation24_spill] sm:$0xff]  ;;  %v6194_v61 = vld [vmem:[#allocation42_spill] sm:$0xff] }
 0x111   : > { %6182 = vst [vmem:[#allocation37_spill] sm:$0xff] %v4026_v17  ;;  %v1112_v58 = vmul.f32 %v6188_v4, %v3500_v30  ;;  %v4044_v20 = vadd.f32 %v397_v14, %v347_v15  ;;  %v6191_v32 = vrot.slane %v6190_v48, 5  ;;  %v6197_v46 = vrot.slane %v6196_v34, 1  ;;  %v6198_v15 = vld [vmem:[#allocation55_spill] sm:$0xff] }
 0x112   : > { %6184 = vst [vmem:[#allocation23_spill] sm:$0xff] %v4030_v38  ;;  %v395_v33 = vsel %vm162_vm1, %v6187_v63, %v394_v47  ;;  %v6192_v47 = vld [vmem:[#allocation43_spill] sm:$0xff]  ;;  %507 = vrot.lane.b32.xlu1 %v3919_v12, %s2993_s29 }
 0x113   : > { %6189 = vst [vmem:[#allocation41_spill] sm:$0xff] %v4044_v20  ;;  %v4051_v24 = vsel %vm429_vm8, %v6191_v32, %v6011_v40  ;;  %v6193_v23 = vrot.slane %v6192_v47, 4  ;;  %v4062_v22 = vsel %vm453_vm7, %v6197_v46, %v1097_v1  ;;  %v4065_v14 = vadd.f32 %v395_v33, %v6198_v15  ;;  %v6200_v17 = vld [vmem:[#allocation19_spill] sm:$0xff]  ;;  %555 = vrot.lane.b32.xlu0 %v3755_v44, %s2993_s29 }
 0x114   : > { %v1118_v38 = vrot.slane %v1112_v58, 1  ;;  %v355_v32 = vmul.f32 %v6200_v17, %v3500_v30  ;;  %v6201_v40 = vrot.slane %v3958_v56, 4  ;;  %v6204_v58 = vld [vmem:[#allocation25_spill] sm:$0xff]  ;;  %v6208_v20 = vld [vmem:[#allocation27_spill] sm:$0xff] }
 0x115   : > { %v414_v27 = vsel %vm162_vm1, %v6193_v23, %v413_v21  ;;  %6199 = vst [vmem:[#allocation45_spill] sm:$0xff] %v4065_v14  ;;  %v4074_v23 = vmul.f32 %v6188_v4, %v3643_v26  ;;  %v1137_v46 = vmul.f32 %v6204_v58, %v3500_v30  ;;  %v4087_v15 = vmul.f32 %v6204_v58, %v3643_v26 }
 0x116   : > { %v4057_v63 = vadd.f32 %v414_v27, %v6194_v61  ;;  %v416_v47 = vsel %vm162_vm1, %v413_v21, %v6201_v40  ;;  %v1092_v27 = vmul.f32 %v6178_v49, %v3643_v26  ;;  %v6202_v61 = vld [vmem:[#allocation46_spill] sm:$0xff]  ;;  %v1187_v56 = vmul.f32 %v6208_v20, %v3500_v30  ;;  %530 = vrot.lane.b32.xlu1 %v3764_v50, %s2993_s29 }
 0x117   : > { %v6203_v34 = vrot.slane %v6202_v61, 1  ;;  %6205 = vst [vmem:[#allocation24_spill] sm:$0xff] %v4087_v15  ;;  %v6206_v40 = vld [vmem:[#allocation26_spill] sm:$0xff]  ;;  %v4095_v49 = vadd.f32 %v416_v47, %v355_v32  ;;  %v6013_v4 = vrot.slane %v4074_v23, 1  ;;  %v1143_v58 = vrot.slane %v1137_v46, 1  ;;  %v6209_v46 = vld [vmem:[#allocation47_spill] sm:$0xff]  ;;  %576 = vrot.lane.b32.xlu0 %v3872_v52, %s2993_s29 }
 0x118   : > { %6195 = vst [vmem:[#allocation40_spill] sm:$0xff] %v4057_v63  ;;  %v1162_v21 = vmul.f32 %v6206_v40, %v3500_v30  ;;  %v1099_v61 = vrot.slane %v1092_v27, 1  ;;  %v6014_v63 = vrot.slane %v4087_v15, 1  ;;  %v1188_v47 = vmul.f32 %v6208_v20, %v3643_v26 }
 0x119   : > { %v4081_v33 = vsel %vm453_vm7, %v6203_v34, %v1118_v38  ;;  %6207 = vst [vmem:[#allocation39_spill] sm:$0xff] %v4095_v49  ;;  %v4100_v34 = vmul.f32 %v6206_v40, %v3643_v26  ;;  %v4111_v44 = vsel %vm453_vm7, %v1118_v38, %v6013_v4  ;;  %v6210_v40 = vrot.slane %v6209_v46, 1 }
 0x11a   : > { %v1168_v14 = vrot.slane %v1162_v21, 1  ;;  %v4106_v12 = vsel %vm453_vm7, %v1097_v1, %v1099_v61  ;;  %v4119_v27 = vsel %vm453_vm7, %v1143_v58, %v6014_v63  ;;  %v6211_v21 = vld [vmem:[#allocation48_spill] sm:$0xff]  ;;  %v1193_v4 = vrot.slane %v1187_v56, 5  ;;  %v6216_v56 = vld [vmem:[#allocation49_spill] sm:$0xff]  ;;  %557 = vrot.lane.b32.xlu1 %v3929_v0, %s2993_s29 }
 0x11b   : > { %v6015_v32 = vrot.slane %v4100_v34, 1  ;;  %v6212_v61 = vrot.slane %v6211_v21, 1  ;;  %v1195_v20 = vrot.slane %v1188_v47, 5  ;;  %v6217_v21 = vrot.slane %v6216_v56, 5  ;;  %v6224_v56 = vld [vmem:[#allocation31_spill] sm:$0xff]  ;;  %600 = vrot.lane.b32.xlu0 %v3733_v28, %s6055_s14 }
 0x11c   : > { %v4124_v1 = vsel %vm453_vm7, %v6210_v40, %v1168_v14  ;;  %v6214_v40 = vld [vmem:[#allocation28_spill] sm:$0xff]  ;;  %v6219_v52 = vstv %s3250_s8  ;;  %s2860_s8 = sld [smem:[#allocation4 + $0x4f]] }
 0x11d   : > { %v4129_v38 = vsel %vm453_vm7, %v6212_v61, %v1143_v58  ;;  %v4138_v46 = vsel %vm453_vm7, %v1168_v14, %v6015_v32  ;;  %v1208_v63 = vmul.f32 %v6214_v40, %v3500_v30  ;;  %v4144_v58 = vmul.f32 %v6214_v40, %v3643_v26  ;;  %v6221_v61 = vld [vmem:[#allocation29_spill] sm:$0xff]  ;;  %v6222_v32 = vld [vmem:[#allocation30_spill] sm:$0xff] }
 0x11e   : > { %6213 = vst [vmem:[#allocation43_spill] sm:$0xff] %v4138_v46  ;;  %v4149_v50 = vsel %vm429_vm8, %v6217_v21, %v1193_v4  ;;  %v4154_v47 = vmul.f32 %v6219_v52, %v3500_v30  ;;  %v1254_v14 = vmul.f32 %v6221_v61, %v3500_v30  ;;  %v1279_v49 = vmul.f32 %v6222_v32, %v3500_v30 }
 0x11f   : > { %6215 = vst [vmem:[#allocation42_spill] sm:$0xff] %v4144_v58  ;;  %6218 = vst [vmem:[#allocation44_spill] sm:$0xff] %v4149_v50  ;;  %v4161_v9 = vsel %vm429_vm8, %v1193_v4, %v1195_v20  ;;  %v1214_v40 = vrot.slane %v1208_v63, 5  ;;  %v6019_v17 = vrot.slane %v4144_v58, 5  ;;  %v1300_v21 = vmul.f32 %v6224_v56, %v3500_v30  ;;  %v6226_v4 = vld [vmem:[#allocation51_spill] sm:$0xff]  ;;  %v6233_v58 = vld [vmem:[#allocation50_spill] sm:$0xff]  ;;  %578 = vrot.lane.b32.xlu1 %v3936_v31, %s2993_s29 }
 0x120   : > { %6220 = vst [vmem:[#allocation55_spill] sm:$0xff] %v4154_v47  ;;  %6223 = vst [vmem:[#allocation46_spill] sm:$0xff] %v4161_v9  ;;  %v1260_v46 = vrot.slane %v1254_v14, 6  ;;  %v1285_v52 = vrot.slane %v1279_v49, 2  ;;  %v1255_v15 = vmul.f32 %v6221_v61, %v3643_v26  ;;  %v6227_v20 = vrot.slane %v6226_v4, 5  ;;  %v6229_v14 = vld [vmem:[#allocation52_spill] sm:$0xff]  ;;  %627 = vrot.lane.b32.xlu0 %v3953_v13, %s6055_s14 }
 0x121   : > { %v4176_v63 = vsel %vm429_vm8, %v1214_v40, %v6019_v17  ;;  %v1306_v49 = vrot.slane %v1300_v21, 2  ;;  %v4185_v61 = vmul.f32 %v6224_v56, %v3643_v26  ;;  %v6230_v0 = vrot.slane %v6229_v14, 6  ;;  %v6235_v4 = vld [vmem:[#allocation53_spill] sm:$0xff]  ;;  %v6237_v56 = vld [vmem:[#allocation54_spill] sm:$0xff] }
 0x122   : > { %6225 = vst [vmem:[#allocation25_spill] sm:$0xff] %v4176_v63  ;;  %v4181_v50 = vsel %vm429_vm8, %v6227_v20, %v1214_v40  ;;  %v6232_v28 = vrot.slane %v4154_v47, 6  ;;  %v6234_v17 = vrot.slane %v6233_v58, 6  ;;  %v6236_v40 = vrot.slane %v6235_v4, 2  ;;  %v6240_v47 = vld [vmem:[#allocation32_spill] sm:$0xff] }
 0x123   : > { %6228 = vst [vmem:[#allocation26_spill] sm:$0xff] %v4181_v50  ;;  %v4190_v9 = vsel %vm594_vm4, %v6230_v0, %v1260_v46  ;;  %v1262_v20 = vrot.slane %v1255_v15, 6  ;;  %v6238_v50 = vrot.slane %v6237_v56, 2  ;;  %v6021_v0 = vrot.slane %v4185_v61, 2  ;;  %v6242_v15 = vld [vmem:[#allocation33_spill] sm:$0xff]  ;;  %625 = vrot.lane.b32.xlu1 %v3640_v6, %s6055_s14 }
 0x124   : > { %6231 = vst [vmem:[#allocation27_spill] sm:$0xff] %v4190_v9  ;;  %v4197_v63 = vsel %vm594_vm4, %v6234_v17, %v6232_v28  ;;  %v4202_v21 = vsel %vm643_vm5, %v6236_v40, %v1285_v52  ;;  %v1280_v9 = vmul.f32 %v6222_v32, %v3643_v26  ;;  %v1325_v17 = vmul.f32 %v6240_v47, %v3500_v30 }
 0x125   : > { %v4207_v14 = vsel %vm643_vm5, %v6238_v50, %v1306_v49  ;;  %v4215_v28 = vsel %vm594_vm4, %v1260_v46, %v1262_v20  ;;  %v4219_v4 = vmul.f32 %v6240_v47, %v3643_v26  ;;  %v1350_v40 = vmul.f32 %v6242_v15, %v3500_v30  ;;  %v6244_v20 = vld [vmem:[#allocation34_spill] sm:$0xff] }
 0x126   : > { %6239 = vst [vmem:[#allocation47_spill] sm:$0xff] %v4207_v14  ;;  %6241 = vst [vmem:[#allocation48_spill] sm:$0xff] %v4215_v28  ;;  %v4225_v50 = vmul.f32 %v6242_v15, %v3643_v26  ;;  %v1287_v32 = vrot.slane %v1280_v9, 2  ;;  %v1331_v46 = vrot.slane %v1325_v17, 2  ;;  %v4234_v47 = vsel %vm643_vm5, %v1306_v49, %v6021_v0 }
 0x127   : > { %6243 = vst [vmem:[#allocation28_spill] sm:$0xff] %v4234_v47  ;;  %v1375_v56 = vmul.f32 %v6244_v20, %v3500_v30  ;;  %v6022_v28 = vrot.slane %v4219_v4, 2  ;;  %v1356_v15 = vrot.slane %v1350_v40, 2  ;;  %v1376_v31 = vmul.f32 %v6244_v20, %v3643_v26 }
 0x128   : > { %v6245_v13 = vrot.slane %v3940_v18, 2  ;;  %v6246_v9 = vrot.slane %v3773_v8, 2  ;;  %v4248_v49 = vsel %vm643_vm5, %v1285_v52, %v1287_v32  ;;  %v6247_v0 = vrot.slane %v3570_v60, 2 }
 0x129   : > { %v1381_v40 = vrot.slane %v1375_v56, 6  ;;  %v4258_v14 = vsel %vm643_vm5, %v1331_v46, %v6022_v28  ;;  %v6248_v18 = vrot.slane %v3566_v51, 2  ;;  %v6249_v52 = vrot.slane %v4225_v50, 2  ;;  %v6251_v51 = vld [vmem:[#allocation36_spill] sm:$0xff] }
 0x12a   : > { %v648_v17 = vsel %vm643_vm5, %v6246_v9, %v6245_v13  ;;  %v4253_v47 = vsel %vm643_vm5, %v6247_v0, %v1331_v46  ;;  %v1383_v13 = vrot.slane %v1376_v31, 6  ;;  %v6250_v60 = vrot.slane %v3577_v62, 6  ;;  %v6252_v31 = vld [vmem:[#allocation12_spill] sm:$0xff] }
 0x12b   : > { %v4263_v20 = vsel %vm643_vm5, %v6248_v18, %v1356_v15  ;;  %v4268_v32 = vsel %vm643_vm5, %v1356_v15, %v6249_v52  ;;  %651 = vrot.lane.b32.xlu0 %v648_v17, %s6055_s14  ;;  %v644_v46 = vrot.slane %v6251_v51, 2  ;;  %v666_v56 = vrot.slane %v3859_v5, 2  ;;  %v6260_v51 = vld [vmem:[#allocation57_spill] sm:$0xff] }
 0x12c   : > { %v4276_v0 = vsel %vm594_vm4, %v6250_v60, %v1381_v40  ;;  %v659_v9 = vmul.f32 %v3253_v10, %v6252_v31  ;;  %v4283_v15 = vsel %vm594_vm4, %v1381_v40, %v1383_v13  ;;  %v6253_v18 = vrot.slane %v3773_v8, 2  ;;  %v6255_v10 = vld [vmem:[#allocation58_spill] sm:$0xff]  ;;  %v6257_v40 = vld [vmem:[#allocation56_spill] sm:$0xff] }
 0x12d   : > { %v6254_v17 = vrot.slane %v3737_v55, 2  ;;  %v6256_v8 = vrot.slane %v3720_v3, 2  ;;  %v6258_v13 = vrot.slane %v6257_v40, 2  ;;  %v6259_v60 = vrot.slane %v3769_v39, 2  ;;  %v6264_v3 = vld [vmem:[#allocation61_spill] sm:$0xff] }
 0x12e   : > { %v646_v6 = vsel %vm643_vm5, %v644_v46, %v6253_v18  ;;  %v665_v52 = vrot.slane %v659_v9, 2  ;;  %v6261_v46 = vrot.slane %v6260_v51, 2  ;;  %v6263_v9 = vld [vmem:[#allocation60_spill] sm:$0xff]  ;;  %v6265_v39 = vrot.slane %v3632_v29, 7  ;;  %v6268_v29 = vld [vmem:[#allocation62_spill] sm:$0xff] }
 0x12f   : > { %v669_v62 = vsel %vm643_vm5, %v666_v56, %v6254_v17  ;;  %649 = vrot.lane.b32.xlu1 %v646_v6, %s6055_s14  ;;  %v694_v55 = vsel %vm643_vm5, %v6258_v13, %v6256_v8  ;;  %v6266_v6 = vld [vmem:[#allocation14_spill] sm:$0xff]  ;;  %v957_v40 = vstv %s2823_s17  ;;  %s4862_s17 = sld [smem:[#allocation4 + $0x38]] }
 0x130   : > { %672 = vrot.lane.b32.xlu0 %v669_v62, %s6055_s14  ;;  %v667_v5 = vsel %vm643_vm5, %v665_v52, %v666_v56  ;;  %v719_v18 = vsel %vm643_vm5, %v6261_v46, %v6259_v60  ;;  %v6262_v56 = vld [vmem:[#allocation59_spill] sm:$0xff]  ;;  %v6267_v17 = vrot.slane %v6266_v6, 7 }
 0x131   : > { %v4379_v46 = vld [vmem:[#allocation2] sm:$0xff] }
 0x132   : > { %v762_v62 = vsel %vm759_vm6, %v6267_v17, %v6265_v39 }
 0x133   : > { %670 = vrot.lane.b32.xlu1 %v667_v5, %s6055_s14  ;;  %v937_v5 = vstv %s2822_s2  ;;  %s4860_s2 = sld [smem:[#allocation4 + $0x31]] }
 0x134   : > { %695 = vrot.lane.b32.xlu0 %v6255_v10, %s6055_s14 }
 0x137   : > { %697 = vrot.lane.b32.xlu1 %v694_v55, %s6055_s14  ;;  %v959_v55 = vmul.f32 %v957_v40, %v3500_v30 }
 0x138   : > { %722 = vrot.lane.b32.xlu0 %v719_v18, %s6055_s14 }
 0x13b   : > { %720 = vrot.lane.b32.xlu1 %v6262_v56, %s6055_s14 }
 0x13c   : > { %745 = vrot.lane.b32.xlu0 %v6263_v9, %s6055_s14  ;;  %v4362_v8 = vpop.permute.xlu1 %598 }
 0x13d   : > { %6274 = vst [vmem:[#allocation29_spill] sm:$0xff] %v4362_v8 }
 0x13f   : > { %747 = vrot.lane.b32.xlu1 %v3797_v35, %s6055_s14  ;;  %v4337_v35 = vpop.permute.xlu0 %433 }
 0x140   : > { %790 = vrot.lane.b32.xlu0 %v6264_v3, %s2994_s13  ;;  %v4374_v60 = vpop.permute.xlu1 %788  ;;  %v958_v3 = vmul.f32 %v4379_v46, %v957_v40 }
 0x141   : > { %6276 = vst [vmem:[#allocation30_spill] sm:$0xff] %v4374_v60  ;;  %v1598_v60 = vstv %s2853_s25  ;;  %s4887_s25 = sld [smem:[#allocation4 + $0x3c]] }
 0x143   : > { %765 = vrot.lane.b32.xlu1 %v762_v62, %s2994_s13  ;;  %v4349_v52 = vpop.permute.xlu0 %623  ;;  %v960_v62 = vmul.f32 %v957_v40, %v3643_v26 }
 0x144   : > { %817 = vrot.lane.b32.xlu0 %v3811_v16, %s2994_s13  ;;  %v6269_v16 = vld [vmem:[#allocation16_spill] sm:$0xff] }
 0x147   : > { %792 = vrot.lane.b32.xlu1 %v3816_v2, %s2994_s13  ;;  %v6270_v2 = vrot.slane %v3831_v25, 3  ;;  %v938_v25 = vmul.f32 %v937_v5, %v6252_v31  ;;  %v4356_v10 = vpop.permute.xlu0 %763 }
 0x148   : > { %841 = vrot.lane.b32.xlu0 %v3834_v59, %s2994_s13  ;;  %v6271_v59 = vld [vmem:[#allocation15_spill] sm:$0xff]  ;;  %6273 = vst [vmem:[#allocation49_spill] sm:$0xff] %v4356_v10  ;;  %v1761_v10 = vstv %s2860_s8  ;;  %s5137_s8 = sld [smem:[#allocation4 + $0x37]] }
 0x14b   : > { %815 = vrot.lane.b32.xlu1 %v3802_v19, %s2994_s13  ;;  %v923_v19 = vstv %s2821_s1  ;;  %s2876_s1 = sld [smem:[#allocation4 + $0x5f]] }
 0x14c   : > { %862 = vrot.lane.b32.xlu0 %v3864_v53, %s2994_s13  ;;  %v6272_v53 = vrot.slane %v6271_v59, 3  ;;  %v925_v13 = vmul.f32 %v923_v19, %v3500_v30 }
 0x14f   : > { %839 = vrot.lane.b32.xlu1 %v6268_v29, %s2994_s13 }
 0x150   : > { %885 = vrot.lane.b32.xlu0 %v3877_v37, %s2994_s13  ;;  %v924_v37 = vmul.f32 %v923_v19, %v6252_v31  ;;  %v4368_v31 = vpop.permute.xlu0 %813 }
 0x153   : > { %860 = vrot.lane.b32.xlu1 %v6269_v16, %s2994_s13 }
 0x154   : > { %889 = vrot.lane.b32.xlu0 %v6270_v2, %s2994_s13 }
 0x157   : > { %864 = vrot.lane.b32.xlu1 %v6272_v53, %s2994_s13 }
 0x158   : > { %912 = vrot.lane.b32.xlu0 %v3893_v41, %s2994_s13  ;;  %v940_v41 = vmul.f32 %v937_v5, %v3643_v26  ;;  %v4376_v51 = vpop.permute.xlu0 %437 }
 0x15b   : > { %887 = vrot.lane.b32.xlu1 %v3882_v54, %s2994_s13  ;;  %v6275_v54 = vrot.slane %v3841_v42, 3  ;;  %v939_v42 = vmul.f32 %v937_v5, %v3500_v30 }
 0x15c   : > { %928 = vrot.lane.b32.xlu0 %v924_v37, %s2995_s10 }
 0x15f   : > { %910 = vrot.lane.b32.xlu1 %v3898_v43, %s2994_s13  ;;  %v977_v43 = vstv %s2824_s20  ;;  %s4867_s20 = sld [smem:[#allocation4 + $0x3f]] }
 0x160   : > { %944 = vrot.lane.b32.xlu0 %v938_v25, %s2995_s10  ;;  %v978_v18 = vmul.f32 %v4379_v46, %v977_v43  ;;  %v980_v39 = vmul.f32 %v977_v43, %v3643_v26  ;;  %v979_v2 = vmul.f32 %v977_v43, %v3500_v30  ;;  %v6284_v26 = vld [vmem:[#allocation21_spill] sm:$0xff]  ;;  %v6288_v30 = vld [vmem:[#allocation22_spill] sm:$0xff]  ;;  %v6294_v43 = vrot.slane %v6190_v48, 5 }
 0x163   : > { %914 = vrot.lane.b32.xlu1 %v6275_v54, %s2994_s13 }
 0x164   : > { %948 = vrot.lane.b32.xlu0 %v940_v41, %s2995_s10  ;;  %v4384_v56 = vpop.permute.xlu1 %484  ;;  %v4386_v9 = vpop.permute.xlu0 %509  ;;  %v6290_v41 = vld [vmem:[#allocation35_spill] sm:$0xff] }
 0x165   : > { %6277 = vst [vmem:[#allocation31_spill] sm:$0xff] %v4384_v56  ;;  %6278 = vst [vmem:[#allocation51_spill] sm:$0xff] %v4386_v9  ;;  %v6291_v54 = vrot.slane %v6290_v41, 4  ;;  %v6313_v41 = vrot.slane %v6233_v58, 6  ;;  %v6321_v58 = vld [vmem:[#allocation27_spill] sm:$0xff] }
 0x167   : > { %930 = vrot.lane.b32.xlu1 %v925_v13, %s2995_s10 }
 0x168   : > { %966 = vrot.lane.b32.xlu0 %v959_v55, %s2995_s10  ;;  %v4392_v6 = vpop.permute.xlu1 %534  ;;  %v4394_v17 = vpop.permute.xlu0 %580 }
 0x169   : > { %6279 = vst [vmem:[#allocation50_spill] sm:$0xff] %v4394_v17  ;;  %v4951_v17 = vstv %s4887_s25 }
 0x16b   : > { %946 = vrot.lane.b32.xlu1 %v939_v42, %s2995_s10 }
 0x16c   : > { %984 = vrot.lane.b32.xlu0 %v978_v18, %s2995_s10  ;;  %v4400_v29 = vpop.permute.xlu1 %602  ;;  %v4402_v16 = vpop.permute.xlu0 %699 }
 0x16d   : > { %6280 = vst [vmem:[#allocation53_spill] sm:$0xff] %v4400_v29  ;;  %6281 = vst [vmem:[#allocation54_spill] sm:$0xff] %v4402_v16 }
 0x16f   : > { %964 = vrot.lane.b32.xlu1 %v958_v3, %s2995_s10 }
 0x170   : > { %988 = vrot.lane.b32.xlu0 %v980_v39, %s2995_s10  ;;  %v4408_v19 = vpop.permute.xlu1 %674  ;;  %v4410_v59 = vpop.permute.xlu0 %767 }
 0x171   : > { %6282 = vst [vmem:[#allocation32_spill] sm:$0xff] %v4408_v19  ;;  %6283 = vst [vmem:[#allocation33_spill] sm:$0xff] %v4410_v59 }
 0x173   : > { %968 = vrot.lane.b32.xlu1 %v960_v62, %s2995_s10 }
 0x174   : > { %1011 = vrot.lane.b32.xlu0 %v3964_v45, %s2995_s10  ;;  %v6285_v45 = vld [vmem:[#allocation38_spill] sm:$0xff]  ;;  %v4416_v53 = vpop.permute.xlu1 %724 }
 0x175   : > { %6286 = vst [vmem:[#allocation34_spill] sm:$0xff] %v4416_v53  ;;  %v4418_v37 = vpop.permute.xlu0 %461 }
 0x176   : > { %6287 = vst [vmem:[#allocation36_spill] sm:$0xff] %v4418_v37 }
 0x177   : > { %986 = vrot.lane.b32.xlu1 %v979_v2, %s2995_s10 }
 0x178   : > { %1032 = vrot.lane.b32.xlu0 %v3988_v57, %s2995_s10  ;;  %v6289_v57 = vrot.slane %v3983_v36, 4  ;;  %v4425_v5 = vpop.permute.xlu1 %435 }
 0x179   : > { %v4427_v25 = vpop.permute.xlu0 %482 }
 0x17b   : > { %1009 = vrot.lane.b32.xlu1 %v6284_v26, %s2995_s10 }
 0x17c   : > { %1055 = vrot.lane.b32.xlu0 %v6285_v45, %s2995_s10  ;;  %v4434_v40 = vpop.permute.xlu1 %459 }
 0x17d   : > { %6292 = vst [vmem:[#allocation12_spill] sm:$0xff] %v4434_v40  ;;  %v4436_v13 = vpop.permute.xlu0 %505 }
 0x17e   : > { %6293 = vst [vmem:[#allocation58_spill] sm:$0xff] %v4436_v13 }
 0x17f   : > { %1030 = vrot.lane.b32.xlu1 %v6288_v30, %s2995_s10 }
 0x180   : > { %1059 = vrot.lane.b32.xlu0 %v6289_v57, %s2995_s10  ;;  %v4442_v36 = vpop.permute.xlu1 %480  ;;  %v6312_v57 = vld [vmem:[#allocation44_spill] sm:$0xff] }
 0x181   : > { %v4444_v55 = vpop.permute.xlu0 %532 }
 0x183   : > { %1034 = vrot.lane.b32.xlu1 %v6291_v54, %s2995_s10 }
 0x184   : > { %1078 = vrot.lane.b32.xlu0 %v4051_v24, %s2996_s30  ;;  %v4451_v24 = vpop.permute.xlu1 %507 }
 0x185   : > { %6295 = vst [vmem:[#allocation56_spill] sm:$0xff] %v4451_v24  ;;  %v4453_v42 = vpop.permute.xlu0 %555 }
 0x186   : > { %6296 = vst [vmem:[#allocation57_spill] sm:$0xff] %v4453_v42 }
 0x187   : > { %1057 = vrot.lane.b32.xlu1 %v4024_v7, %s2995_s10  ;;  %v6297_v7 = vrot.slane %v4011_v11, 5 }
 0x188   : > { %1101 = vrot.lane.b32.xlu0 %v4062_v22, %s2996_s30  ;;  %v6298_v22 = vrot.slane %v4074_v23, 1  ;;  %v4461_v18 = vpop.permute.xlu1 %530 }
 0x189   : > { %v4463_v3 = vpop.permute.xlu0 %576 }
 0x18a   : > { %6299 = vst [vmem:[#allocation59_spill] sm:$0xff] %v4463_v3 }
 0x18b   : > { %1076 = vrot.lane.b32.xlu1 %v6294_v43, %s2996_s30 }
 0x18c   : > { %1122 = vrot.lane.b32.xlu0 %v4081_v33, %s2996_s30  ;;  %v4469_v48 = vpop.permute.xlu1 %557 }
 0x18d   : > { %6300 = vst [vmem:[#allocation60_spill] sm:$0xff] %v4469_v48  ;;  %v4471_v33 = vpop.permute.xlu0 %600 }
 0x18e   : > { %6301 = vst [vmem:[#allocation61_spill] sm:$0xff] %v4471_v33 }
 0x18f   : > { %1080 = vrot.lane.b32.xlu1 %v6297_v7, %s2996_s30  ;;  %v6315_v7 = vld [vmem:[#allocation26_spill] sm:$0xff] }
 0x190   : > { %1126 = vrot.lane.b32.xlu0 %v6298_v22, %s2996_s30  ;;  %v6316_v22 = vld [vmem:[#allocation55_spill] sm:$0xff] }
 0x191   : > { %v4477_v11 = vpop.permute.xlu1 %578 }
 0x192   : > { %v4479_v23 = vpop.permute.xlu0 %627 }
 0x193   : > { %1103 = vrot.lane.b32.xlu1 %v4106_v12, %s2996_s30  ;;  %v6302_v12 = vrot.slane %v4100_v34, 1  ;;  %v6309_v34 = vld [vmem:[#allocation25_spill] sm:$0xff] }
 0x194   : > { %1149 = vrot.lane.b32.xlu0 %v4119_v27, %s2996_s30 }
 0x195   : > { %v4486_v27 = vpop.permute.xlu1 %625 }
 0x197   : > { %1124 = vrot.lane.b32.xlu1 %v4111_v44, %s2996_s30  ;;  %v6304_v44 = vld [vmem:[#allocation24_spill] sm:$0xff] }
 0x198   : > { %1172 = vrot.lane.b32.xlu0 %v4124_v1, %s2996_s30  ;;  %v6305_v62 = vrot.slane %v6304_v44, 1  ;;  %v6306_v1 = vld [vmem:[#allocation46_spill] sm:$0xff] }
 0x19b   : > { %1147 = vrot.lane.b32.xlu1 %v4129_v38, %s2996_s30  ;;  %v6308_v38 = vld [vmem:[#allocation43_spill] sm:$0xff] }
 0x19c   : > { %1176 = vrot.lane.b32.xlu0 %v6302_v12, %s2996_s30  ;;  %v6317_v12 = vrot.slane %v6316_v22, 6  ;;  %v6326_v22 = vld [vmem:[#allocation52_spill] sm:$0xff] }
 0x19d   : > { %v4488_v39 = vpop.permute.xlu0 %651 }
 0x19e   : > { %6303 = vst [vmem:[#allocation14_spill] sm:$0xff] %v4488_v39 }
 0x19f   : > { %1151 = vrot.lane.b32.xlu1 %v6305_v62, %s2996_s30 }
 0x1a0   : > { %1199 = vrot.lane.b32.xlu0 %v6306_v1, %s2996_s30  ;;  %v6319_v1 = vld [vmem:[#allocation42_spill] sm:$0xff] }
 0x1a1   : > { %v4495_v2 = vpop.permute.xlu1 %649 }
 0x1a2   : > { %6307 = vst [vmem:[#allocation62_spill] sm:$0xff] %v4495_v2  ;;  %v4497_v26 = vpop.permute.xlu0 %672  ;;  %v1538_v2 = vstv %s2850_s23  ;;  %s4881_s23 = sld [smem:[#allocation4 + $0x4d]] }
 0x1a3   : > { %1174 = vrot.lane.b32.xlu1 %v6308_v38, %s2996_s30  ;;  %v6320_v38 = vrot.slane %v6319_v1, 5  ;;  %v6328_v1 = vld [vmem:[#allocation47_spill] sm:$0xff] }
 0x1a4   : > { %1220 = vrot.lane.b32.xlu0 %v6309_v34, %s2996_s30 }
 0x1a5   : > { %v4503_v45 = vpop.permute.xlu1 %670 }
 0x1a6   : > { %6310 = vst [vmem:[#allocation16_spill] sm:$0xff] %v4503_v45  ;;  %v4505_v30 = vpop.permute.xlu0 %695  ;;  %v6407_v45 = vld [vmem:[#allocation18_spill] sm:$0xff] }
 0x1a7   : > { %6311 = vst [vmem:[#allocation15_spill] sm:$0xff] %v4505_v30  ;;  %1197 = vrot.lane.b32.xlu1 %v6312_v57, %s2996_s30 }
 0x1a8   : > { %1239 = vrot.lane.b32.xlu0 %v6313_v41, %s2997_s5 }
 0x1a9   : > { %v4512_v54 = vpop.permute.xlu1 %697 }
 0x1aa   : > { %6314 = vst [vmem:[#allocation21_spill] sm:$0xff] %v4512_v54  ;;  %v4514_v43 = vpop.permute.xlu0 %722 }
 0x1ab   : > { %1218 = vrot.lane.b32.xlu1 %v6315_v7, %s2996_s30 }
 0x1ac   : > { %1243 = vrot.lane.b32.xlu0 %v6317_v12, %s2997_s5  ;;  %v6327_v12 = vrot.slane %v6326_v22, 6 }
 0x1ad   : > { %v4521_v44 = vpop.permute.xlu1 %720 }
 0x1ae   : > { %v4523_v62 = vpop.permute.xlu0 %745 }
 0x1af   : > { %6318 = vst [vmem:[#allocation38_spill] sm:$0xff] %v4523_v62  ;;  %1222 = vrot.lane.b32.xlu1 %v6320_v38, %s2996_s30 }
 0x1b0   : > { %1266 = vrot.lane.b32.xlu0 %v6321_v58, %s2997_s5 }
 0x1b1   : > { %v4530_v34 = vpop.permute.xlu1 %747 }
 0x1b2   : > { %6322 = vst [vmem:[#allocation22_spill] sm:$0xff] %v4530_v34  ;;  %v4532_v57 = vpop.permute.xlu0 %790 }
 0x1b3   : > { %6323 = vst [vmem:[#allocation35_spill] sm:$0xff] %v4532_v57  ;;  %1241 = vrot.lane.b32.xlu1 %v4197_v63, %s2997_s5  ;;  %v6331_v63 = vld [vmem:[#allocation48_spill] sm:$0xff] }
 0x1b4   : > { %1289 = vrot.lane.b32.xlu0 %v4202_v21, %s2997_s5  ;;  %v6332_v21 = vrot.slane %v4185_v61, 2 }
 0x1b5   : > { %v4538_v41 = vpop.permute.xlu1 %765 }
 0x1b6   : > { %6324 = vst [vmem:[#allocation24_spill] sm:$0xff] %v4538_v41  ;;  %v4540_v7 = vpop.permute.xlu0 %817 }
 0x1b7   : > { %6325 = vst [vmem:[#allocation46_spill] sm:$0xff] %v4540_v7  ;;  %1264 = vrot.lane.b32.xlu1 %v6327_v12, %s2997_s5 }
 0x1b8   : > { %1310 = vrot.lane.b32.xlu0 %v6328_v1, %s2997_s5  ;;  %v6336_v1 = vld [vmem:[#allocation28_spill] sm:$0xff] }
 0x1b9   : > { %v4547_v38 = vpop.permute.xlu1 %792 }
 0x1ba   : > { %6329 = vst [vmem:[#allocation43_spill] sm:$0xff] %v4547_v38  ;;  %v4549_v58 = vpop.permute.xlu0 %841 }
 0x1bb   : > { %6330 = vst [vmem:[#allocation25_spill] sm:$0xff] %v4549_v58  ;;  %1268 = vrot.lane.b32.xlu1 %v6331_v63, %s2997_s5  ;;  %v1558_v58 = vstv %s2851_s24  ;;  %s4885_s24 = sld [smem:[#allocation4 + $0x54]] }
 0x1bc   : > { %1314 = vrot.lane.b32.xlu0 %v6332_v21, %s2997_s5 }
 0x1bd   : > { %v4556_v28 = vpop.permute.xlu1 %815 }
 0x1be   : > { %v4558_v62 = vpop.permute.xlu0 %862 }
 0x1bf   : > { %6333 = vst [vmem:[#allocation44_spill] sm:$0xff] %v4558_v62  ;;  %1291 = vrot.lane.b32.xlu1 %v4248_v49, %s2997_s5  ;;  %v6413_v62 = vld [vmem:[#allocation17_spill] sm:$0xff] }
 0x1c0   : > { %1337 = vrot.lane.b32.xlu0 %v4258_v14, %s2997_s5  ;;  %v6339_v14 = vrot.slane %v4225_v50, 2 }
 0x1c1   : > { %v4564_v22 = vpop.permute.xlu1 %839 }
 0x1c2   : > { %6334 = vst [vmem:[#allocation26_spill] sm:$0xff] %v4564_v22  ;;  %v4566_v12 = vpop.permute.xlu0 %885 }
 0x1c3   : > { %6335 = vst [vmem:[#allocation55_spill] sm:$0xff] %v4566_v12  ;;  %1312 = vrot.lane.b32.xlu1 %v6336_v1, %s2997_s5  ;;  %v4585_v1 = vld [vmem:[#allocation2 + $0x20] sm:$0xff]  ;;  %v4618_v12 = vld [vmem:[#allocation2 + $0x28] sm:$0x3f] }
 0x1c4   : > { %1360 = vrot.lane.b32.xlu0 %v4263_v20, %s2997_s5  ;;  %v6341_v20 = vrot.slane %v4219_v4, 2  ;;  %v1561_v42 = vmul.f32 %v1558_v58, %v4618_v12 }
 0x1c5   : > { %v4572_v61 = vpop.permute.xlu1 %860 }
 0x1c6   : > { %6337 = vst [vmem:[#allocation42_spill] sm:$0xff] %v4572_v61  ;;  %v4574_v63 = vpop.permute.xlu0 %889 }
 0x1c7   : > { %6338 = vst [vmem:[#allocation27_spill] sm:$0xff] %v4574_v63  ;;  %1335 = vrot.lane.b32.xlu1 %v4253_v47, %s2997_s5  ;;  %v1524_v47 = vstv %s2849_s22  ;;  %s4873_s22 = sld [smem:[#allocation4 + $0x15]] }
 0x1c8   : > { %1364 = vrot.lane.b32.xlu0 %v6339_v14, %s2997_s5  ;;  %v1526_v14 = vmul.f32 %v1524_v47, %v4585_v1 }
 0x1c9   : > { %v4581_v49 = vpop.permute.xlu1 %864 }
 0x1ca   : > { %6340 = vst [vmem:[#allocation52_spill] sm:$0xff] %v4581_v49  ;;  %v4583_v21 = vpop.permute.xlu0 %912 }
 0x1cb   : > { %1339 = vrot.lane.b32.xlu1 %v6341_v20, %s2997_s5  ;;  %v1540_v20 = vmul.f32 %v1538_v2, %v4585_v1 }
 0x1cc   : > { %1387 = vrot.lane.b32.xlu0 %v4283_v15, %s2997_s5  ;;  %v4605_v15 = vld [vmem:[#allocation2 + $0x18] sm:$0xff] }
 0x1cd   : > { %v4592_v22 = vpop.permute.xlu1 %887  ;;  %v1559_v38 = vmul.f32 %v1558_v58, %v4605_v15 }
 0x1ce   : > { %6342 = vst [vmem:[#allocation47_spill] sm:$0xff] %v4592_v22  ;;  %v4594_v50 = vpop.permute.xlu0 %928 }
 0x1cf   : > { %6343 = vst [vmem:[#allocation48_spill] sm:$0xff] %v4594_v50  ;;  %1362 = vrot.lane.b32.xlu1 %v4268_v32, %s2997_s5  ;;  %v1525_v50 = vmul.f32 %v1524_v47, %v4605_v15  ;;  %v1600_v47 = vmul.f32 %v1598_v60, %v4585_v1 }
 0x1d0   : > { %1531 = vrot.lane.b32.xlu0 %v1526_v14, %s2993_s29 }
 0x1d1   : > { %v4600_v63 = vpop.permute.xlu1 %910 }
 0x1d2   : > { %6344 = vst [vmem:[#allocation28_spill] sm:$0xff] %v4600_v63  ;;  %v4602_v4 = vpop.permute.xlu0 %944 }
 0x1d3   : > { %6345 = vst [vmem:[#allocation63_spill] sm:$0xff] %v4602_v4  ;;  %1385 = vrot.lane.b32.xlu1 %v4276_v0, %s2997_s5  ;;  %v1669_v4 = vstv %s4646_s3  ;;  %s4961_s3 = sld [smem:[#allocation4 + $0x4b]] }
 0x1d4   : > { %1547 = vrot.lane.b32.xlu0 %v1540_v20, %s2993_s29  ;;  %v1539_v20 = vmul.f32 %v1538_v2, %v4605_v15  ;;  %v1670_v59 = vmul.f32 %v1669_v4, %v4605_v15 }
 0x1d5   : > { %v4610_v32 = vpop.permute.xlu1 %914 }
 0x1d6   : > { %6346 = vst [vmem:[#allocation64_spill] sm:$0xff] %v4610_v32  ;;  %v4612_v14 = vpop.permute.xlu0 %948 }
 0x1d7   : > { %6347 = vst [vmem:[#allocation65_spill] sm:$0xff] %v4612_v14  ;;  %1529 = vrot.lane.b32.xlu1 %v1525_v50, %s2993_s29  ;;  %v1578_v50 = vstv %s2852_s26  ;;  %v1606_v14 = vrot.slane %v1600_v47, 4  ;;  %s4893_s26 = sld [smem:[#allocation4 + $0x5b]] }
 0x1d8   : > { %1565 = vrot.lane.b32.xlu0 %v1559_v38, %s2993_s29  ;;  %v1599_v38 = vmul.f32 %v1598_v60, %v4605_v15  ;;  %v1580_v48 = vmul.f32 %v1578_v50, %v4585_v1 }
 0x1d9   : > { %v4620_v34 = vpop.permute.xlu1 %930 }
 0x1da   : > { %6348 = vst [vmem:[#allocation66_spill] sm:$0xff] %v4620_v34  ;;  %v4622_v0 = vpop.permute.xlu0 %966  ;;  %v1541_v34 = vmul.f32 %v1538_v2, %v4618_v12  ;;  %v1560_v2 = vmul.f32 %v1558_v58, %v4585_v1  ;;  %v1644_v58 = vstv %s2855_s28  ;;  %s4959_s28 = sld [smem:[#allocation4 + $0x5e]] }
 0x1db   : > { %6349 = vst [vmem:[#allocation67_spill] sm:$0xff] %v4622_v0  ;;  %1545 = vrot.lane.b32.xlu1 %v1539_v20, %s2993_s29  ;;  %v1619_v0 = vstv %s2854_s27  ;;  %v1647_v57 = vmul.f32 %v1644_v58, %v4618_v12  ;;  %s4895_s27 = sld [smem:[#allocation4 + $0x51]] }
 0x1dc   : > { %1569 = vrot.lane.b32.xlu0 %v1561_v42, %s2993_s29  ;;  %v1621_v30 = vmul.f32 %v1619_v0, %v4585_v1  ;;  %v1605_v42 = vrot.slane %v1599_v38, 4  ;;  %v1620_v20 = vmul.f32 %v1619_v0, %v4605_v15  ;;  %v1579_v38 = vmul.f32 %v1578_v50, %v4605_v15 }
 0x1dd   : > { %v4630_v39 = vpop.permute.xlu1 %946 }
 0x1de   : > { %6350 = vst [vmem:[#allocation68_spill] sm:$0xff] %v4630_v39  ;;  %v4632_v40 = vpop.permute.xlu0 %984  ;;  %v1607_v49 = vsel %vm162_vm1, %v1605_v42, %v1606_v14  ;;  %v1627_v8 = vrot.slane %v1621_v30, 4  ;;  %v1601_v30 = vmul.f32 %v1598_v60, %v4618_v12 }
 0x1df   : > { %6351 = vst [vmem:[#allocation69_spill] sm:$0xff] %v4632_v40  ;;  %1549 = vrot.lane.b32.xlu1 %v1541_v34, %s2993_s29  ;;  %v1626_v34 = vrot.slane %v1620_v20, 4 }
 0x1e0   : > { %1587 = vrot.lane.b32.xlu0 %v1580_v48, %s2993_s29 }
 0x1e1   : > { %v4640_v37 = vpop.permute.xlu1 %964  ;;  %v1628_v42 = vsel %vm162_vm1, %v1626_v34, %v1627_v8  ;;  %v1654_v34 = vrot.slane %v1647_v57, 4  ;;  %v1645_v57 = vmul.f32 %v1644_v58, %v4605_v15 }
 0x1e2   : > { %6352 = vst [vmem:[#allocation70_spill] sm:$0xff] %v4640_v37  ;;  %v4642_v22 = vpop.permute.xlu0 %988  ;;  %v1622_v37 = vmul.f32 %v1619_v0, %v4618_v12 }
 0x1e3   : > { %6353 = vst [vmem:[#allocation71_spill] sm:$0xff] %v4642_v22  ;;  %1567 = vrot.lane.b32.xlu1 %v1560_v2, %s2993_s29 }
 0x1e4   : > { %1610 = vrot.lane.b32.xlu0 %v1607_v49, %s2993_s29  ;;  %v1646_v49 = vmul.f32 %v1644_v58, %v4585_v1  ;;  %v1629_v0 = vrot.slane %v1622_v37, 4 }
 0x1e5   : > { %v4650_v48 = vpop.permute.xlu1 %968 }
 0x1e6   : > { %6354 = vst [vmem:[#allocation72_spill] sm:$0xff] %v4650_v48  ;;  %v4652_v47 = vpop.permute.xlu0 %1011  ;;  %v1608_v48 = vrot.slane %v1601_v30, 4  ;;  %v1652_v60 = vrot.slane %v1646_v49, 4  ;;  %v1674_v30 = vrot.slane %v1670_v59, 5  ;;  %v1671_v49 = vmul.f32 %v1669_v4, %v4585_v1 }
 0x1e7   : > { %6355 = vst [vmem:[#allocation73_spill] sm:$0xff] %v4652_v47  ;;  %1585 = vrot.lane.b32.xlu1 %v1579_v38, %s2993_s29  ;;  %v1581_v47 = vmul.f32 %v1578_v50, %v4618_v12 }
 0x1e8   : > { %1631 = vrot.lane.b32.xlu0 %v1628_v42, %s2993_s29  ;;  %v1609_v16 = vsel %vm162_vm1, %v1606_v14, %v1608_v48  ;;  %v1655_v37 = vsel %vm162_vm1, %v1652_v60, %v1654_v34  ;;  %v1675_v59 = vrot.slane %v1671_v49, 5 }
 0x1e9   : > { %v4662_v20 = vpop.permute.xlu1 %986 }
 0x1ea   : > { %v4664_v2 = vpop.permute.xlu0 %1032 }
 0x1eb   : > { %6356 = vst [vmem:[#allocation74_spill] sm:$0xff] %v4664_v2  ;;  %1589 = vrot.lane.b32.xlu1 %v1581_v47, %s2993_s29 }
 0x1ec   : > { %1635 = vrot.lane.b32.xlu0 %v1629_v0, %s2993_s29 }
 0x1ed   : > { %v4670_v38 = vpop.permute.xlu1 %1009 }
 0x1ee   : > { %6357 = vst [vmem:[#allocation75_spill] sm:$0xff] %v4670_v38  ;;  %v4672_v42 = vpop.permute.xlu0 %1055  ;;  %v1690_v38 = vstv %s2857_s4  ;;  %s5066_s4 = sld [smem:[#allocation4 + $0x58]] }
 0x1ef   : > { %6358 = vst [vmem:[#allocation76_spill] sm:$0xff] %v4672_v42  ;;  %1612 = vrot.lane.b32.xlu1 %v1609_v16, %s2993_s29  ;;  %v1630_v42 = vsel %vm162_vm1, %v1627_v8, %v1629_v0  ;;  %v1693_v14 = vmul.f32 %v1690_v38, %v4618_v12  ;;  %v1651_v16 = vrot.slane %v1645_v57, 4  ;;  %v1692_v48 = vmul.f32 %v1690_v38, %v4585_v1 }
 0x1f0   : > { %1658 = vrot.lane.b32.xlu0 %v1655_v37, %s2993_s29 }
 0x1f1   : > { %v4680_v50 = vpop.permute.xlu1 %1030  ;;  %v1653_v4 = vsel %vm162_vm1, %v1651_v16, %v1652_v60  ;;  %v1698_v0 = vrot.slane %v1692_v48, 1  ;;  %v1691_v16 = vmul.f32 %v1690_v38, %v4605_v15 }
 0x1f2   : > { %6359 = vst [vmem:[#allocation77_spill] sm:$0xff] %v4680_v50  ;;  %v4682_v47 = vpop.permute.xlu0 %1059  ;;  %v1700_v50 = vrot.slane %v1693_v14, 1 }
 0x1f3   : > { %6360 = vst [vmem:[#allocation78_spill] sm:$0xff] %v4682_v47  ;;  %1633 = vrot.lane.b32.xlu1 %v1630_v42, %s2993_s29  ;;  %v1711_v47 = vstv %s2858_s6  ;;  %s5097_s6 = sld [smem:[#allocation4 + $0x3d]] }
 0x1f4   : > { %1677 = vrot.lane.b32.xlu0 %v1674_v30, %s6055_s14  ;;  %v1714_v8 = vmul.f32 %v1711_v47, %v4618_v12  ;;  %v1713_v42 = vmul.f32 %v1711_v47, %v4585_v1  ;;  %v1701_v49 = vsel %vm453_vm7, %v1698_v0, %v1700_v50  ;;  %v1712_v38 = vmul.f32 %v1711_v47, %v4605_v15 }
 0x1f5   : > { %v4690_v58 = vpop.permute.xlu1 %1034  ;;  %v1763_v47 = vmul.f32 %v1761_v10, %v4585_v1 }
 0x1f6   : > { %6361 = vst [vmem:[#allocation79_spill] sm:$0xff] %v4690_v58  ;;  %v4692_v37 = vpop.permute.xlu0 %1078  ;;  %v1736_v58 = vstv %s2859_s7  ;;  %v1721_v54 = vrot.slane %v1714_v8, 1  ;;  %v1719_v14 = vrot.slane %v1713_v42, 1  ;;  %s5129_s7 = sld [smem:[#allocation4 + $0x4a]] }
 0x1f7   : > { %1656 = vrot.lane.b32.xlu1 %v1653_v4, %s2993_s29  ;;  %v1738_v60 = vmul.f32 %v1736_v58, %v4585_v1  ;;  %v1737_v48 = vmul.f32 %v1736_v58, %v4605_v15 }
 0x1f8   : > { %1681 = vrot.lane.b32.xlu0 %v1675_v59, %s6055_s14  ;;  %v1722_v50 = vsel %vm453_vm7, %v1719_v14, %v1721_v54 }
 0x1f9   : > { %v4699_v57 = vpop.permute.xlu1 %1057  ;;  %v1744_v8 = vrot.slane %v1738_v60, 1  ;;  %v1743_v42 = vrot.slane %v1737_v48, 1  ;;  %v1764_v60 = vmul.f32 %v1761_v10, %v4618_v12 }
 0x1fa   : > { %6362 = vst [vmem:[#allocation80_spill] sm:$0xff] %v4699_v57  ;;  %v4701_v61 = vpop.permute.xlu0 %1101 }
 0x1fb   : > { %6363 = vst [vmem:[#allocation81_spill] sm:$0xff] %v4701_v61  ;;  %1660 = vrot.lane.b32.xlu1 %v1654_v34, %s2993_s29  ;;  %v1676_v61 = vsel %vm429_vm8, %v1674_v30, %v1675_v59  ;;  %v1697_v34 = vrot.slane %v1691_v16, 1  ;;  %v1745_v59 = vsel %vm453_vm7, %v1743_v42, %v1744_v8  ;;  %s2862_s29 = sld [smem:[#allocation4 + $0x5d]]  ;;  %v1769_v42 = vrot.slane %v1763_v47, 1 }
 0x1fc   : > { %1704 = vrot.lane.b32.xlu0 %v1701_v49, %s6055_s14 }
 0x1fd   : > { %v4709_v4 = vpop.permute.xlu1 %1076  ;;  %v1699_v30 = vsel %vm453_vm7, %v1697_v34, %v1698_v0  ;;  %v1771_v0 = vrot.slane %v1764_v60, 1  ;;  %v1853_v34 = vstv %s2864_s11  ;;  %s5156_s11 = sld [smem:[#allocation4 + $0x59]] }
 0x1fe   : > { %6364 = vst [vmem:[#allocation82_spill] sm:$0xff] %v4709_v4  ;;  %v4711_v57 = vpop.permute.xlu0 %1122  ;;  %v1855_v60 = vmul.f32 %v1853_v34, %v4585_v1  ;;  %v4972_v4 = vmul.f32 %v4951_v17, %v4585_v1 }
 0x1ff   : > { %6365 = vst [vmem:[#allocation83_spill] sm:$0xff] %v4711_v57  ;;  %1679 = vrot.lane.b32.xlu1 %v1676_v61, %s6055_s14  ;;  %v1739_v57 = vmul.f32 %v1736_v58, %v4618_v12  ;;  %v1718_v61 = vrot.slane %v1712_v38, 1 }
 0x200   : > { %1725 = vrot.lane.b32.xlu0 %v1722_v50, %s6055_s14 }
 0x201   : > { %v4718_v49 = vpop.permute.xlu1 %1080  ;;  %v1746_v50 = vrot.slane %v1739_v57, 1  ;;  %v1720_v58 = vsel %vm453_vm7, %v1718_v61, %v1719_v14  ;;  %v1856_v57 = vmul.f32 %v1853_v34, %v4618_v12  ;;  %v1762_v14 = vmul.f32 %v1761_v10, %v4605_v15 }
 0x202   : > { %6366 = vst [vmem:[#allocation84_spill] sm:$0xff] %v4718_v49  ;;  %v4720_v13 = vpop.permute.xlu0 %1126 }
 0x203   : > { %6367 = vst [vmem:[#allocation85_spill] sm:$0xff] %v4720_v13  ;;  %1702 = vrot.lane.b32.xlu1 %v1699_v30, %s6055_s14  ;;  %v1747_v13 = vsel %vm453_vm7, %v1744_v8, %v1746_v50 }
 0x204   : > { %1748 = vrot.lane.b32.xlu0 %v1745_v59, %s6055_s14  ;;  %v1854_v59 = vmul.f32 %v1853_v34, %v4605_v15 }
 0x205   : > { %v4729_v16 = vpop.permute.xlu1 %1103 }
 0x206   : > { %6368 = vst [vmem:[#allocation86_spill] sm:$0xff] %v4729_v16  ;;  %v4731_v48 = vpop.permute.xlu0 %1149  ;;  %v1772_v16 = vsel %vm453_vm7, %v1769_v42, %v1771_v0 }
 0x207   : > { %6369 = vst [vmem:[#allocation87_spill] sm:$0xff] %v4731_v48  ;;  %1723 = vrot.lane.b32.xlu1 %v1720_v58, %s6055_s14  ;;  %v1860_v58 = vrot.slane %v1854_v59, 6  ;;  %v1807_v48 = vstv %s2862_s29  ;;  %s5192_s29 = sld [smem:[#allocation4 + $0x44]] }
 0x208   : > { %1752 = vrot.lane.b32.xlu0 %v1746_v50, %s6055_s14  ;;  %v1810_v49 = vmul.f32 %v1807_v48, %v4618_v12  ;;  %v1809_v10 = vmul.f32 %v1807_v48, %v4585_v1 }
 0x209   : > { %v4736_v30 = vpop.permute.xlu1 %1124 }
 0x20a   : > { %6370 = vst [vmem:[#allocation88_spill] sm:$0xff] %v4736_v30  ;;  %v4738_v38 = vpop.permute.xlu0 %1172  ;;  %v1863_v30 = vrot.slane %v1856_v57, 6  ;;  %v1817_v50 = vrot.slane %v1810_v49, 5 }
 0x20b   : > { %6371 = vst [vmem:[#allocation89_spill] sm:$0xff] %v4738_v38  ;;  %1727 = vrot.lane.b32.xlu1 %v1721_v54, %s6055_s14  ;;  %v1768_v54 = vrot.slane %v1762_v14, 1 }
 0x20c   : > { %1775 = vrot.lane.b32.xlu0 %v1772_v16, %s6055_s14  ;;  %v1861_v16 = vrot.slane %v1855_v60, 6 }
 0x20d   : > { %v4747_v61 = vpop.permute.xlu1 %1147  ;;  %v1770_v59 = vsel %vm453_vm7, %v1768_v54, %v1769_v42 }
 0x20e   : > { %6372 = vst [vmem:[#allocation90_spill] sm:$0xff] %v4747_v61  ;;  %v4749_v47 = vpop.permute.xlu0 %1176  ;;  %v1864_v8 = vsel %vm594_vm4, %v1861_v16, %v1863_v30  ;;  %v1808_v30 = vmul.f32 %v1807_v48, %v4605_v15 }
 0x20f   : > { %6373 = vst [vmem:[#allocation91_spill] sm:$0xff] %v4749_v47  ;;  %1750 = vrot.lane.b32.xlu1 %v1747_v13, %s6055_s14  ;;  %v1949_v47 = vstv %s2868_s12  ;;  %v1815_v13 = vrot.slane %v1809_v10, 5  ;;  %s5213_s12 = sld [smem:[#allocation4 + $0x36]] }
 0x210   : > { %1865 = vrot.lane.b32.xlu0 %v1860_v58, %s2994_s13  ;;  %v1951_v57 = vmul.f32 %v1949_v47, %v4585_v1  ;;  %v1950_v14 = vmul.f32 %v1949_v47, %v4605_v15 }
 0x211   : > { %v4756_v34 = vpop.permute.xlu1 %1151 }
 0x212   : > { %6374 = vst [vmem:[#allocation92_spill] sm:$0xff] %v4756_v34  ;;  %v4758_v61 = vpop.permute.xlu0 %1199  ;;  %v1957_v42 = vrot.slane %v1951_v57, 2  ;;  %v1956_v49 = vrot.slane %v1950_v14, 2 }
 0x213   : > { %6375 = vst [vmem:[#allocation93_spill] sm:$0xff] %v4758_v61  ;;  %1773 = vrot.lane.b32.xlu1 %v1770_v59, %s6055_s14  ;;  %v1818_v61 = vsel %vm429_vm8, %v1815_v13, %v1817_v50  ;;  %v1952_v59 = vmul.f32 %v1949_v47, %v4618_v12  ;;  %v1899_v47 = vstv %s2866_s16  ;;  %s5246_s16 = sld [smem:[#allocation4 + $0x60]] }
 0x214   : > { %1869 = vrot.lane.b32.xlu0 %v1864_v8, %s2994_s13  ;;  %v1832_v8 = vstv %s2863_s15  ;;  %v1958_v33 = vsel %vm643_vm5, %v1956_v49, %v1957_v42  ;;  %v1901_v49 = vmul.f32 %v1899_v47, %v4585_v1  ;;  %s5230_s15 = sld [smem:[#allocation4 + $0x53]] }
 0x215   : > { %v4766_v60 = vpop.permute.xlu1 %1174  ;;  %v1834_v57 = vmul.f32 %v1832_v8, %v4585_v1  ;;  %v1833_v48 = vmul.f32 %v1832_v8, %v4605_v15 }
 0x216   : > { %v4768_v34 = vpop.permute.xlu0 %1220 }
 0x217   : > { %6376 = vst [vmem:[#allocation94_spill] sm:$0xff] %v4768_v34  ;;  %1777 = vrot.lane.b32.xlu1 %v1771_v0, %s6055_s14  ;;  %v1862_v34 = vsel %vm594_vm4, %v1860_v58, %v1861_v16  ;;  %v1814_v0 = vrot.slane %v1808_v30, 5  ;;  %v1838_v16 = vrot.slane %v1834_v57, 6 }
 0x218   : > { %1821 = vrot.lane.b32.xlu0 %v1818_v61, %s6055_s14 }
 0x219   : > { %v4774_v54 = vpop.permute.xlu1 %1197  ;;  %v1816_v58 = vsel %vm429_vm8, %v1814_v0, %v1815_v13 }
 0x21a   : > { %6377 = vst [vmem:[#allocation95_spill] sm:$0xff] %v4774_v54  ;;  %v4776_v10 = vpop.permute.xlu0 %1239  ;;  %v1959_v54 = vrot.slane %v1952_v59, 2 }
 0x21b   : > { %6378 = vst [vmem:[#allocation96_spill] sm:$0xff] %v4776_v10  ;;  %1867 = vrot.lane.b32.xlu1 %v1862_v34, %s2994_s13  ;;  %v1900_v34 = vmul.f32 %v1899_v47, %v4605_v15 }
 0x21c   : > { %1961 = vrot.lane.b32.xlu0 %v1958_v33, %s2994_s13  ;;  %v1837_v33 = vrot.slane %v1833_v48, 6  ;;  %v1902_v48 = vmul.f32 %v1899_v47, %v4618_v12  ;;  %v1960_v10 = vsel %vm643_vm5, %v1957_v42, %v1959_v54  ;;  %v2041_v47 = vstv %s2872_s19  ;;  %s5613_s19 = sld [smem:[#allocation4 + $0x61]] }
 0x21d   : > { %v4785_v61 = vpop.permute.xlu1 %1218  ;;  %v1906_v13 = vrot.slane %v1900_v34, 2 }
 0x21e   : > { %6379 = vst [vmem:[#allocation97_spill] sm:$0xff] %v4785_v61  ;;  %v4787_v14 = vpop.permute.xlu0 %1243  ;;  %v1839_v59 = vsel %vm594_vm4, %v1837_v33, %v1838_v16 }
 0x21f   : > { %6380 = vst [vmem:[#allocation98_spill] sm:$0xff] %v4787_v14  ;;  %1819 = vrot.lane.b32.xlu1 %v1816_v58, %s6055_s14  ;;  %v1907_v14 = vrot.slane %v1901_v49, 2  ;;  %v1786_v58 = vstv %s2861_s18  ;;  %s5564_s18 = sld [smem:[#allocation4 + $0x4c]] }
 0x220   : > { %1965 = vrot.lane.b32.xlu0 %v1959_v54, %s2994_s13  ;;  %v1789_v61 = vmul.f32 %v1786_v58, %v4618_v12  ;;  %v2042_v54 = vmul.f32 %v2041_v47, %v4605_v15 }
 0x221   : > { %v4794_v30 = vpop.permute.xlu1 %1222 }
 0x222   : > { %6381 = vst [vmem:[#allocation99_spill] sm:$0xff] %v4794_v30  ;;  %v4796_v8 = vpop.permute.xlu0 %1266  ;;  %v1908_v30 = vsel %vm643_vm5, %v1906_v13, %v1907_v14  ;;  %v1924_v13 = vstv %s2867_s21  ;;  %s5651_s21 = sld [smem:[#allocation4 + $0x3e]] }
 0x223   : > { %6382 = vst [vmem:[#allocation100_spill] sm:$0xff] %v4796_v8  ;;  %1823 = vrot.lane.b32.xlu1 %v1817_v50, %s6055_s14  ;;  %v1788_v50 = vmul.f32 %v1786_v58, %v4585_v1 }
 0x224   : > { %1842 = vrot.lane.b32.xlu0 %v1839_v59, %s2994_s13  ;;  %v1909_v59 = vrot.slane %v1902_v48, 2 }
 0x225   : > { %v4801_v57 = vpop.permute.xlu1 %1241  ;;  %v1794_v42 = vrot.slane %v1788_v50, 5  ;;  %v1787_v50 = vmul.f32 %v1786_v58, %v4605_v15 }
 0x226   : > { %6383 = vst [vmem:[#allocation101_spill] sm:$0xff] %v4801_v57  ;;  %v4803_v0 = vpop.permute.xlu0 %1289  ;;  %v4817_v57 = vmul.f32 %v2041_v47, %v4585_v1 }
 0x227   : > { %6384 = vst [vmem:[#allocation102_spill] sm:$0xff] %v4803_v0  ;;  %1963 = vrot.lane.b32.xlu1 %v1960_v10, %s2994_s13  ;;  %v1796_v0 = vrot.slane %v1789_v61, 5 }
 0x228   : > { %1911 = vrot.lane.b32.xlu0 %v1908_v30, %s2994_s13  ;;  %v2049_v61 = vrot.slane %v4817_v57, 7  ;;  %v1910_v57 = vsel %vm643_vm5, %v1907_v14, %v1909_v59 }
 0x229   : > { %v4812_v49 = vpop.permute.xlu1 %1264  ;;  %v1797_v48 = vsel %vm429_vm8, %v1794_v42, %v1796_v0 }
 0x22a   : > { %6385 = vst [vmem:[#allocation103_spill] sm:$0xff] %v4812_v49  ;;  %v4814_v34 = vpop.permute.xlu0 %1310 }
 0x22b   : > { %6386 = vst [vmem:[#allocation104_spill] sm:$0xff] %v4814_v34  ;;  %1840 = vrot.lane.b32.xlu1 %v1837_v33, %s2994_s13  ;;  %v4831_v34 = vmul.f32 %v1924_v13, %v4585_v1  ;;  %v2048_v33 = vrot.slane %v2042_v54, 7 }
 0x22c   : > { %1915 = vrot.lane.b32.xlu0 %v1909_v59, %s2994_s13 }
 0x22d   : > { %v4822_v10 = vpop.permute.xlu1 %1268  ;;  %v2050_v0 = vsel %vm759_vm6, %v2048_v33, %v2049_v61  ;;  %v1932_v19 = vrot.slane %v4831_v34, 2  ;;  %v2044_v34 = vmul.f32 %v2041_v47, %v4618_v12 }
 0x22e   : > { %6387 = vst [vmem:[#allocation105_spill] sm:$0xff] %v4822_v10  ;;  %v4824_v30 = vpop.permute.xlu0 %1314 }
 0x22f   : > { %6388 = vst [vmem:[#allocation106_spill] sm:$0xff] %v4824_v30  ;;  %1844 = vrot.lane.b32.xlu1 %v1838_v16, %s2994_s13  ;;  %v1925_v30 = vmul.f32 %v1924_v13, %v4605_v15  ;;  %v1793_v16 = vrot.slane %v1787_v50, 5  ;;  %v1878_v50 = vstv %s2865_s9  ;;  %s3001_s9 = smov 48  }
 0x230   : > { %1800 = vrot.lane.b32.xlu0 %v1797_v48, %s6055_s14 }
 0x231   : > { %v4837_v10 = vpop.permute.xlu1 %1291  ;;  %v1931_v54 = vrot.slane %v1925_v30, 2  ;;  %v1795_v14 = vsel %vm429_vm8, %v1793_v16, %v1794_v42 }
 0x232   : > { %6389 = vst [vmem:[#allocation107_spill] sm:$0xff] %v4837_v10  ;;  %v4839_v49 = vpop.permute.xlu0 %1337  ;;  %v1927_v10 = vmul.f32 %v1924_v13, %v4618_v12 }
 0x233   : > { %6390 = vst [vmem:[#allocation108_spill] sm:$0xff] %v4839_v49  ;;  %1913 = vrot.lane.b32.xlu1 %v1910_v57, %s2994_s13  ;;  %v1995_v49 = vstv %s4826_s0  ;;  %v1933_v59 = vsel %vm643_vm5, %v1931_v54, %v1932_v19  ;;  %v4877_v54 = vmul.f32 %v1878_v50, %v4585_v1  ;;  %s5666_s0 = sld [smem:[#allocation4 + $0x5a]] }
 0x234   : > { %2055 = vrot.lane.b32.xlu0 %v2050_v0, %s2995_s10  ;;  %v4856_v57 = vmul.f32 %v1995_v49, %v4585_v1  ;;  %v4865_v30 = vmul.f32 %v1995_v49, %v4605_v15  ;;  %v1934_v47 = vrot.slane %v1927_v10, 2  ;;  %v2051_v0 = vrot.slane %v2044_v34, 7 }
 0x235   : > { %v4846_v58 = vpop.permute.xlu1 %1312  ;;  %v1879_v10 = vmul.f32 %v1878_v50, %v4605_v15  ;;  %v6399_v38 = vrot.slane %v4877_v54, 2 }
 0x236   : > { %6391 = vst [vmem:[#allocation109_spill] sm:$0xff] %v4846_v58  ;;  %v4848_v48 = vpop.permute.xlu0 %1360  ;;  %v6023_v16 = vrot.slane %v4856_v57, 7  ;;  %v2000_v49 = vrot.slane %v4865_v30, 7  ;;  %v2052_v34 = vsel %vm759_vm6, %v2049_v61, %v2051_v0  ;;  %v1431_v0 = vstv %s4867_s20  ;;  %s3005_s20 = smov 112  }
 0x237   : > { %6392 = vst [vmem:[#allocation110_spill] sm:$0xff] %v4848_v48  ;;  %1798 = vrot.lane.b32.xlu1 %v1795_v14, %s6055_s14  ;;  %s2845_s14 = sld [smem:[#allocation4 + $0x46]]  ;;  %v1885_v58 = vrot.slane %v1879_v10, 2  ;;  %v361_v10 = vstv %s4873_s22  ;;  %v1433_v3 = vmul.f32 %v1431_v0, %v4585_v1  ;;  %s6628_s22 = sld [smem:[#allocation8_spill]] }
 0x238   : > { %1936 = vrot.lane.b32.xlu0 %v1933_v59, %s2994_s13  ;;  %v2002_v30 = vsel %vm759_vm6, %v2000_v49, %v6023_v16  ;;  %v4975_v39 = vmul.f32 %v4379_v46, %v361_v10 }
 0x239   : > { %v4869_v42 = vpop.permute.xlu1 %1335 }
 0x23a   : > { %6393 = vst [vmem:[#allocation111_spill] sm:$0xff] %v4869_v42  ;;  %v4871_v13 = vpop.permute.xlu0 %1364  ;;  %v1935_v42 = vsel %vm643_vm5, %v1932_v19, %v1934_v47  ;;  %v4935_v19 = vmul.f32 %v1431_v0, %v4605_v15 }
 0x23b   : > { %6394 = vst [vmem:[#allocation112_spill] sm:$0xff] %v4871_v13  ;;  %2053 = vrot.lane.b32.xlu1 %v2048_v33, %s2995_s10  ;;  %v2137_v33 = vstv %s2876_s1  ;;  %s3002_s1 = smov 64  }
 0x23c   : > { %1940 = vrot.lane.b32.xlu0 %v1934_v47, %s2994_s13  ;;  %v4903_v13 = vmul.f32 %v2137_v33, %v4585_v1  ;;  %v2138_v61 = vmul.f32 %v2137_v33, %v4605_v15  ;;  %v4941_v47 = vstv %s4885_s24  ;;  %v4948_v29 = vmul.f32 %v2137_v33, %v4618_v12 }
 0x23d   : > { %v4889_v14 = vpop.permute.xlu1 %1339  ;;  %v1881_v33 = vmul.f32 %v1878_v50, %v4618_v12  ;;  %v5005_v56 = vmul.f32 %v4941_v47, %v4605_v15 }
 0x23e   : > { %6395 = vst [vmem:[#allocation113_spill] sm:$0xff] %v4889_v14  ;;  %v4891_v59 = vpop.permute.xlu0 %1387  ;;  %v4909_v14 = vstv %s4862_s17  ;;  %s3004_s17 = smov 96  }
 0x23f   : > { %6396 = vst [vmem:[#allocation114_spill] sm:$0xff] %v4891_v59  ;;  %2057 = vrot.lane.b32.xlu1 %v2052_v34, %s2995_s10  ;;  %v1397_v59 = vstv %s4860_s2  ;;  %v1887_v34 = vsel %vm643_vm5, %v1885_v58, %v6399_v38  ;;  %v4928_v22 = vmul.f32 %v4909_v14, %v4605_v15  ;;  %v4938_v38 = vstv %s4881_s23  ;;  %6409 = vst [vmem:[#allocation123_spill] sm:$0xff] %v5005_v56  ;;  %s3003_s2 = smov 80   ;;  %s6630_s23 = sshll.u32 %s6628_s22, 3 }
 0x240   : > { %2005 = vrot.lane.b32.xlu0 %v2002_v30, %s2995_s10  ;;  %v4924_v2 = vmul.f32 %v1397_v59, %v4605_v15  ;;  %v2144_v58 = vrot.slane %v2138_v61, 3  ;;  %v4964_v61 = vmul.f32 %v1397_v59, %v4585_v1  ;;  %v4983_v59 = vmul.f32 %v4938_v38, %v4605_v15 }
 0x241   : > { %v4913_v48 = vpop.permute.xlu1 %1362  ;;  %6401 = vst [vmem:[#allocation118_spill] sm:$0xff] %v4928_v22  ;;  %v4987_v50 = vmul.f32 %v4909_v14, %v4585_v1  ;;  %v1888_v40 = vrot.slane %v1881_v33, 2  ;;  %v1434_v56 = vmul.f32 %v1431_v0, %v4618_v12  ;;  %v6415_v0 = vld [vmem:[#allocation20_spill] sm:$0xff] }
 0x242   : > { %6397 = vst [vmem:[#allocation115_spill] sm:$0xff] %v4913_v48  ;;  %v4915_v16 = vpop.permute.xlu0 %1531  ;;  %6400 = vst [vmem:[#allocation117_spill] sm:$0xff] %v4924_v2  ;;  %v2147_v48 = vrot.slane %v4948_v29, 3  ;;  %v6412_v29 = vrot.slane %v4856_v57, 7  ;;  %v6416_v63 = vrot.slane %v6415_v0, 4  ;;  %v2950_v57 = vld [vmem:[#allocation2 + $0x8] sm:$0xff] }
 0x243   : > { %6398 = vst [vmem:[#allocation116_spill] sm:$0xff] %v4915_v16  ;;  %v4930_v16 = vstv %s2845_s14  ;;  %1938 = vrot.lane.b32.xlu1 %v1935_v42, %s2994_s13  ;;  %v4954_v42 = vstv %s4893_s26  ;;  %6404 = vst [vmem:[#allocation121_spill] sm:$0xff] %v4964_v61  ;;  %v1420_v8 = vrot.slane %v4987_v50, 7  ;;  %v6419_v50 = vrot.slane %v4964_v61, 7  ;;  %s6629_s14 = sld [smem:[#allocation9_spill]]  ;;  %s6631_s26 = sld [smem:[#allocation143_spill]] }
 0x244   : > { %1890 = vrot.lane.b32.xlu0 %v1887_v34, %s2994_s13  ;;  %v4957_v34 = vstv %s4895_s27  ;;  %v4992_v46 = vmul.f32 %v4930_v16, %v4605_v15  ;;  %v1415_v61 = vmul.f32 %v4909_v14, %v4618_v12 }
 0x245   : > { %v4943_v30 = vpop.permute.xlu1 %1385  ;;  %v5014_v7 = vmul.f32 %v4957_v34, %v4585_v1 }
 0x246   : > { %6402 = vst [vmem:[#allocation119_spill] sm:$0xff] %v4943_v30  ;;  %v4945_v24 = vpop.permute.xlu0 %1547  ;;  %v6405_v30 = vrot.slane %v4903_v13, 3  ;;  %6406 = vst [vmem:[#allocation122_spill] sm:$0xff] %v4992_v46  ;;  %v6414_v46 = vrot.slane %v6413_v62, 4  ;;  %v1974_v62 = vstv %s4959_s28 }
 0x247   : > { %6403 = vst [vmem:[#allocation120_spill] sm:$0xff] %v4945_v24  ;;  %2003 = vrot.lane.b32.xlu1 %v2000_v49, %s2995_s10  ;;  %v2949_v49 = vld [vmem:[#allocation2 + $0x10] sm:$0x3f] }
 0x248   : > { %v2146_v24 = vsel %vm833_vm9, %v2144_v58, %v6405_v30  ;;  %v4996_v58 = vmul.f32 %v4951_v17, %v4605_v15  ;;  %v348_v32 = vmul.f32 %v2949_v49, %v6407_v45  ;;  %v6411_v45 = vld [vmem:[#allocation19_spill] sm:$0xff] }
 0x249   : > { %2149 = vrot.lane.b32.xlu0 %v2146_v24, %s2995_s10  ;;  %v4998_v24 = vmul.f32 %v2949_v49, %v361_v10  ;;  %v5001_v9 = vpop.permute.xlu1 %1529  ;;  %s157_s27 = scalar_lea.vmem %s6631_s26, %s6630_s23 }
 0x24a   : > { %6408 = vst [vmem:[#allocation18_spill] sm:$0xff] %v5001_v9  ;;  %v5007_v30 = vpop.permute.xlu0 %1565  ;;  %v356_v9 = vmul.f32 %v2949_v49, %v6411_v45  ;;  %v2023_v49 = vrot.slane %v4996_v58, 7  ;;  %v2088_v45 = vmul.f32 %v4957_v34, %v4605_v15 }
 0x24b   : > { %6410 = vst [vmem:[#allocation124_spill] sm:$0xff] %v5007_v30  ;;  %2007 = vrot.lane.b32.xlu1 %v6412_v29, %s2995_s10  ;;  %v5026_v30 = vadd.f32 %v6414_v46, %v348_v32  ;;  %v5036_v29 = vmul.f32 %v2950_v57, %v361_v10  ;;  %v5044_v32 = vstv %s4961_s3  ;;  %v6420_v46 = vrot.slane %v4924_v2, 7 }
 0x24c   : > { %v5034_v53 = vadd.f32 %v6416_v63, %v356_v9  ;;  %v6421_v9 = vrot.slane %v4877_v54, 2  ;;  %v6422_v10 = vrot.slane %v4972_v4, 7  ;;  %v6028_v57 = vrot.slane %v5014_v7, 3 }
 0x24d   : > { %2153 = vrot.lane.b32.xlu0 %v2147_v48, %s2995_s10  ;;  %v5038_v41 = vpop.permute.xlu1 %1545  ;;  %v5051_v58 = vsel %vm759_vm6, %v6420_v46, %v6419_v50  ;;  %v1453_v2 = vmul.f32 %v4930_v16, %v4618_v12  ;;  %v2094_v14 = vrot.slane %v2088_v45, 3  ;;  %v5081_v50 = vmul.f32 %v4938_v38, %v4618_v12 }
 0x24e   : > { %6417 = vst [vmem:[#allocation19_spill] sm:$0xff] %v5038_v41  ;;  %v5040_v33 = vpop.permute.xlu0 %1569  ;;  %v1889_v63 = vsel %vm643_vm5, %v6421_v9, %v1888_v40  ;;  %v2025_v0 = vsel %vm759_vm6, %v2023_v49, %v6422_v10  ;;  %v1441_v41 = vrot.slane %v1434_v56, 7  ;;  %v6423_v40 = vrot.slane %v4928_v22, 7 }
 0x24f   : > { %6418 = vst [vmem:[#allocation17_spill] sm:$0xff] %v5040_v33  ;;  %v1439_v33 = vrot.slane %v1433_v3, 7  ;;  %1892 = vrot.lane.b32.xlu1 %v1889_v63, %s2994_s13  ;;  %v5075_v56 = vmul.f32 %v4930_v16, %v4585_v1  ;;  %v1469_v3 = vmul.f32 %v4938_v38, %v4585_v1  ;;  %v5085_v46 = vmul.f32 %v4941_v47, %v4618_v12 }
 0x250   : > { %v5071_v54 = vsel %vm759_vm6, %v6423_v40, %v1420_v8  ;;  %v5091_v63 = vmul.f32 %v4954_v42, %v4618_v12  ;;  %v2090_v10 = vmul.f32 %v4957_v34, %v4618_v12  ;;  %v6428_v38 = vrot.slane %v4903_v13, 3 }
 0x251   : > { %2030 = vrot.lane.b32.xlu0 %v2025_v0, %s2995_s10  ;;  %6424 = vst [vmem:[#allocation20_spill] sm:$0xff] %v5071_v54  ;;  %6425 = vst [vmem:[#allocation125_spill] sm:$0xff] %v5075_v56  ;;  %v5087_v9 = vpop.permute.xlu1 %1549  ;;  %v2096_v0 = vsel %vm833_vm9, %v2094_v14, %v6028_v57  ;;  %v2019_v40 = vmul.f32 %v4951_v17, %v4618_v12  ;;  %v1977_v22 = vmul.f32 %v1974_v62, %v4618_v12 }
 0x252   : > { %6426 = vst [vmem:[#allocation126_spill] sm:$0xff] %v5085_v46  ;;  %6427 = vst [vmem:[#allocation127_spill] sm:$0xff] %v5087_v9  ;;  %v5093_v16 = vpop.permute.xlu0 %1587  ;;  %v2148_v45 = vsel %vm833_vm9, %v6428_v38, %v2147_v48  ;;  %v5110_v9 = vadd.f32 %v4337_v35, %v4975_v39  ;;  %v5113_v34 = vsel %vm759_vm6, %v1439_v33, %v1441_v41  ;;  %v1422_v54 = vrot.slane %v1415_v61, 7 }
 0x253   : > { %6429 = vst [vmem:[#allocation128_spill] sm:$0xff] %v5113_v34  ;;  %v1460_v13 = vrot.slane %v1453_v2, 3  ;;  %2151 = vrot.lane.b32.xlu1 %v2148_v45, %s2995_s10  ;;  %v6430_v48 = vrot.slane %v4935_v19, 7  ;;  %v5124_v17 = vmul.f32 %v4941_v47, %v4585_v1  ;;  %v1507_v35 = vmul.f32 %v4954_v42, %v4585_v1 }
 0x254   : > { %v1976_v39 = vmul.f32 %v1974_v62, %v4585_v1  ;;  %v6029_v41 = vrot.slane %v5075_v56, 3  ;;  %v1475_v2 = vrot.slane %v1469_v3, 3  ;;  %v6030_v61 = vrot.slane %v5081_v50, 3 }
 0x255   : > { %2099 = vrot.lane.b32.xlu0 %v2096_v0, %s2995_s10  ;;  %v5120_v14 = vsel %vm759_vm6, %v6430_v48, %v1439_v33  ;;  %6431 = vst [vmem:[#allocation129_spill] sm:$0xff] %v5124_v17  ;;  %v5133_v38 = vpop.permute.xlu1 %1567  ;;  %v2097_v45 = vrot.slane %v2090_v10, 3  ;;  %v2026_v48 = vrot.slane %v2019_v40, 7  ;;  %v1984_v57 = vrot.slane %v1977_v22, 6 }
 0x256   : > { %6432 = vst [vmem:[#allocation130_spill] sm:$0xff] %v5133_v38  ;;  %v5135_v33 = vpop.permute.xlu0 %1610  ;;  %v5142_v34 = vsel %vm759_vm6, %v1420_v8, %v1422_v54  ;;  %v5147_v3 = vsel %vm833_vm9, %v6029_v41, %v1460_v13  ;;  %v1506_v10 = vmul.f32 %v4954_v42, %v4605_v15  ;;  %v2112_v47 = vstv %s5066_s4 }
 0x257   : > { %6433 = vst [vmem:[#allocation131_spill] sm:$0xff] %v5135_v33  ;;  %6434 = vst [vmem:[#allocation132_spill] sm:$0xff] %v5142_v34  ;;  %2028 = vrot.lane.b32.xlu1 %v2023_v49, %s2995_s10  ;;  %v1513_v22 = vrot.slane %v1507_v35, 3  ;;  %v1982_v0 = vrot.slane %v1976_v39, 6  ;;  %v1975_v8 = vmul.f32 %v1974_v62, %v4605_v15  ;;  %v5161_v54 = vsel %vm833_vm9, %v1475_v2, %v6030_v61 }
 0x258   : > { %6435 = vst [vmem:[#allocation133_spill] sm:$0xff] %v5147_v3  ;;  %v6436_v49 = vrot.slane %v4983_v59, 3  ;;  %v2114_v35 = vmul.f32 %v2112_v47, %v4585_v1  ;;  %v5174_v62 = vstv %s5097_s6  ;;  %v6437_v39 = vrot.slane %v5091_v63, 3 }
 0x259   : > { %2103 = vrot.lane.b32.xlu0 %v2097_v45, %s2995_s10  ;;  %v5168_v42 = vpop.permute.xlu1 %1585  ;;  %v6438_v61 = vrot.slane %v5085_v46, 3  ;;  %v6439_v59 = vrot.slane %v5124_v17, 3  ;;  %v1985_v56 = vsel %vm594_vm4, %v1982_v0, %v1984_v57  ;;  %v1512_v3 = vrot.slane %v1506_v10, 3 }
 0x25a   : > { %v5166_v13 = vsel %vm833_vm9, %v6436_v49, %v1475_v2  ;;  %v5170_v41 = vpop.permute.xlu0 %1631  ;;  %v5179_v40 = vsel %vm833_vm9, %v1513_v22, %v6437_v39  ;;  %v6440_v49 = vrot.slane %v4972_v4, 7  ;;  %v6441_v39 = vrot.slane %v5014_v7, 3 }
 0x25b   : > { %v5186_v2 = vsel %vm833_vm9, %v6439_v59, %v6438_v61  ;;  %v2218_v61 = vmul.f32 %v5044_v32, %v4585_v1  ;;  %v2113_v4 = vmul.f32 %v2112_v47, %v4605_v15  ;;  %v443_v57 = vadd.f32 %v4425_v5, %v5036_v29 }
 0x25c   : > { %v2027_v33 = vsel %vm759_vm6, %v6440_v49, %v2026_v48  ;;  %v2098_v46 = vsel %vm833_vm9, %v6441_v39, %v2097_v45  ;;  %v1981_v48 = vrot.slane %v1975_v8, 6  ;;  %v2115_v59 = vmul.f32 %v2112_v47, %v4618_v12 }
 0x25d   : > { %2032 = vrot.lane.b32.xlu1 %v2027_v33, %s2995_s10  ;;  %1988 = vrot.lane.b32.xlu0 %v1985_v56, %s2994_s13  ;;  %v2066_v10 = vstv %s5129_s7  ;;  %v5206_v49 = vpop.permute.xlu1 %1589  ;;  %v2120_v56 = vrot.slane %v2114_v35, 3  ;;  %v2307_v45 = vstv %s5137_s8  ;;  %v540_v34 = vadd.f32 %v4444_v55, %v443_v57 }
 0x25e   : > { %v5208_v33 = vpop.permute.xlu0 %1635  ;;  %v2068_v7 = vmul.f32 %v2066_v10, %v4585_v1  ;;  %v2069_v39 = vmul.f32 %v2066_v10, %v4618_v12  ;;  %v5217_v5 = vsel %vm833_vm9, %v1512_v3, %v1513_v22  ;;  %v2217_v29 = vmul.f32 %v5044_v32, %v4605_v15 }
 0x25f   : > { %6442 = vst [vmem:[#allocation134_spill] sm:$0xff] %v5208_v33  ;;  %v5222_v47 = vmul.f32 %v2307_v45, %v4585_v1  ;;  %v1983_v8 = vsel %vm594_vm4, %v1981_v48, %v1982_v0  ;;  %v2119_v35 = vrot.slane %v2113_v4, 3  ;;  %v2178_v17 = vmul.f32 %v5174_v62, %v4585_v1 }
 0x260   : > { %v2067_v55 = vmul.f32 %v2066_v10, %v4605_v15  ;;  %v633_v3 = vadd.f32 %v4486_v27, %v540_v34  ;;  %v2122_v22 = vrot.slane %v2115_v59, 3  ;;  %v5234_v57 = vmul.f32 %v2307_v45, %v4605_v15 }
 0x261   : > { %2101 = vrot.lane.b32.xlu1 %v2098_v46, %s2995_s10  ;;  %2225 = vrot.lane.b32.xlu0 %v2218_v61, %s2996_s30  ;;  %v2257_v46 = vstv %s5156_s11  ;;  %v5237_v33 = vpop.permute.xlu1 %1612  ;;  %v2121_v0 = vsel %vm833_vm9, %v2119_v35, %v2120_v56  ;;  %v2074_v4 = vrot.slane %v2068_v7, 3  ;;  %v5244_v48 = vmul.f32 %v5174_v62, %v4605_v15 }
 0x262   : > { %6443 = vst [vmem:[#allocation135_spill] sm:$0xff] %v5237_v33  ;;  %v5239_v61 = vpop.permute.xlu0 %1658  ;;  %v2076_v10 = vrot.slane %v2069_v39, 3  ;;  %v539_v27 = vadd.f32 %v4461_v18, %v5110_v9  ;;  %v730_v34 = vadd.f32 %v4514_v43, %v633_v3  ;;  %v6034_v59 = vrot.slane %v5222_v47, 5 }
 0x263   : > { %6444 = vst [vmem:[#allocation136_spill] sm:$0xff] %v5239_v61  ;;  %v5253_v45 = vstv %s5192_s29  ;;  %v2073_v7 = vrot.slane %v2067_v55, 3  ;;  %v2258_v35 = vmul.f32 %v2257_v46, %v4605_v15  ;;  %v2259_v39 = vmul.f32 %v2257_v46, %v4585_v1 }
 0x264   : > { %v5260_v33 = vmul.f32 %v2257_v46, %v4618_v12  ;;  %v823_v18 = vadd.f32 %v4556_v28, %v730_v34  ;;  %v2123_v43 = vsel %vm833_vm9, %v2120_v56, %v2122_v22  ;;  %v5267_v3 = vmul.f32 %v5253_v45, %v4585_v1 }
 0x265   : > { %1986 = vrot.lane.b32.xlu1 %v1983_v8, %s2994_s13  ;;  %2124 = vrot.lane.b32.xlu0 %v2121_v0, %s2995_s10  ;;  %v5269_v8 = vpop.permute.xlu1 %1633  ;;  %v2075_v0 = vsel %vm833_vm9, %v2073_v7, %v2074_v4  ;;  %v5275_v46 = vsel %vm833_vm9, %v2074_v4, %v2076_v10  ;;  %v5279_v28 = vmul.f32 %v5253_v45, %v4605_v15  ;;  %v2162_v56 = vstv %s5213_s12  ;;  %s5282_s13 = sld [smem:[#allocation4 + $0x45]] }
 0x266   : > { %v5271_v55 = vpop.permute.xlu0 %1677  ;;  %v444_v1 = vadd.f32 %v4376_v51, %v4998_v24  ;;  %v632_v34 = vadd.f32 %v4349_v52, %v539_v27  ;;  %v920_v9 = vadd.f32 %v4583_v21, %v823_v18  ;;  %v6445_v7 = vrot.slane %v5234_v57, 5  ;;  %v6446_v21 = vld [vmem:[#allocation41_spill] sm:$0xff] }
 0x267   : > { %v2264_v15 = vrot.slane %v2258_v35, 4  ;;  %v2265_v10 = vrot.slane %v2259_v39, 4  ;;  %v6035_v51 = vrot.slane %v5260_v33, 4  ;;  %v2399_v24 = vstv %s5230_s15  ;;  %v5310_v35 = vld [vmem:[#allocation2 + $0x20] sm:$0xff] }
 0x268   : > { %v5293_v4 = vsel %vm429_vm8, %v6445_v7, %v6034_v59  ;;  %v541_v52 = vadd.f32 %v4392_v6, %v444_v1  ;;  %v490_v27 = vadd.f32 %v4427_v25, %v6446_v21  ;;  %v729_v18 = vadd.f32 %v4521_v44, %v632_v34  ;;  %6448 = vst [vmem:[#allocation137_spill] sm:$0xff] %v5310_v35  ;;  %v5322_v1 = vld [vmem:[#allocation2 + $0x18] sm:$0xff] }
 0x269   : > { %2223 = vrot.lane.b32.xlu1 %v2217_v29, %s2996_s30  ;;  %2128 = vrot.lane.b32.xlu0 %v2122_v22, %s2995_s10  ;;  %v994_v7 = vadd.f32 %v4662_v20, %v920_v9  ;;  %v5304_v59 = vpop.permute.xlu1 %1656  ;;  %v2219_v22 = vmul.f32 %v5044_v32, %v4618_v12  ;;  %v5313_v39 = vmul.f32 %v5310_v35, %v2162_v56  ;;  %v2282_v25 = vstv %s5246_s16 }
 0x26a   : > { %6447 = vst [vmem:[#allocation41_spill] sm:$0xff] %v5304_v59  ;;  %v5306_v29 = vpop.permute.xlu0 %1681  ;;  %v5316_v6 = vmul.f32 %v5310_v35, %v2399_v24  ;;  %v586_v44 = vadd.f32 %v4477_v11, %v490_v27  ;;  %v634_v20 = vadd.f32 %v4479_v23, %v541_v52  ;;  %6449 = vst [vmem:[#allocation138_spill] sm:$0xff] %v5322_v1  ;;  %v5337_v23 = vld [vmem:[#allocation2 + $0x28] sm:$0x3f] }
 0x26b   : > { %v1086_v9 = vadd.f32 %v4692_v37, %v994_v7  ;;  %v5325_v34 = vmul.f32 %v5322_v1, %v2162_v56  ;;  %v5330_v12 = vsel %vm162_vm1, %v2264_v15, %v2265_v10  ;;  %v5335_v11 = vsel %vm162_vm1, %v2265_v10, %v6035_v51  ;;  %v6450_v15 = vld [vmem:[#allocation45_spill] sm:$0xff]  ;;  %v6457_v59 = vld [vmem:[#allocation100_spill] sm:$0xff] }
 0x26c   : > { %v5340_v37 = vmul.f32 %v5337_v23, %v2399_v24  ;;  %v680_v32 = vadd.f32 %v4497_v26, %v586_v44  ;;  %v822_v56 = vadd.f32 %v4368_v31, %v729_v18  ;;  %v489_v21 = vadd.f32 %v4442_v36, %v6450_v15  ;;  %v6454_v31 = vld [vmem:[#allocation24_spill] sm:$0xff]  ;;  %v6458_v36 = vld [vmem:[#allocation59_spill] sm:$0xff] }
 0x26d   : > { %2227 = vrot.lane.b32.xlu1 %v2219_v22, %s2996_s30  ;;  %2185 = vrot.lane.b32.xlu0 %v2178_v17, %s2996_s30  ;;  %v1182_v52 = vadd.f32 %v4766_v60, %v1086_v9  ;;  %v5346_v17 = vmul.f32 %v5322_v1, %v2282_v25  ;;  %v5350_v27 = vpop.permute.xlu1 %1660  ;;  %v5356_v22 = vmul.f32 %v5310_v35, %v2282_v25  ;;  %v5359_v26 = vstv %s5282_s13  ;;  %v6455_v60 = vld [vmem:[#allocation34_spill] sm:$0xff]  ;;  %v6456_v9 = vld [vmem:[#allocation28_spill] sm:$0xff] }
 0x26e   : > { %6451 = vst [vmem:[#allocation45_spill] sm:$0xff] %v5350_v27  ;;  %v5352_v10 = vpop.permute.xlu0 %1704  ;;  %6453 = vst [vmem:[#allocation140_spill] sm:$0xff] %v5359_v26  ;;  %v773_v18 = vadd.f32 %v6454_v31, %v680_v32  ;;  %v731_v44 = vadd.f32 %v6455_v60, %v634_v20  ;;  %v919_v51 = vadd.f32 %v6456_v9, %v822_v56  ;;  %v6459_v32 = vld [vmem:[#allocation46_spill] sm:$0xff]  ;;  %v6460_v31 = vld [vmem:[#allocation44_spill] sm:$0xff] }
 0x26f   : > { %6452 = vst [vmem:[#allocation139_spill] sm:$0xff] %v5352_v10  ;;  %v1274_v61 = vadd.f32 %v6457_v59, %v1182_v52  ;;  %v585_v15 = vadd.f32 %v6458_v36, %v489_v21  ;;  %v5370_v10 = vmul.f32 %v5322_v1, %v2399_v24  ;;  %v5373_v27 = vmul.f32 %v5337_v23, %v2282_v25  ;;  %v6461_v60 = vld [vmem:[#allocation69_spill] sm:$0xff]  ;;  %v6462_v52 = vld [vmem:[#allocation115_spill] sm:$0xff]  ;;  %v6465_v7 = vld [vmem:[#allocation16_spill] sm:$0xff] }
 0x270   : > { %v824_v20 = vadd.f32 %v6459_v32, %v731_v44  ;;  %v870_v56 = vadd.f32 %v6460_v31, %v773_v18  ;;  %v993_v59 = vadd.f32 %v6461_v60, %v919_v51  ;;  %v5388_v25 = vmul.f32 %v5310_v35, %v5359_v26  ;;  %v6467_v18 = vld [vmem:[#allocation64_spill] sm:$0xff] }
 0x271   : > { %2126 = vrot.lane.b32.xlu1 %v2123_v43, %s2995_s10  ;;  %2078 = vrot.lane.b32.xlu0 %v2075_v0, %s2995_s10  ;;  %v1370_v21 = vadd.f32 %v6462_v52, %v1274_v61  ;;  %v6463_v43 = vld [vmem:[#allocation31_spill] sm:$0xff]  ;;  %v679_v24 = vadd.f32 %v6465_v7, %v585_v15  ;;  %v1680_v1 = vpop.permute.xlu1 %1679  ;;  %v6468_v51 = vld [vmem:[#allocation68_spill] sm:$0xff]  ;;  %v6469_v61 = vld [vmem:[#allocation82_spill] sm:$0xff] }
 0x272   : > { %v491_v9 = vadd.f32 %v6463_v43, %v5026_v30  ;;  %v6464_v0 = vld [vmem:[#allocation51_spill] sm:$0xff]  ;;  %v5384_v38 = vpop.permute.xlu0 %1725  ;;  %6466 = vst [vmem:[#allocation24_spill] sm:$0xff] %v5388_v25  ;;  %v921_v44 = vadd.f32 %v6467_v18, %v824_v20  ;;  %v954_v32 = vadd.f32 %v6468_v51, %v870_v56  ;;  %v1085_v31 = vadd.f32 %v6469_v61, %v993_v59  ;;  %v6471_v7 = vld [vmem:[#allocation53_spill] sm:$0xff]  ;;  %v6473_v43 = vld [vmem:[#allocation56_spill] sm:$0xff] }
 0x273   : > { %v516_v36 = vadd.f32 %v6464_v0, %v5034_v53  ;;  %v5395_v30 = vmul.f32 %v5337_v23, %v5359_v26  ;;  %v6470_v53 = vld [vmem:[#allocation50_spill] sm:$0xff]  ;;  %v6472_v52 = vld [vmem:[#allocation39_spill] sm:$0xff]  ;;  %v6474_v20 = vrot.slane %v5234_v57, 5  ;;  %v6477_v26 = vld [vmem:[#allocation89_spill] sm:$0xff] }
 0x274   : > { %v587_v60 = vadd.f32 %v6470_v53, %v491_v9  ;;  %v515_v0 = vadd.f32 %v6473_v43, %v6472_v52  ;;  %v6475_v59 = vld [vmem:[#allocation71_spill] sm:$0xff]  ;;  %v6476_v51 = vld [vmem:[#allocation74_spill] sm:$0xff]  ;;  %v1181_v9 = vadd.f32 %v6477_v26, %v1085_v31  ;;  %v6478_v53 = vld [vmem:[#allocation32_spill] sm:$0xff] }
 0x275   : > { %v609_v15 = vadd.f32 %v6471_v7, %v516_v36  ;;  %2183 = vrot.lane.b32.xlu1 %v5244_v48, %s2996_s30  ;;  %2315 = vrot.lane.b32.xlu0 %v6474_v20, %s2997_s5  ;;  %v995_v18 = vadd.f32 %v6475_v59, %v921_v44  ;;  %v1040_v61 = vadd.f32 %v6476_v51, %v954_v32  ;;  %v6479_v52 = vld [vmem:[#allocation61_spill] sm:$0xff]  ;;  %v5414_v35 = vpop.permute.xlu1 %1702  ;;  %v6482_v44 = vld [vmem:[#allocation84_spill] sm:$0xff]  ;;  %v6484_v26 = vld [vmem:[#allocation103_spill] sm:$0xff] }
 0x276   : > { %v1447_v36 = vadd.f32 %v5120_v14, %v1370_v21  ;;  %v681_v7 = vadd.f32 %v6478_v53, %v587_v60  ;;  %v608_v43 = vadd.f32 %v6479_v52, %v515_v0  ;;  %v6480_v25 = vld [vmem:[#allocation49_spill] sm:$0xff]  ;;  %6481 = vst [vmem:[#allocation34_spill] sm:$0xff] %v5414_v35  ;;  %v5416_v57 = vpop.permute.xlu0 %1748  ;;  %v2179_v20 = vmul.f32 %v5337_v23, %v5174_v62  ;;  %v6483_v32 = vld [vmem:[#allocation88_spill] sm:$0xff]  ;;  %v6490_v56 = vld [vmem:[#allocation42_spill] sm:$0xff] }
 0x277   : > { %v772_v48 = vadd.f32 %v6480_v25, %v679_v24  ;;  %v1087_v59 = vadd.f32 %v6482_v44, %v995_v18  ;;  %v1132_v51 = vadd.f32 %v6483_v32, %v1040_v61  ;;  %v1273_v31 = vadd.f32 %v6484_v26, %v1181_v9  ;;  %v6487_v24 = vld [vmem:[#allocation40_spill] sm:$0xff]  ;;  %v6488_v25 = vld [vmem:[#allocation58_spill] sm:$0xff]  ;;  %v6489_v53 = vld [vmem:[#allocation21_spill] sm:$0xff] }
 0x278   : > { %v6485_v14 = vrot.slane %v5340_v37, 1  ;;  %v6486_v21 = vrot.slane %v5316_v6, 1  ;;  %v514_v0 = vadd.f32 %v6488_v25, %v6487_v24  ;;  %v705_v52 = vadd.f32 %v6489_v53, %v608_v43  ;;  %v6492_v9 = vld [vmem:[#allocation91_spill] sm:$0xff]  ;;  %v6493_v32 = vld [vmem:[#allocation94_spill] sm:$0xff]  ;;  %v6496_v53 = vld [vmem:[#allocation33_spill] sm:$0xff] }
 0x279   : > { %v869_v62 = vadd.f32 %v6490_v56, %v772_v48  ;;  %2187 = vrot.lane.b32.xlu1 %v2179_v20, %s2996_s30  ;;  %v6491_v18 = vrot.slane %v5222_v47, 5  ;;  %v2289_v61 = vrot.slane %v5346_v17, 4  ;;  %v1183_v44 = vadd.f32 %v6492_v9, %v1087_v59  ;;  %v6495_v25 = vld [vmem:[#allocation54_spill] sm:$0xff]  ;;  %v6497_v48 = vld [vmem:[#allocation63_spill] sm:$0xff]  ;;  %v5446_v35 = vpop.permute.xlu1 %1723 }
 0x27a   : > { %v5428_v60 = vsel %vm453_vm7, %v6486_v21, %v6485_v14  ;;  %v1228_v26 = vadd.f32 %v6493_v32, %v1132_v51  ;;  %v6494_v14 = vld [vmem:[#allocation110_spill] sm:$0xff]  ;;  %v1521_v24 = vadd.f32 %v5179_v40, %v1447_v36  ;;  %v706_v43 = vadd.f32 %v6495_v25, %v609_v15  ;;  %v5448_v47 = vpop.permute.xlu0 %1752  ;;  %v6499_v51 = vld [vmem:[#allocation35_spill] sm:$0xff]  ;;  %v6501_v40 = vld [vmem:[#allocation109_spill] sm:$0xff] }
 0x27b   : > { %2319 = vrot.lane.b32.xlu0 %v6491_v18, %s2997_s5  ;;  %v1369_v21 = vadd.f32 %v6494_v14, %v1273_v31  ;;  %v774_v56 = vadd.f32 %v6496_v53, %v681_v7  ;;  %v953_v20 = vadd.f32 %v6497_v48, %v869_v62  ;;  %v6498_v17 = vrot.slane %v5356_v22, 4  ;;  %v6500_v31 = vld [vmem:[#allocation105_spill] sm:$0xff]  ;;  %v6503_v62 = vld [vmem:[#allocation52_spill] sm:$0xff] }
 0x27c   : > { %v798_v18 = vadd.f32 %v6499_v51, %v705_v52  ;;  %v1275_v9 = vadd.f32 %v6500_v31, %v1183_v44  ;;  %v1320_v36 = vadd.f32 %v6501_v40, %v1228_v26  ;;  %v1595_v15 = vadd.f32 %v5093_v16, %v1521_v24  ;;  %v6502_v7 = vld [vmem:[#allocation29_spill] sm:$0xff]  ;;  %v6507_v26 = vld [vmem:[#allocation112_spill] sm:$0xff] }
 0x27d   : > { %v5453_v59 = vsel %vm162_vm1, %v2289_v61, %v6498_v17  ;;  %v607_v32 = vadd.f32 %v6502_v7, %v514_v0  ;;  %v871_v14 = vadd.f32 %v6503_v62, %v774_v56  ;;  %v6504_v25 = vld [vmem:[#allocation77_spill] sm:$0xff]  ;;  %2080 = vrot.lane.b32.xlu1 %v5275_v46, %s2995_s10  ;;  %v6505_v61 = vld [vmem:[#allocation47_spill] sm:$0xff]  ;;  %v6506_v44 = vrot.slane %v4935_v19, 7  ;;  %v6509_v0 = vld [vmem:[#allocation36_spill] sm:$0xff]  ;;  %v5475_v62 = vpop.permute.xlu1 %1727  ;;  %s5491_s10 = sld [smem:[#allocation4 + $0x52]] }
 0x27e   : > { %v1039_v53 = vadd.f32 %v6504_v25, %v953_v20  ;;  %v895_v52 = vadd.f32 %v6505_v61, %v798_v18  ;;  %v1371_v17 = vadd.f32 %v6507_v26, %v1275_v9  ;;  %v1687_v16 = vadd.f32 %v1680_v1, %v1595_v15  ;;  %v6508_v24 = vld [vmem:[#allocation37_spill] sm:$0xff]  ;;  %v6510_v56 = vld [vmem:[#allocation15_spill] sm:$0xff]  ;;  %v6514_v9 = vld [vmem:[#allocation60_spill] sm:$0xff] }
 0x27f   : > { %2205 = vrot.lane.b32.xlu0 %v5267_v3, %s2996_s30  ;;  %v1446_v48 = vadd.f32 %v6506_v44, %v1369_v21  ;;  %v466_v51 = vadd.f32 %v6509_v0, %v6508_v24  ;;  %v704_v31 = vadd.f32 %v6510_v56, %v607_v32  ;;  %v6511_v20 = vld [vmem:[#allocation65_spill] sm:$0xff]  ;;  %v6512_v7 = vld [vmem:[#allocation83_spill] sm:$0xff]  ;;  %v1776_v3 = vpop.permute.xlu0 %1775  ;;  %v1409_v19 = vadd.f32 %v5051_v58, %v1320_v36  ;;  %v6521_v24 = vld [vmem:[#allocation128_spill] sm:$0xff] }
 0x280   : > { %v955_v40 = vadd.f32 %v6511_v20, %v871_v14  ;;  %v1131_v46 = vadd.f32 %v6512_v7, %v1039_v53  ;;  %v6513_v25 = vld [vmem:[#allocation67_spill] sm:$0xff]  ;;  %v5479_v21 = vadd.f32 %v1776_v3, %v1687_v16  ;;  %v2199_v1 = vmul.f32 %v5337_v23, %v5253_v45  ;;  %v6516_v44 = vld [vmem:[#allocation97_spill] sm:$0xff]  ;;  %v6520_v45 = vld [vmem:[#allocation80_spill] sm:$0xff] }
 0x281   : > { %v974_v18 = vadd.f32 %v6513_v25, %v895_v52  ;;  %v562_v15 = vadd.f32 %v6514_v9, %v466_v51  ;;  %v6515_v61 = vld [vmem:[#allocation79_spill] sm:$0xff]  ;;  %2317 = vrot.lane.b32.xlu1 %v5293_v4, %s2997_s5  ;;  %v6519_v36 = vld [vmem:[#allocation12_spill] sm:$0xff]  ;;  %v1448_v0 = vadd.f32 %v6521_v24, %v1371_v17  ;;  %v1520_v51 = vadd.f32 %v5217_v5, %v1446_v48  ;;  %v6522_v56 = vld [vmem:[#allocation14_spill] sm:$0xff] }
 0x282   : > { %v1041_v32 = vadd.f32 %v6515_v61, %v955_v40  ;;  %v1227_v14 = vadd.f32 %v6516_v44, %v1131_v46  ;;  %v6517_v26 = vld [vmem:[#allocation123_spill] sm:$0xff]  ;;  %v6523_v40 = vld [vmem:[#allocation30_spill] sm:$0xff]  ;;  %v6524_v46 = vld [vmem:[#allocation85_spill] sm:$0xff] }
 0x283   : > { %v1493_v53 = vrot.slane %v6517_v26, 3  ;;  %2269 = vrot.lane.b32.xlu0 %v5330_v12, %s2996_s30  ;;  %v6518_v58 = vld [vmem:[#allocation23_spill] sm:$0xff]  ;;  %v1065_v16 = vadd.f32 %v6520_v45, %v974_v18  ;;  %v656_v20 = vadd.f32 %v6522_v56, %v562_v15  ;;  %v797_v7 = vadd.f32 %v6523_v40, %v704_v31  ;;  %v6525_v3 = vld [vmem:[#allocation104_spill] sm:$0xff]  ;;  %v5502_v12 = vpop.permute.xlu1 %1750  ;;  %v1866_v9 = vpop.permute.xlu0 %1865  ;;  %v6526_v61 = vld [vmem:[#allocation57_spill] sm:$0xff] }
 0x284   : > { %v465_v52 = vadd.f32 %v6519_v36, %v6518_v58  ;;  %v1133_v4 = vadd.f32 %v6524_v46, %v1041_v32  ;;  %v1319_v25 = vadd.f32 %v6525_v3, %v1227_v14  ;;  %v6527_v58 = vld [vmem:[#allocation87_spill] sm:$0xff]  ;;  %v1483_v18 = vadd.f32 %v5161_v54, %v1409_v19  ;;  %v6528_v5 = vld [vmem:[#allocation22_spill] sm:$0xff]  ;;  %v6533_v54 = vld [vmem:[#allocation120_spill] sm:$0xff] }
 0x285   : > { %v1157_v36 = vadd.f32 %v6527_v58, %v1065_v16  ;;  %v1594_v17 = vadd.f32 %v5168_v42, %v1520_v51  ;;  %v752_v48 = vadd.f32 %v6528_v5, %v656_v20  ;;  %v6529_v15 = vld [vmem:[#allocation55_spill] sm:$0xff]  ;;  %2203 = vrot.lane.b32.xlu1 %v5279_v28, %s2996_s30  ;;  %v6531_v32 = vrot.slane %v5260_v33, 4  ;;  %v6537_v46 = vld [vmem:[#allocation117_spill] sm:$0xff]  ;;  %v6539_v3 = vld [vmem:[#allocation106_spill] sm:$0xff] }
 0x286   : > { %v561_v44 = vadd.f32 %v6526_v61, %v465_v52  ;;  %v894_v45 = vadd.f32 %v6529_v15, %v797_v7  ;;  %v6530_v31 = vld [vmem:[#allocation99_spill] sm:$0xff]  ;;  %v2406_v14 = vrot.slane %v5370_v10, 1  ;;  %v6532_v52 = vld [vmem:[#allocation101_spill] sm:$0xff]  ;;  %v1555_v19 = vadd.f32 %v6533_v54, %v1483_v18  ;;  %v6536_v7 = vld [vmem:[#allocation70_spill] sm:$0xff] }
 0x287   : > { %v1229_v24 = vadd.f32 %v6530_v31, %v1133_v4  ;;  %2273 = vrot.lane.b32.xlu0 %v6531_v32, %s2996_s30  ;;  %v1249_v16 = vadd.f32 %v6532_v52, %v1157_v36  ;;  %v6534_v42 = vrot.slane %v5091_v63, 3  ;;  %v1686_v56 = vadd.f32 %v5271_v55, %v1594_v17  ;;  %v6535_v20 = vld [vmem:[#allocation43_spill] sm:$0xff]  ;;  %v1774_v10 = vpop.permute.xlu1 %1773  ;;  %v1870_v58 = vpop.permute.xlu0 %1869  ;;  %v6540_v36 = vld [vmem:[#allocation108_spill] sm:$0xff]  ;;  %v6541_v55 = vld [vmem:[#allocation25_spill] sm:$0xff] }
 0x288   : > { %v799_v40 = vadd.f32 %v6535_v20, %v706_v43  ;;  %v973_v28 = vadd.f32 %v6536_v7, %v894_v45  ;;  %v6538_v4 = vrot.slane %v6537_v46, 7  ;;  %v1641_v63 = vadd.f32 %v5269_v8, %v1555_v19  ;;  %v6542_v15 = vld [vmem:[#allocation27_spill] sm:$0xff]  ;;  %v6543_v31 = vld [vmem:[#allocation76_spill] sm:$0xff] }
 0x289   : > { %v1522_v51 = vadd.f32 %v6534_v42, %v1448_v0  ;;  %v1321_v61 = vadd.f32 %v6539_v3, %v1229_v24  ;;  %v1345_v5 = vadd.f32 %v6540_v36, %v1249_v16  ;;  %v1782_v0 = vadd.f32 %v1774_v10, %v1686_v56  ;;  %2207 = vrot.lane.b32.xlu1 %v2199_v1, %s2996_s30  ;;  %v6544_v24 = vld [vmem:[#allocation62_spill] sm:$0xff]  ;;  %v6546_v54 = vld [vmem:[#allocation72_spill] sm:$0xff]  ;;  %v6548_v56 = vld [vmem:[#allocation121_spill] sm:$0xff] }
 0x28a   : > { %v1408_v33 = vadd.f32 %v6538_v4, %v1319_v25  ;;  %v846_v17 = vadd.f32 %v6541_v55, %v752_v48  ;;  %v896_v43 = vadd.f32 %v6542_v15, %v799_v40  ;;  %v1064_v45 = vadd.f32 %v6543_v31, %v973_v28  ;;  %v6545_v16 = vld [vmem:[#allocation66_spill] sm:$0xff]  ;;  %v6550_v7 = vld [vmem:[#allocation20_spill] sm:$0xff]  ;;  %v6559_v31 = vld [vmem:[#allocation111_spill] sm:$0xff] }
 0x28b   : > { %v1596_v18 = vadd.f32 %v5206_v49, %v1522_v51  ;;  %2169 = vrot.lane.b32.xlu0 %v5313_v39, %s2996_s30  ;;  %v5537_v25 = vstv %s5491_s10  ;;  %v655_v32 = vadd.f32 %v6544_v24, %v561_v44  ;;  %v1733_v8 = vadd.f32 %v5384_v38, %v1641_v63  ;;  %v6547_v42 = vld [vmem:[#allocation90_spill] sm:$0xff]  ;;  %v1778_v40 = vpop.permute.xlu1 %1777  ;;  %v1822_v39 = vpop.permute.xlu0 %1821  ;;  %v6551_v38 = vld [vmem:[#allocation73_spill] sm:$0xff]  ;;  %v6553_v10 = vld [vmem:[#allocation96_spill] sm:$0xff] }
 0x28c   : > { %v1874_v52 = vadd.f32 %v1866_v9, %v1782_v0  ;;  %v935_v48 = vadd.f32 %v6545_v16, %v846_v17  ;;  %v975_v19 = vadd.f32 %v6546_v54, %v896_v43  ;;  %v1156_v51 = vadd.f32 %v6547_v42, %v1064_v45  ;;  %v6552_v4 = vld [vmem:[#allocation78_spill] sm:$0xff]  ;;  %v6558_v43 = vld [vmem:[#allocation92_spill] sm:$0xff]  ;;  %v6562_v54 = vld [vmem:[#allocation93_spill] sm:$0xff] }
 0x28d   : > { %v1688_v49 = vadd.f32 %v5306_v29, %v1596_v18  ;;  %v6549_v1 = vrot.slane %v6548_v56, 7  ;;  %v1428_v28 = vadd.f32 %v6550_v7, %v1345_v5  ;;  %v1482_v44 = vadd.f32 %v5166_v13, %v1408_v33  ;;  %2271 = vrot.lane.b32.xlu1 %v5335_v11, %s2996_s30  ;;  %v6554_v5 = vld [vmem:[#allocation38_spill] sm:$0xff]  ;;  %v6555_v13 = vld [vmem:[#allocation19_spill] sm:$0xff] }
 0x28e   : > { %v5549_v29 = vadd.f32 %v1822_v39, %v1733_v8  ;;  %v1016_v9 = vadd.f32 %v6551_v38, %v935_v48  ;;  %v1066_v3 = vadd.f32 %v6552_v4, %v975_v19  ;;  %v1248_v36 = vadd.f32 %v6553_v10, %v1156_v51  ;;  %v6557_v17 = vld [vmem:[#allocation86_spill] sm:$0xff]  ;;  %v6568_v7 = vld [vmem:[#allocation107_spill] sm:$0xff] }
 0x28f   : > { %v1410_v20 = vadd.f32 %v6549_v1, %v1321_v61  ;;  %v1784_v46 = vadd.f32 %v1778_v40, %v1688_v49  ;;  %2413 = vrot.lane.b32.xlu0 %v5428_v60, %s2997_s5  ;;  %v2292_v61 = vrot.slane %v5373_v27, 4  ;;  %v751_v18 = vadd.f32 %v6554_v5, %v655_v32  ;;  %v1868_v49 = vpop.permute.xlu1 %1867  ;;  %v1962_v32 = vpop.permute.xlu0 %1961  ;;  %v6561_v16 = vld [vmem:[#allocation26_spill] sm:$0xff]  ;;  %v6566_v1 = vld [vmem:[#allocation137_spill] sm:$0xff]  ;;  %v6567_v40 = vld [vmem:[#allocation48_spill] sm:$0xff] }
 0x290   : > { %v1554_v33 = vadd.f32 %v6555_v13, %v1482_v44  ;;  %v6556_v0 = vrot.slane %v5316_v6, 1  ;;  %v1108_v15 = vadd.f32 %v6557_v17, %v1016_v9  ;;  %v1158_v11 = vadd.f32 %v6558_v43, %v1066_v3  ;;  %v6563_v42 = vld [vmem:[#allocation98_spill] sm:$0xff]  ;;  %v6574_v13 = vld [vmem:[#allocation75_spill] sm:$0xff]  ;;  %v6577_v43 = vld [vmem:[#allocation24_spill] sm:$0xff] }
 0x291   : > { %v1876_v63 = vadd.f32 %v1870_v58, %v1784_v46  ;;  %v1344_v45 = vadd.f32 %v6559_v31, %v1248_v36  ;;  %v6560_v60 = vrot.slane %v5081_v50, 3  ;;  %v1502_v8 = vadd.f32 %v5186_v2, %v1428_v28  ;;  %2167 = vrot.lane.b32.xlu1 %v5325_v34, %s2996_s30  ;;  %v6564_v2 = vld [vmem:[#allocation127_spill] sm:$0xff]  ;;  %v6565_v56 = vld [vmem:[#allocation130_spill] sm:$0xff]  ;;  %v6573_v36 = vld [vmem:[#allocation136_spill] sm:$0xff] }
 0x292   : > { %v2408_v55 = vsel %vm453_vm7, %v2406_v14, %v6556_v0  ;;  %v1640_v58 = vadd.f32 %v5170_v41, %v1554_v33  ;;  %v1875_v6 = vadd.f32 %v1868_v49, %v5479_v21  ;;  %v5574_v14 = vadd.f32 %v1962_v32, %v1874_v52  ;;  %v6569_v34 = vld [vmem:[#allocation118_spill] sm:$0xff]  ;;  %v6575_v0 = vld [vmem:[#allocation129_spill] sm:$0xff] }
 0x293   : > { %v1484_v24 = vadd.f32 %v6560_v60, %v1410_v20  ;;  %v845_v48 = vadd.f32 %v6561_v16, %v751_v18  ;;  %v1204_v19 = vadd.f32 %v6562_v54, %v1108_v15  ;;  %v1250_v51 = vadd.f32 %v6563_v42, %v1158_v11  ;;  %2294 = vrot.lane.b32.xlu0 %v5453_v59, %s2996_s30  ;;  %v6571_v59 = vld [vmem:[#allocation113_spill] sm:$0xff]  ;;  %v1820_v9 = vpop.permute.xlu1 %1819  ;;  %v1966_v4 = vpop.permute.xlu0 %1965  ;;  %v6572_v3 = vld [vmem:[#allocation134_spill] sm:$0xff]  ;;  %v6581_v54 = vld [vmem:[#allocation132_spill] sm:$0xff] }
 0x294   : > { %v2359_v50 = vrot.slane %v5395_v30, 1  ;;  %v1575_v21 = vadd.f32 %v6565_v56, %v1502_v8  ;;  %v1732_v52 = vadd.f32 %v5446_v35, %v1640_v58  ;;  %v5589_v20 = vmul.f32 %v6566_v1, %v5537_v25  ;;  %v6578_v31 = vld [vmem:[#allocation138_spill] sm:$0xff]  ;;  %v6580_v49 = vld [vmem:[#allocation81_spill] sm:$0xff]  ;;  %v6602_v30 = vld [vmem:[#allocation131_spill] sm:$0xff] }
 0x295   : > { %v1556_v41 = vadd.f32 %v6564_v2, %v1484_v24  ;;  %v934_v39 = vadd.f32 %v6567_v40, %v845_v48  ;;  %v1296_v28 = vadd.f32 %v6568_v7, %v1204_v19  ;;  %v6570_v44 = vrot.slane %v6569_v34, 7  ;;  %2411 = vrot.lane.b32.xlu1 %v2408_v55, %s2997_s5 }
 0x296   : > { %v1346_v38 = vadd.f32 %v6571_v59, %v1250_v51  ;;  %v1666_v35 = vadd.f32 %v6573_v36, %v1575_v21  ;;  %v1828_v5 = vadd.f32 %v1820_v9, %v1732_v52  ;;  %v5598_v18 = vadd.f32 %v1966_v4, %v1876_v63  ;;  %v6584_v21 = vld [vmem:[#allocation140_spill] sm:$0xff]  ;;  %v6588_v59 = vld [vmem:[#allocation102_spill] sm:$0xff] }
 0x297   : > { %v1427_v46 = vadd.f32 %v6570_v44, %v1344_v45  ;;  %v1642_v10 = vadd.f32 %v6572_v3, %v1556_v41  ;;  %v1015_v33 = vadd.f32 %v6574_v13, %v934_v39  ;;  %v6576_v17 = vrot.slane %v6575_v0, 3  ;;  %2298 = vrot.lane.b32.xlu0 %v2292_v61, %s2996_s30  ;;  %v6579_v45 = vld [vmem:[#allocation114_spill] sm:$0xff]  ;;  %v1824_v32 = vpop.permute.xlu1 %1823  ;;  %v1843_v8 = vpop.permute.xlu0 %1842  ;;  %v6585_v39 = vld [vmem:[#allocation133_spill] sm:$0xff]  ;;  %v6587_v44 = vld [vmem:[#allocation124_spill] sm:$0xff] }
 0x298   : > { %v2357_v11 = vrot.slane %v6577_v43, 1  ;;  %v2237_v63 = vmul.f32 %v6578_v31, %v5537_v25  ;;  %v1392_v60 = vadd.f32 %v6579_v45, %v1296_v28  ;;  %v1758_v26 = vadd.f32 %v5502_v12, %v1666_v35  ;;  %v6582_v12 = vld [vmem:[#allocation95_spill] sm:$0xff]  ;;  %v6586_v28 = vld [vmem:[#allocation122_spill] sm:$0xff]  ;;  %v6592_v0 = vld [vmem:[#allocation41_spill] sm:$0xff] }
 0x299   : > { %v1495_v15 = vsel %vm833_vm9, %v1493_v53, %v6576_v17  ;;  %v1734_v24 = vadd.f32 %v5475_v62, %v1642_v10  ;;  %v2374_v53 = vstv %s5564_s18  ;;  %v1107_v55 = vadd.f32 %v6580_v49, %v1015_v33  ;;  %v6590_v35 = vld [vmem:[#allocation126_spill] sm:$0xff]  ;;  %v6593_v45 = vld [vmem:[#allocation116_spill] sm:$0xff]  ;;  %v6595_v49 = vld [vmem:[#allocation17_spill] sm:$0xff] }
 0x29a   : > { %v2360_v58 = vsel %vm453_vm7, %v2357_v11, %v2359_v50  ;;  %v2244_v16 = vrot.slane %v5589_v20, 4  ;;  %v5625_v48 = vmul.f32 %v6566_v1, %v2374_v53  ;;  %v1429_v19 = vadd.f32 %v6581_v54, %v1346_v38 }
 0x29b   : > { %v1501_v42 = vadd.f32 %v1495_v15, %v1427_v46  ;;  %v1830_v62 = vadd.f32 %v1824_v32, %v1734_v24  ;;  %v5628_v51 = vadd.f32 %v1843_v8, %v1758_v26  ;;  %v1203_v2 = vadd.f32 %v6582_v12, %v1107_v55  ;;  %2363 = vrot.lane.b32.xlu0 %v2360_v58, %s2997_s5  ;;  %v1964_v9 = vpop.permute.xlu1 %1963  ;;  %v6594_v24 = vld [vmem:[#allocation119_spill] sm:$0xff]  ;;  %v6597_v12 = vld [vmem:[#allocation45_spill] sm:$0xff] }
 0x29c   : > { %v6583_v41 = vrot.slane %v5340_v37, 1  ;;  %v2243_v56 = vrot.slane %v2237_v63, 4  ;;  %v2350_v52 = vmul.f32 %v6578_v31, %v6584_v21  ;;  %v2375_v40 = vmul.f32 %v6578_v31, %v2374_v53  ;;  %v1912_v37 = vpop.permute.xlu0 %1911 }
 0x29d   : > { %v1465_v7 = vadd.f32 %v6585_v39, %v1392_v60  ;;  %v1457_v34 = vrot.slane %v6586_v28, 3  ;;  %v1574_v46 = vadd.f32 %v6587_v44, %v1501_v42  ;;  %v1295_v38 = vadd.f32 %v6588_v59, %v1203_v2 }
 0x29e   : > { %2415 = vrot.lane.b32.xlu1 %v6583_v41, %s2997_s5  ;;  %v6589_v4 = vrot.slane %v5356_v22, 4  ;;  %v2245_v10 = vsel %vm162_vm1, %v2243_v56, %v2244_v16  ;;  %v2382_v36 = vrot.slane %v5625_v48, 1  ;;  %v6591_v13 = vrot.slane %v6590_v35, 3  ;;  %v6598_v56 = vld [vmem:[#allocation125_spill] sm:$0xff] }
 0x29f   : > { %v1665_v17 = vadd.f32 %v6592_v0, %v1574_v46  ;;  %v1971_v15 = vadd.f32 %v1964_v9, %v1875_v6  ;;  %v5656_v43 = vadd.f32 %v1912_v37, %v1828_v5  ;;  %2248 = vrot.lane.b32.xlu0 %v2245_v10, %s2996_s30  ;;  %v2356_v27 = vrot.slane %v2350_v52, 1  ;;  %v1841_v6 = vpop.permute.xlu1 %1840 }
 0x2a0   : > { %v2293_v3 = vsel %vm162_vm1, %v6589_v4, %v2292_v61  ;;  %v1503_v33 = vadd.f32 %v6591_v13, %v1429_v19  ;;  %v2381_v22 = vrot.slane %v2375_v40, 1  ;;  %v2377_v61 = vmul.f32 %v5337_v23, %v2374_v53  ;;  %v1916_v5 = vpop.permute.xlu0 %1915  ;;  %v6596_v19 = vld [vmem:[#allocation135_spill] sm:$0xff] }
 0x2a1   : > { %v2445_v63 = vstv %s5613_s19  ;;  %v1536_v60 = vadd.f32 %v6593_v45, %v1465_v7  ;;  %v1391_v26 = vadd.f32 %v6594_v24, %v1295_v38  ;;  %v1757_v32 = vadd.f32 %v5416_v57, %v1665_v17  ;;  %v6600_v40 = vld [vmem:[#allocation139_spill] sm:$0xff] }
 0x2a2   : > { %2296 = vrot.lane.b32.xlu1 %v2293_v3, %s2996_s30  ;;  %v1576_v55 = vadd.f32 %v6595_v49, %v1503_v33  ;;  %v2358_v8 = vsel %vm453_vm7, %v2356_v27, %v2357_v11  ;;  %v2383_v58 = vsel %vm453_vm7, %v2381_v22, %v2382_v36  ;;  %v2239_v53 = vmul.f32 %v5337_v23, %v5537_v25 }
 0x2a3   : > { %v5675_v54 = vmul.f32 %v5337_v23, %v2445_v63  ;;  %v1617_v42 = vadd.f32 %v6596_v19, %v1536_v60  ;;  %v1849_v2 = vadd.f32 %v1841_v6, %v1757_v32  ;;  %v5679_v41 = vadd.f32 %v1916_v5, %v1830_v62  ;;  %2386 = vrot.lane.b32.xlu0 %v2383_v58, %s2997_s5  ;;  %v1845_v28 = vpop.permute.xlu1 %1844  ;;  %v6603_v60 = vld [vmem:[#allocation34_spill] sm:$0xff] }
 0x2a4   : > { %v1667_v57 = vadd.f32 %v6597_v12, %v1576_v55  ;;  %v6599_v11 = vrot.slane %v6598_v56, 3  ;;  %v2447_v25 = vmul.f32 %v6566_v1, %v2445_v63  ;;  %v1801_v44 = vpop.permute.xlu0 %1800  ;;  %v2384_v62 = vrot.slane %v2377_v61, 1 }
 0x2a5   : > { %v1709_v39 = vadd.f32 %v6600_v40, %v1617_v42  ;;  %v2246_v46 = vrot.slane %v2239_v53, 4  ;;  %v2455_v59 = vrot.slane %v5675_v54, 5  ;;  %v2328_v38 = vstv %s5651_s21 }
 0x2a6   : > { %v1459_v21 = vsel %vm833_vm9, %v1457_v34, %v6599_v11  ;;  %2361 = vrot.lane.b32.xlu1 %v2358_v8, %s2997_s5  ;;  %v1759_v7 = vadd.f32 %v5448_v47, %v1667_v57  ;;  %v2330_v37 = vmul.f32 %v6566_v1, %v2328_v38  ;;  %v2453_v4 = vrot.slane %v2447_v25, 5  ;;  %v6601_v47 = vld [vmem:[#allocation18_spill] sm:$0xff] }
 0x2a7   : > { %v1464_v52 = vadd.f32 %v1459_v21, %v1391_v26  ;;  %v5691_v9 = vadd.f32 %v1801_v44, %v1709_v39  ;;  %2390 = vrot.lane.b32.xlu0 %v2384_v62, %s2997_s5  ;;  %v2329_v10 = vmul.f32 %v6578_v31, %v2328_v38  ;;  %v2424_v35 = vstv %s5666_s0  ;;  %v1914_v13 = vpop.permute.xlu1 %1913 }
 0x2a8   : > { %v1851_v34 = vadd.f32 %v1845_v28, %v1759_v7  ;;  %v2056_v33 = vpop.permute.xlu0 %2055  ;;  %v2247_v0 = vsel %vm162_vm1, %v2244_v16, %v2246_v46  ;;  %v2456_v17 = vsel %vm429_vm8, %v2453_v4, %v2455_v59  ;;  %v2426_v27 = vmul.f32 %v6566_v1, %v2424_v35 }
 0x2a9   : > { %v1535_v3 = vadd.f32 %v6601_v47, %v1464_v52  ;;  %v1921_v22 = vadd.f32 %v1914_v13, %v5549_v29  ;;  %v2063_v61 = vadd.f32 %v2056_v33, %v1971_v15  ;;  %v2336_v45 = vrot.slane %v2330_v37, 1 }
 0x2aa   : > { %2365 = vrot.lane.b32.xlu1 %v2359_v50, %s2997_s5  ;;  %v2335_v26 = vrot.slane %v2329_v10, 1  ;;  %v2446_v20 = vmul.f32 %v6578_v31, %v2445_v63  ;;  %v2425_v16 = vmul.f32 %v6578_v31, %v2424_v35  ;;  %v2385_v1 = vsel %vm453_vm7, %v2382_v36, %v2384_v62 }
 0x2ab   : > { %v1616_v50 = vadd.f32 %v6602_v30, %v1535_v3  ;;  %2459 = vrot.lane.b32.xlu0 %v2456_v17, %s2997_s5  ;;  %v1799_v49 = vpop.permute.xlu1 %1798  ;;  %v2432_v6 = vrot.slane %v2426_v27, 5  ;;  %v2331_v31 = vmul.f32 %v5337_v23, %v2328_v38  ;;  %v2427_v56 = vmul.f32 %v5337_v23, %v2424_v35 }
 0x2ac   : > { %v1937_v55 = vpop.permute.xlu0 %1936  ;;  %v2337_v32 = vsel %vm453_vm7, %v2335_v26, %v2336_v45  ;;  %v2452_v5 = vrot.slane %v2446_v20, 5  ;;  %v2431_v8 = vrot.slane %v2425_v16, 5 }
 0x2ad   : > { %v1708_v24 = vadd.f32 %v6603_v60, %v1616_v50  ;;  %v1945_v15 = vadd.f32 %v1937_v55, %v1849_v2  ;;  %v2338_v2 = vrot.slane %v2331_v31, 1  ;;  %v2434_v40 = vrot.slane %v2427_v56, 5 }
 0x2ae   : > { %2250 = vrot.lane.b32.xlu1 %v2247_v0, %s2996_s30  ;;  %v2454_v36 = vsel %vm429_vm8, %v2452_v5, %v2453_v4  ;;  %v2433_v54 = vsel %vm429_vm8, %v2431_v8, %v2432_v6  ;;  %s2999_s30 = smov 16  }
 0x2af   : > { %v1804_v29 = vadd.f32 %v1799_v49, %v1708_v24  ;;  %2340 = vrot.lane.b32.xlu0 %v2337_v32, %s2997_s5  ;;  %v2054_v63 = vpop.permute.xlu1 %2053  ;;  %v2339_v52 = vsel %vm453_vm7, %v2336_v45, %v2338_v2  ;;  %v2435_v44 = vsel %vm429_vm8, %v2432_v6, %v2434_v40 }
 0x2b0   : > { %v1941_v58 = vpop.permute.xlu0 %1940  ;;  %v2062_v53 = vadd.f32 %v2054_v63, %v5574_v14 }
 0x2b1   : > { %v1947_v48 = vadd.f32 %v1941_v58, %v1851_v34 }
 0x2b2   : > { %2388 = vrot.lane.b32.xlu1 %v2385_v1, %s2997_s5 }
 0x2b3   : > { %2436 = vrot.lane.b32.xlu0 %v2433_v54, %s2997_s5  ;;  %v2058_v19 = vpop.permute.xlu1 %2057 }
 0x2b4   : > { %v2006_v42 = vpop.permute.xlu0 %2005  ;;  %v2064_v12 = vadd.f32 %v2058_v19, %v5598_v18 }
 0x2b5   : > { %v2013_v57 = vadd.f32 %v2006_v42, %v1921_v22 }
 0x2b6   : > { %2457 = vrot.lane.b32.xlu1 %v2454_v36, %s2997_s5 }
 0x2b7   : > { %v1939_v14 = vpop.permute.xlu1 %1938 }
 0x2b8   : > { %v1891_v11 = vpop.permute.xlu0 %1890  ;;  %v1946_v21 = vadd.f32 %v1939_v14, %v5628_v51 }
 0x2b9   : > { %v1896_v25 = vadd.f32 %v1891_v11, %v1804_v29 }
 0x2ba   : > { %2461 = vrot.lane.b32.xlu1 %v2455_v59, %s2997_s5 }
 0x2bb   : > { %v2004_v39 = vpop.permute.xlu1 %2003 }
 0x2bc   : > { %v2150_v7 = vpop.permute.xlu0 %2149  ;;  %v2012_v18 = vadd.f32 %v2004_v39, %v5656_v43 }
 0x2bd   : > { %v2158_v28 = vadd.f32 %v2150_v7, %v2062_v53 }
 0x2be   : > { %2342 = vrot.lane.b32.xlu1 %v2339_v52, %s2997_s5 }
 0x2bf   : > { %v2008_v23 = vpop.permute.xlu1 %2007 }
 0x2c0   : > { %v2154_v62 = vpop.permute.xlu0 %2153  ;;  %v2014_v46 = vadd.f32 %v2008_v23, %v5679_v41 }
 0x2c1   : > { %v2160_v51 = vadd.f32 %v2154_v62, %v2064_v12 }
 0x2c2   : > { %2438 = vrot.lane.b32.xlu1 %v2435_v44, %s2997_s5  ;;  %s3000_s5 = smov 32  }
 0x2c3   : > { %v1893_v59 = vpop.permute.xlu1 %1892 }
 0x2c4   : > { %v2031_v38 = vpop.permute.xlu0 %2030  ;;  %v1897_v34 = vadd.f32 %v1893_v59, %v5691_v9 }
 0x2c5   : > { %v5736_v37 = vadd.f32 %v2031_v38, %v1946_v21 }
 0x2c7   : > { %v2152_v4 = vpop.permute.xlu1 %2151 }
 0x2c8   : > { %v2100_v47 = vpop.permute.xlu0 %2099  ;;  %v2159_v3 = vadd.f32 %v2152_v4, %v2063_v61 }
 0x2c9   : > { %v5738_v43 = vadd.f32 %v2100_v47, %v2012_v18 }
 0x2cb   : > { %v2029_v10 = vpop.permute.xlu1 %2028 }
 0x2cc   : > { %v2104_v35 = vpop.permute.xlu0 %2103  ;;  %v2037_v13 = vadd.f32 %v2029_v10, %v1945_v15 }
 0x2cd   : > { %v5740_v33 = vadd.f32 %v2104_v35, %v2014_v46 }
 0x2cf   : > { %v2033_v0 = vpop.permute.xlu1 %2032 }
 0x2d0   : > { %v1989_v17 = vpop.permute.xlu0 %1988  ;;  %v2039_v41 = vadd.f32 %v2033_v0, %v1947_v48 }
 0x2d1   : > { %v5742_v27 = vadd.f32 %v1989_v17, %v1897_v34 }
 0x2d3   : > { %v2102_v30 = vpop.permute.xlu1 %2101 }
 0x2d4   : > { %v2226_v50 = vpop.permute.xlu0 %2225  ;;  %v5744_v9 = vadd.f32 %v2102_v30, %v2013_v57 }
 0x2d5   : > { %v2233_v22 = vadd.f32 %v2226_v50, %v2159_v3 }
 0x2d7   : > { %v1987_v45 = vpop.permute.xlu1 %1986 }
 0x2d8   : > { %v2125_v60 = vpop.permute.xlu0 %2124  ;;  %v5746_v61 = vadd.f32 %v1987_v45, %v1896_v25 }
 0x2d9   : > { %v2133_v24 = vadd.f32 %v2125_v60, %v2037_v13 }
 0x2db   : > { %v2224_v26 = vpop.permute.xlu1 %2223 }
 0x2dc   : > { %v2129_v20 = vpop.permute.xlu0 %2128  ;;  %v2232_v16 = vadd.f32 %v2224_v26, %v2158_v28 }
 0x2dd   : > { %v2135_v49 = vadd.f32 %v2129_v20, %v2039_v41 }
 0x2df   : > { %v2228_v55 = vpop.permute.xlu1 %2227 }
 0x2e0   : > { %v2186_v1 = vpop.permute.xlu0 %2185  ;;  %v2234_v52 = vadd.f32 %v2228_v55, %v2160_v51 }
 0x2e1   : > { %v2193_v26 = vadd.f32 %v2186_v1, %v5744_v9 }
 0x2e3   : > { %v2127_v29 = vpop.permute.xlu1 %2126 }
 0x2e4   : > { %v2079_v15 = vpop.permute.xlu0 %2078  ;;  %v2134_v50 = vadd.f32 %v2127_v29, %v5736_v37 }
 0x2e7   : > { %v2184_v32 = vpop.permute.xlu1 %2183 }
 0x2e8   : > { %v2316_v6 = vpop.permute.xlu0 %2315  ;;  %v2192_v20 = vadd.f32 %v2184_v32, %v5738_v43 }
 0x2e9   : > { %v2324_v14 = vadd.f32 %v2316_v6, %v2232_v16 }
 0x2eb   : > { %v2188_v5 = vpop.permute.xlu1 %2187 }
 0x2ed   : > { %v2320_v8 = vpop.permute.xlu0 %2319 }
 0x2ee   : > { %v2326_v39 = vadd.f32 %v2320_v8, %v2234_v52 }
 0x2ef   : > { %v5748_v63 = vpop.permute.xlu1 %2080 }
 0x2f1   : > { %v2206_v58 = vpop.permute.xlu0 %2205 }
 0x2f3   : > { %v2318_v31 = vpop.permute.xlu1 %2317 }
 0x2f4   : > { %v2325_v56 = vadd.f32 %v2318_v31, %v2233_v22 }
 0x2f5   : > { %v2270_v53 = vpop.permute.xlu0 %2269 }
 0x2f6   : > { %v2278_v31 = vadd.f32 %v2270_v53, %v2192_v20 }
 0x2f7   : > { %v2204_v48 = vpop.permute.xlu1 %2203 }
 0x2f8   : > { %v2212_v34 = vadd.f32 %v2204_v48, %v2133_v24  ;;  %v2213_v24 = vadd.f32 %v2206_v58, %v2134_v50 }
 0x2f9   : > { %v2274_v36 = vpop.permute.xlu0 %2273 }
 0x2fb   : > { %v2208_v54 = vpop.permute.xlu1 %2207 }
 0x2fc   : > { %v2214_v35 = vadd.f32 %v2208_v54, %v2135_v49  ;;  %v2084_v49 = vadd.f32 %v2079_v15, %v5746_v61 }
 0x2fd   : > { %v5750_v19 = vpop.permute.xlu0 %2169 }
 0x2ff   : > { %v2272_v42 = vpop.permute.xlu1 %2271 }
 0x300   : > { %v2279_v16 = vadd.f32 %v2272_v42, %v2193_v26 }
 0x301   : > { %v2414_v12 = vpop.permute.xlu0 %2413 }
 0x302   : > { %v2421_v11 = vadd.f32 %v2414_v12, %v2325_v56  ;;  %v2194_v12 = vadd.f32 %v2188_v5, %v5740_v33 }
 0x303   : > { %v2168_v57 = vpop.permute.xlu1 %2167 }
 0x304   : > { %v2485_v7 = vrot.slane %v2421_v11, 1  ;;  %v2173_v37 = vadd.f32 %v2168_v57, %v2084_v49 }
 0x305   : > { %v2295_v2 = vpop.permute.xlu0 %2294 }
 0x306   : > { %v2303_v47 = vadd.f32 %v2295_v2, %v2212_v34 }
 0x307   : > { %v2412_v21 = vpop.permute.xlu1 %2411 }
 0x308   : > { %v2420_v40 = vadd.f32 %v2412_v21, %v2324_v14  ;;  %v2280_v14 = vadd.f32 %v2274_v36, %v2194_v12  ;;  %v2085_v36 = vadd.f32 %v5748_v63, %v5742_v27 }
 0x309   : > { %v2299_v25 = vpop.permute.xlu0 %2298 }
 0x30a   : > { %v2484_v18 = vrot.slane %v2420_v40, 1  ;;  %v2305_v13 = vadd.f32 %v2299_v25, %v2214_v35  ;;  %v2998_v35 = vmov 1966171168  }
 0x30c   : > { %v2486_v62 = vsel %vm453_vm7, %v2484_v18, %v2485_v7 }
 0x30d   : > { %v2364_v44 = vpop.permute.xlu0 %2363 }
 0x30e   : > { %v2371_v48 = vadd.f32 %v2364_v44, %v2279_v16 }
 0x310   : > { %v2416_v28 = vpop.permute.xlu1 %2415 }
 0x311   : > { %v2422_v23 = vadd.f32 %v2416_v28, %v2326_v39  ;;  %v2249_v38 = vpop.permute.xlu0 %2248 }
 0x312   : > { %v2254_v9 = vadd.f32 %v2249_v38, %v2173_v37 }
 0x313   : > { %v2487_v46 = vrot.slane %v2422_v23, 1 }
 0x314   : > { %v2297_v59 = vpop.permute.xlu1 %2296 }
 0x315   : > { %v2488_v4 = vsel %vm453_vm7, %v2485_v7, %v2487_v46  ;;  %v2387_v10 = vpop.permute.xlu0 %2386  ;;  %v2304_v55 = vadd.f32 %v2297_v59, %v2213_v24  ;;  %v2174_v7 = vadd.f32 %v5750_v19, %v2085_v36  ;;  %v2526_v19 = vunpack.c.l.s4 %v2998_v35 }
 0x316   : > { %v2395_v51 = vadd.f32 %v2387_v10, %v2303_v47  ;;  %v2519_v10 = vlaneseq }
 0x318   : > { %v2362_v3 = vpop.permute.xlu1 %2361  ;;  %v2492_v0 = vadd.f32 %v2486_v62, %v2395_v51  ;;  %v2527_v51 = vunpack.c.0.s8 %v2526_v19  ;;  %vm2521_vm10 = vcmp.lt.s32.totalorder %v2519_v10, 16  ;;  %vm5772_vm11 = vcmp.ge.s32.totalorder %v2519_v10, 16 }
 0x319   : > { %v2391_v41 = vpop.permute.xlu0 %2390  ;;  %v2370_v29 = vadd.f32 %v2362_v3, %v2278_v31  ;;  %vm5777_vm12 = vcmp.lt.s32.totalorder %v2519_v10, 32  ;;  %vm5786_vm14 = vcmp.ge.s32.totalorder %v2519_v10, 32  ;;  %vm5791_vm15 = vcmp.lt.s32.totalorder %v2519_v10, 48 }
 0x31a   : > { %v2397_v30 = vadd.f32 %v2391_v41, %v2305_v13  ;;  %v2498_v58 = vrot.slane %v2492_v0, 2  ;;  %v5767_v13 = vshrl.u32 %v2519_v10, 7  ;;  %vm2552_vm13 = vmand %vm5772_vm11, %vm5777_vm12  ;;  %vm5805_vm1 = vcmp.ge.s32.totalorder %v2519_v10, 48 }
 0x31b   : > { %vm2560_vm0 = vmand %vm5786_vm14, %vm5791_vm15  ;;  %vm5810_vm2 = vcmp.lt.s32.totalorder %v2519_v10, 64  ;;  %vm5824_vm4 = vcmp.ge.s32.totalorder %v2519_v10, 64  ;;  %vm5853_vm8 = vcmp.lt.s32.totalorder %v2519_v10, 96  ;;  %vm5877_vm11 = vcmp.lt.s32.totalorder %v2519_v10, 112 }
 0x31c   : > { %v2366_v17 = vpop.permute.xlu1 %2365  ;;  %v2494_v22 = vadd.f32 %v2487_v46, %v2397_v30  ;;  %v2530_v41 = vsub.s32 %v2527_v51, %v5767_v13  ;;  %vm2568_vm3 = vmand %vm5805_vm1, %vm5810_vm2  ;;  %vm2620_vm14 = vcmp.lt.s32.totalorder %v2519_v10, 128 }
 0x31d   : > { %v2460_v60 = vpop.permute.xlu0 %2459  ;;  %v2372_v61 = vadd.f32 %v2366_v17, %v2280_v14 }
 0x31e   : > { %v2467_v2 = vadd.f32 %v2460_v60, %v2371_v48  ;;  %v2501_v43 = vrot.slane %v2494_v22, 2 }
 0x320   : > { %v2251_v45 = vpop.permute.xlu1 %2250  ;;  %v2473_v21 = vrot.slane %v2467_v2, 1 }
 0x321   : > { %v2341_v8 = vpop.permute.xlu0 %2340  ;;  %v2255_v23 = vadd.f32 %v2251_v45, %v2174_v7 }
 0x322   : > { %v2346_v15 = vadd.f32 %v2341_v8, %v2254_v9 }
 0x324   : > { %v2389_v6 = vpop.permute.xlu1 %2388 }
 0x325   : > { %v2396_v54 = vadd.f32 %v2389_v6, %v2304_v55  ;;  %v2437_v11 = vpop.permute.xlu0 %2436 }
 0x326   : > { %v2442_v5 = vadd.f32 %v2437_v11, %v2346_v15 }
 0x327   : > { %v2493_v56 = vadd.f32 %v2488_v4, %v2396_v54 }
 0x328   : > { %v2458_v1 = vpop.permute.xlu1 %2457 }
 0x329   : > { %v2499_v32 = vrot.slane %v2493_v56, 2  ;;  %v2466_v42 = vadd.f32 %v2458_v1, %v2370_v29 }
 0x32b   : > { %v2472_v53 = vrot.slane %v2466_v42, 1  ;;  %v2500_v25 = vsel %vm643_vm5, %v2498_v58, %v2499_v32  ;;  %v2502_v33 = vsel %vm643_vm5, %v2499_v32, %v2501_v43  ;;  %vm5829_vm5 = vcmp.lt.s32.totalorder %v2519_v10, 80 }
 0x32c   : > { %v2462_v57 = vpop.permute.xlu1 %2461  ;;  %vm2590_vm6 = vmand %vm5824_vm4, %vm5829_vm5 }
 0x32d   : > { %v2474_v52 = vsel %vm453_vm7, %v2472_v53, %v2473_v21  ;;  %v2468_v40 = vadd.f32 %v2462_v57, %v2372_v61 }
 0x32e   : > { %v2479_v39 = vadd.f32 %v2474_v52, %v2442_v5 }
 0x32f   : > { %v2475_v18 = vrot.slane %v2468_v40, 1 }
 0x330   : > { %v2505_v28 = vadd.f32 %v2500_v25, %v2479_v39  ;;  %v2343_v44 = vpop.permute.xlu1 %2342 }
 0x331   : > { %v2476_v62 = vsel %vm453_vm7, %v2473_v21, %v2475_v18  ;;  %v2347_v59 = vadd.f32 %v2343_v44, %v2255_v23  ;;  %vm5848_vm7 = vcmp.ge.s32.totalorder %v2519_v10, 80 }
 0x332   : > { %v2891_v46 = vmul.f32 -1.442695, %v2505_v28  ;;  %vm2605_vm9 = vmand %vm5848_vm7, %vm5853_vm8 }
 0x334   : > { %2940 = vpow2.f32 %v2891_v46  ;;  %v2439_v38 = vpop.permute.xlu1 %2438 }
 0x335   : > { %v2443_v34 = vadd.f32 %v2439_v38, %v2347_v59 }
 0x337   : > { %v2480_v4 = vadd.f32 %v2476_v62, %v2443_v34 }
 0x339   : > { %v2506_v47 = vadd.f32 %v2502_v33, %v2480_v4 }
 0x33b   : > { %v2892_v27 = vmul.f32 -1.442695, %v2506_v47 }
 0x33d   : > { %2942 = vpow2.f32 %v2892_v27 }
 0x33e   : > { %v2941_v63 = vpop.eup %2940 }
 0x33f   : > { %v2513_v3 = vadd.f32 1.0, %v2941_v63  ;;  %v2706_v63 = vsub.s32 0, %v5767_v13 }
 0x341   : > { %2944 = vrcp.f32 %v2513_v3  ;;  %v2710_v3 = vsub.s32 1, %v5767_v13 }
 0x347   : > { %v2943_v0 = vpop.eup %2942 }
 0x348   : > { %v2514_v17 = vadd.f32 1.0, %v2943_v0  ;;  %v2954_v0 = vld [vmem:[%s6629_s14] sm:$0xff] }
 0x34a   : > { %2946 = vrcp.f32 %v2514_v17 }
 0x34b   : > { %v2945_v30 = vpop.eup %2944 }
 0x34c   : > { %v2531_v50 = vrot.slane %v2945_v30, %v2530_v41  ;;  %2523 = vst.msk [vmem:[#allocation3] sm:$0x1] %vm2521_vm10, %v2945_v30  ;;  %v2570_v20 = vcombine.high %v2945_v30, %v2945_v30 }
 0x34e   : > { %v2532_v22 = vcombine.high %v2531_v50, %v2531_v50  ;;  %v2539_v60 = vrot.slane %v2531_v50, %v2530_v41  ;;  %v2577_v6 = vrot.slane %v2570_v20, %v2530_v41 }
 0x350   : > { %v2546_v45 = vrot.slane %v2532_v22, %v2530_v41  ;;  %v2554_v24 = vcombine.high %v2539_v60, %v2539_v60  ;;  %v2584_v48 = vrot.slane %v2577_v6, %v2530_v41  ;;  %v2592_v54 = vcombine.high %v2577_v6, %v2577_v6 }
 0x352   : > { %2547 = vrot.lane.b32.xlu0 %v2546_v45, %s2999_s30  ;;  %v2562_v49 = vcombine.high %v2546_v45, %v2546_v45  ;;  %v2599_v29 = vrot.slane %v2592_v54, %v2530_v41  ;;  %v2607_v14 = vcombine.high %v2584_v48, %v2584_v48 }
 0x354   : > { %v2947_v26 = vpop.eup %2946  ;;  %v2615_v58 = vcombine.high %v2599_v29, %v2599_v29 }
 0x355   : > { %v2631_v16 = vrot.slane %v2947_v26, %v2530_v41  ;;  %2623 = vst.msk [vmem:[#allocation3 + $0x1] sm:$0x1] %vm2521_vm10, %v2947_v26  ;;  %v2661_v37 = vcombine.high %v2947_v26, %v2947_v26  ;;  %vm5872_vm10 = vcmp.ge.s32.totalorder %v2519_v10, 96 }
 0x356   : > { %2555 = vrot.lane.b32.xlu0 %v2554_v24, %s3000_s5  ;;  %vm2613_vm12 = vmand %vm5872_vm10, %vm5877_vm11 }
 0x357   : > { %v2632_v55 = vcombine.high %v2631_v16, %v2631_v16  ;;  %v2639_v31 = vrot.slane %v2631_v16, %v2530_v41  ;;  %v2668_v56 = vrot.slane %v2661_v37, %v2530_v41 }
 0x359   : > { %v2646_v8 = vrot.slane %v2632_v55, %v2530_v41  ;;  %v2651_v12 = vcombine.high %v2639_v31, %v2639_v31  ;;  %v2675_v9 = vrot.slane %v2668_v56, %v2530_v41  ;;  %v2680_v1 = vcombine.high %v2668_v56, %v2668_v56 }
 0x35a   : > { %2563 = vrot.lane.b32.xlu0 %v2562_v49, %s3001_s9 }
 0x35b   : > { %2647 = vrot.lane.b32.xlu1 %v2646_v8, %s2999_s30  ;;  %v2656_v2 = vcombine.high %v2646_v8, %v2646_v8  ;;  %v2687_v43 = vrot.slane %v2680_v1, %v2530_v41  ;;  %v2692_v32 = vcombine.high %v2675_v9, %v2675_v9 }
 0x35d   : > { %v2697_v42 = vcombine.high %v2687_v43, %v2687_v43 }
 0x35e   : > { %2585 = vrot.lane.b32.xlu0 %v2584_v48, %s3002_s1 }
 0x35f   : > { %2652 = vrot.lane.b32.xlu1 %v2651_v12, %s3000_s5 }
 0x362   : > { %2600 = vrot.lane.b32.xlu0 %v2599_v29, %s3003_s2 }
 0x363   : > { %2657 = vrot.lane.b32.xlu1 %v2656_v2, %s3001_s9 }
 0x366   : > { %2608 = vrot.lane.b32.xlu0 %v2607_v14, %s3004_s17 }
 0x367   : > { %2676 = vrot.lane.b32.xlu1 %v2675_v9, %s3002_s1 }
 0x36a   : > { %2616 = vrot.lane.b32.xlu0 %v2615_v58, %s3005_s20 }
 0x36b   : > { %2688 = vrot.lane.b32.xlu1 %v2687_v43, %s3003_s2 }
 0x36f   : > { %2693 = vrot.lane.b32.xlu1 %v2692_v32, %s3004_s17 }
 0x373   : > { %2698 = vrot.lane.b32.xlu1 %v2697_v42, %s3005_s20 }
 0x3c4   : > { %v2548_v53 = vpop.permute.xlu0 %2547 }
 0x3c5   : > { %2553 = vst.msk [vmem:[#allocation3] sm:$0x1] %vm2552_vm13, %v2548_v53 }
 0x3c8   : > { %v2556_v5 = vpop.permute.xlu0 %2555 }
 0x3c9   : > { %2561 = vst.msk [vmem:[#allocation3] sm:$0x1] %vm2560_vm0, %v2556_v5 }
 0x3cc   : > { %v2564_v52 = vpop.permute.xlu0 %2563 }
 0x3cd   : > { %2569 = vst.msk [vmem:[#allocation3] sm:$0x1] %vm2568_vm3, %v2564_v52  ;;  %v2648_v40 = vpop.permute.xlu1 %2647 }
 0x3ce   : > { %2650 = vst.msk [vmem:[#allocation3 + $0x1] sm:$0x1] %vm2552_vm13, %v2648_v40  ;;  %vm2619_vm13 = vcmp.ge.s32.totalorder %v2519_v10, 112 }
 0x3cf   : > { %vm2621_vm15 = vmand %vm2619_vm13, %vm2620_vm14 }
 0x3d0   : > { %v2586_v18 = vpop.permute.xlu0 %2585 }
 0x3d1   : > { %2591 = vst.msk [vmem:[#allocation3] sm:$0x1] %vm2590_vm6, %v2586_v18  ;;  %v2653_v28 = vpop.permute.xlu1 %2652 }
 0x3d2   : > { %2655 = vst.msk [vmem:[#allocation3 + $0x1] sm:$0x1] %vm2560_vm0, %v2653_v28 }
 0x3d4   : > { %v2601_v62 = vpop.permute.xlu0 %2600 }
 0x3d5   : > { %2606 = vst.msk [vmem:[#allocation3] sm:$0x1] %vm2605_vm9, %v2601_v62  ;;  %v2658_v46 = vpop.permute.xlu1 %2657 }
 0x3d6   : > { %2660 = vst.msk [vmem:[#allocation3 + $0x1] sm:$0x1] %vm2568_vm3, %v2658_v46 }
 0x3d8   : > { %v2609_v59 = vpop.permute.xlu0 %2608 }
 0x3d9   : > { %2614 = vst.msk [vmem:[#allocation3] sm:$0x1] %vm2613_vm12, %v2609_v59  ;;  %v2677_v38 = vpop.permute.xlu1 %2676 }
 0x3da   : > { %2679 = vst.msk [vmem:[#allocation3 + $0x1] sm:$0x1] %vm2590_vm6, %v2677_v38 }
 0x3dc   : > { %v2617_v34 = vpop.permute.xlu0 %2616 }
 0x3dd   : > { %2622 = vst.msk [vmem:[#allocation3] sm:$0x1] %vm2621_vm15, %v2617_v34  ;;  %v2689_v4 = vpop.permute.xlu1 %2688 }
 0x3de   : > { %2691 = vst.msk [vmem:[#allocation3 + $0x1] sm:$0x1] %vm2605_vm9, %v2689_v4 }
 0x3e1   : > { %v2694_v47 = vpop.permute.xlu1 %2693 }
 0x3e2   : > { %2696 = vst.msk [vmem:[#allocation3 + $0x1] sm:$0x1] %vm2613_vm12, %v2694_v47 }
 0x3e5   : > { %v2699_v27 = vpop.permute.xlu1 %2698 }
 0x3e6   : > { %2701 = vst.msk [vmem:[#allocation3 + $0x1] sm:$0x1] %vm2621_vm15, %v2699_v27 }
 0x3ed   : > { %v2702_v10 = vld [vmem:[#allocation3] sm:$0x3] }
 0x3ee   : > { %v2707_v35 = vrot.slane %v2702_v10, %v2706_v63  ;;  %v2711_v19 = vrot.slane %v2702_v10, %v2710_v3 }
 0x3f0   : > { %v2712_v51 = vcombine.low %v2707_v35, %v2711_v19 }
 0x3f2   : > { %v2714_v17 = vmul.f32 %v2954_v0, %v2712_v51 }
 0x3f4   : > { %2715 = vst [vmem:[%s157_s27] sm:$0xff] %v2714_v17 }
 0x3f5 PF: > { %s6632_s28 = sld [smem:[#allocation7_spill]] }
 0x3fb   : > { %s13_s9 = sadd.s32 1, %s6632_s28  }
 0x3fc   : > { %p10_p1 = scmp.ge.s32.totalorder %s13_s9, 4  }
 0x3fe   :  { %12 = sbr.rel (!%p10_p1) target bundleno = 5 (0x5), region = 64 }
 0x405   :  { %2737 = vsyncpa [#allocation5], 1 }
 0x406   :  { %2739 = vsyncpa [#allocation5 + $0x1], 1 }

</bundles_post_ra>
